<compile_context>
chip_gen: v6e
topology: v6e:2x2x1
jax: 0.10.0
libtpu: 0.0.40
codegen_flags: <defaults>
</compile_context>

<pallas_src>
import jax
import jax.numpy as jnp
from jax.experimental import pallas as pl
from jax.experimental.pallas import tpu as pltpu

EPS = 1e-5
LANE = 128
SUB = 8


def _round_up(x, m):
    return (x + m - 1) // m * m


def _make_kernels(H, W, Wq, Cp):
    """Build the three kernel bodies as closures over static tile dims."""
    K3 = 3 * Cp
    inv_hw = 1.0 / float(H * W)

    def pad_tile(v):
        # (H, W, Cp) bf16 -> (H+2, Wq, Cp): zero halo rows 0 / H+1, zero cols >= W.
        # Every piece is sublane(8)/lane(128)-aligned -> dense, unmasked stores.
        zrow = jnp.zeros((1, Wq, Cp), jnp.bfloat16)
        body = jnp.concatenate(
            [v, jnp.zeros((H, Wq - W, Cp), jnp.bfloat16)], axis=1)
        return jnp.concatenate([zrow, body, zrow], axis=0)

    def conv3x3(xpad, w_ref):
        # xpad:  (H+2, Wq, Cp) bf16, zero rows 0/H+1 and zero cols >= W.
        # w_ref: (9*Cp, Cp) bf16 ref, row index = kw*(3*Cp) + kh*Cp + cin.
        # im2col over kh only: leading-axis slices + lane-axis concat (aligned).
        slab = jnp.concatenate(
            [xpad[kh:kh + H, :, :] for kh in range(3)], axis=-1
        ).reshape(H * Wq, K3)
        # Three K=3*Cp MXU matmuls with f32 accumulation (one per kw group).
        p = [jnp.dot(slab, w_ref[pl.ds(kw * K3, K3), :],
                     preferred_element_type=jnp.float32).reshape(H, Wq, Cp)
             for kw in range(3)]
        # +/-1 column (kw) shifts applied to the f32 partials on the XLU; the
        # wrapped-in columns come from the zero region >= W, so halos are exact.
        conv = pltpu.roll(p[0], 1, 1) + p[1] + pltpu.roll(p[2], Wq - 1, 1)
        return conv[:, 0:W, :]                                  # (H, W, Cp) f32

    def tile_stats(v):
        # Per-tile channel sum + centered second moment (stable two-pass form).
        s = jnp.sum(v, axis=(0, 1))[None, :]                    # (1, Cp)
        d = v - s * inv_hw
        m2 = jnp.sum(d * d, axis=(0, 1))[None, :]               # (1, Cp)
        return s, m2

    def conv1_kernel(x_ref, w_ref, raw_ref, sum_ref, m2_ref):
        conv = conv3x3(pad_tile(x_ref[...]), w_ref)
        s, m2 = tile_stats(conv)
        sum_ref[...] = s
        m2_ref[...] = m2
        raw_ref[...] = conv.astype(jnp.bfloat16)

    def conv2_kernel(raw1_ref, sc_ref, sh_ref, w_ref, raw2_ref, sum_ref, m2_ref):
        h = jnp.maximum(
            raw1_ref[...].astype(jnp.float32) * sc_ref[...] + sh_ref[...], 0.0)
        conv = conv3x3(pad_tile(h.astype(jnp.bfloat16)), w_ref)
        s, m2 = tile_stats(conv)
        sum_ref[...] = s
        m2_ref[...] = m2
        raw2_ref[...] = conv.astype(jnp.bfloat16)

    def out_kernel(raw2_ref, id_ref, sc_ref, sh_ref, out_ref):
        y = (raw2_ref[...].astype(jnp.float32) * sc_ref[...] + sh_ref[...]
             + id_ref[...])
        out_ref[...] = jnp.maximum(y, 0.0).astype(jnp.bfloat16)

    return conv1_kernel, conv2_kernel, out_kernel


def _bn_affine(csum, cm2, gamma, beta, n_pix):
    """Combine per-image (sum, centered M2) into BN scale/shift (Chan's formula)."""
    csum = csum.reshape(csum.shape[0], -1)                      # (N, Cp)
    cm2 = cm2.reshape(cm2.shape[0], -1)
    n_img = csum.shape[0]
    total = float(n_pix * n_img)
    mean = jnp.sum(csum, axis=0) / total
    m_i = csum / float(n_pix)
    var = (jnp.sum(cm2, axis=0)
           + float(n_pix) * jnp.sum((m_i - mean) ** 2, axis=0)) / total
    scale = gamma * jax.lax.rsqrt(var + EPS)
    shift = beta - mean * scale
    return scale.reshape(1, -1), shift.reshape(1, -1)


@jax.jit
def basic_block(x_nchw, w1_oihw, w2_oihw, g1, b1, g2, b2):
    """Pallas BasicBlock forward. x_nchw: (N, C, H, W) f32; weights torch OIHW."""
    N, Cin, H, W = x_nchw.shape
    Cout = w1_oihw.shape[0]
    assert Cin == Cout, "downsample=None requires in_channels == out_channels"

    Cp = max(LANE, _round_up(Cout, LANE))
    Wq = _round_up(W + 2, SUB)            # >= W+2 zero columns -> exact roll halos
    n_pix = H * W

    # Conv-input path: cast to bf16 *before* the layout change, NCHW->NHWC, pad C.
    xb = jnp.transpose(x_nchw.astype(jnp.bfloat16), (0, 2, 3, 1))
    xb = jnp.pad(xb, ((0, 0), (0, 0), (0, 0), (0, Cp - Cin)))
    # Residual identity stays f32; only read by the final kernel.
    ident = jnp.pad(jnp.transpose(x_nchw, (0, 2, 3, 1)),
                    ((0, 0), (0, 0), (0, 0), (0, Cp - Cin)))

    def prep_w(w):
        # torch OIHW -> rows ordered (kw, kh, cin) -> (9*Cp, Cp) bf16.
        w = jnp.pad(w.astype(jnp.bfloat16),
                    ((0, Cp - Cout), (0, Cp - Cin), (0, 0), (0, 0)))
        return jnp.transpose(w, (3, 2, 1, 0)).reshape(9 * Cp, Cp)

    def prep_v(v):
        return jnp.pad(v.astype(jnp.float32), (0, Cp - Cout))

    w1f, w2f = prep_w(w1_oihw), prep_w(w2_oihw)
    g1p, b1p, g2p, b2p = prep_v(g1), prep_v(b1), prep_v(g2), prep_v(b2)

    conv1_kernel, conv2_kernel, out_kernel = _make_kernels(H, W, Wq, Cp)

    img_spec = pl.BlockSpec((None, H, W, Cp), lambda i: (i, 0, 0, 0))
    stat_spec = pl.BlockSpec((None, 1, Cp), lambda i: (i, 0, 0))
    w_spec = pl.BlockSpec((9 * Cp, Cp), lambda i: (0, 0))
    aff_spec = pl.BlockSpec((1, Cp), lambda i: (0, 0))
    cparams = pltpu.CompilerParams(dimension_semantics=("parallel",))

    stat_shape = jax.ShapeDtypeStruct((N, 1, Cp), jnp.float32)
    img_shape = jax.ShapeDtypeStruct((N, H, W, Cp), jnp.bfloat16)

    # --- call A: conv1 + per-image BN1 stats --------------------------------
    raw1, s1, m21 = pl.pallas_call(
        conv1_kernel,
        grid=(N,),
        in_specs=[img_spec, w_spec],
        out_specs=(img_spec, stat_spec, stat_spec),
        out_shape=(img_shape, stat_shape, stat_shape),
        compiler_params=cparams,
    )(xb, w1f)
    scale1, shift1 = _bn_affine(s1, m21, g1p, b1p, n_pix)

    # --- call B: bn1 + relu + conv2 + per-image BN2 stats -------------------
    raw2, s2, m22 = pl.pallas_call(
        conv2_kernel,
        grid=(N,),
        in_specs=[img_spec, aff_spec, aff_spec, w_spec],
        out_specs=(img_spec, stat_spec, stat_spec),
        out_shape=(img_shape, stat_shape, stat_shape),
        compiler_params=cparams,
    )(raw1, scale1, shift1, w2f)
    scale2, shift2 = _bn_affine(s2, m22, g2p, b2p, n_pix)

    # --- call C: bn2 + residual add + relu ----------------------------------
    out_p = pl.pallas_call(
        out_kernel,
        grid=(N,),
        in_specs=[img_spec, img_spec, aff_spec, aff_spec],
        out_specs=img_spec,
        out_shape=img_shape,
        compiler_params=cparams,
    )(raw2, ident, scale2, shift2)

    # Drop channel padding, back to NCHW, f32 (the module's output dtype).
    return jnp.transpose(out_p[..., :Cout].astype(jnp.float32), (0, 3, 1, 2))


def basic_block_ref(x, w1, w2, g1, b1, g2, b2):
    """Pure-JAX f32 reference mirroring the PyTorch forward (NCHW, train-mode BN)."""
    def conv(x, w):
        return jax.lax.conv_general_dilated(
            x, w, (1, 1), ((1, 1), (1, 1)),
            dimension_numbers=('NCHW', 'OIHW', 'NCHW'))

    def bn(x, g, b):
        mean = x.mean(axis=(0, 2, 3), keepdims=True)
        var = ((x - mean) ** 2).mean(axis=(0, 2, 3), keepdims=True)
        return ((x - mean) * jax.lax.rsqrt(var + EPS)
                * g.reshape(1, -1, 1, 1) + b.reshape(1, -1, 1, 1))

    h = jax.nn.relu(bn(conv(x, w1), g1, b1))
    y = bn(conv(h, w2), g2, b2)
    return jax.nn.relu(y + x)


if __name__ == "__main__":
    key = jax.random.PRNGKey(0)
    kx, kw1, kw2, kg1, kb1, kg2, kb2 = jax.random.split(key, 7)

    N, C, H, W = 2, 4, 16, 16
    x = jax.random.normal(kx, (N, C, H, W), jnp.float32)
    w1 = jax.random.normal(kw1, (C, C, 3, 3), jnp.float32) * 0.1
    w2 = jax.random.normal(kw2, (C, C, 3, 3), jnp.float32) * 0.1
    g1 = 1.0 + 0.1 * jax.random.normal(kg1, (C,), jnp.float32)
    b1 = 0.1 * jax.random.normal(kb1, (C,), jnp.float32)
    g2 = 1.0 + 0.1 * jax.random.normal(kg2, (C,), jnp.float32)
    b2 = 0.1 * jax.random.normal(kb2, (C,), jnp.float32)

    out = jax.block_until_ready(basic_block(x, w1, w2, g1, b1, g2, b2))
    ref = jax.block_until_ready(basic_block_ref(x, w1, w2, g1, b1, g2, b2))

    assert out.shape == (N, C, H, W)
    # bf16 MXU inputs / bf16 HBM intermediates (f32 accumulation + f32 BN math)
    # vs. a pure-f32 reference.
    assert bool(jnp.allclose(out, ref, rtol=3e-2, atol=3e-2)), "mismatch vs reference"

    print("KERNEL_OK")
</pallas_src>

<mosaic_0001>
module attributes {stable_mosaic.version = 11 : i64} {
  func.func @conv2_kernel(%arg0: i32, %arg1: memref<1x16x16x128xbf16, #tpu.memory_space<vmem>>, %arg2: memref<1x128xf32, #tpu.memory_space<vmem>>, %arg3: memref<1x128xf32, #tpu.memory_space<vmem>>, %arg4: memref<1152x128xbf16, #tpu.memory_space<vmem>>, %arg5: memref<1x16x16x128xbf16, #tpu.memory_space<vmem>>, %arg6: memref<1x1x128xf32, #tpu.memory_space<vmem>>, %arg7: memref<1x1x128xf32, #tpu.memory_space<vmem>>) attributes {dimension_semantics = [#tpu.dimension_semantics<parallel>], iteration_bounds = array<i64: 2>, scalar_prefetch = 0 : i64, scratch_operands = 0 : i64, tpu.core_type = #tpu.core_type<tc>, window_params = [{transform_indices = @transform_0, window_bounds = array<i64: 1, 16, 16, 128>}, {pipeline_mode = #tpu.pipeline_mode<synchronous>, transform_indices = @transform_1, window_bounds = array<i64: 1, 128>}, {pipeline_mode = #tpu.pipeline_mode<synchronous>, transform_indices = @transform_2, window_bounds = array<i64: 1, 128>}, {pipeline_mode = #tpu.pipeline_mode<synchronous>, transform_indices = @transform_3, window_bounds = array<i64: 1152, 128>}, {transform_indices = @transform_4, window_bounds = array<i64: 1, 16, 16, 128>}, {transform_indices = @transform_5, window_bounds = array<i64: 1, 1, 128>}, {transform_indices = @transform_6, window_bounds = array<i64: 1, 1, 128>}]} {
    %c0 = arith.constant 0 : index
    %c0_0 = arith.constant 0 : index
    %c0_1 = arith.constant 0 : index
    %c0_2 = arith.constant 0 : index
    %0 = vector.load %arg1[%c0, %c0_0, %c0_1, %c0_2] : memref<1x16x16x128xbf16, #tpu.memory_space<vmem>>, vector<1x16x16x128xbf16>
    %1 = vector.shape_cast %0 : vector<1x16x16x128xbf16> to vector<16x16x128xbf16>
    %2 = arith.extf %1 : vector<16x16x128xbf16> to vector<16x16x128xf32>
    %c0_3 = arith.constant 0 : index
    %c0_4 = arith.constant 0 : index
    %3 = vector.load %arg2[%c0_3, %c0_4] : memref<1x128xf32, #tpu.memory_space<vmem>>, vector<1x128xf32>
    %4 = vector.shape_cast %3 : vector<1x128xf32> to vector<1x1x128xf32>
    %5 = vector.broadcast %4 : vector<1x1x128xf32> to vector<16x16x128xf32>
    %6 = arith.mulf %2, %5 : vector<16x16x128xf32>
    %c0_5 = arith.constant 0 : index
    %c0_6 = arith.constant 0 : index
    %7 = vector.load %arg3[%c0_5, %c0_6] : memref<1x128xf32, #tpu.memory_space<vmem>>, vector<1x128xf32>
    %8 = vector.shape_cast %7 : vector<1x128xf32> to vector<1x1x128xf32>
    %9 = vector.broadcast %8 : vector<1x1x128xf32> to vector<16x16x128xf32>
    %10 = arith.addf %6, %9 : vector<16x16x128xf32>
    %cst = arith.constant 0.000000e+00 : f32
    %11 = vector.broadcast %cst : f32 to vector<16x16x128xf32>
    %12 = arith.maximumf %10, %11 : vector<16x16x128xf32>
    %13 = arith.truncf %12 : vector<16x16x128xf32> to vector<16x16x128xbf16>
    %cst_7 = arith.constant 0.000000e+00 : bf16
    %14 = vector.broadcast %cst_7 : bf16 to vector<1x24x128xbf16>
    %cst_8 = arith.constant 0.000000e+00 : bf16
    %15 = vector.broadcast %cst_8 : bf16 to vector<16x8x128xbf16>
    %16 = tpu.concatenate %13, %15 in 1 : vector<16x16x128xbf16>, vector<16x8x128xbf16> -> vector<16x24x128xbf16>
    %17 = tpu.concatenate %14, %16, %14 in 0 : vector<1x24x128xbf16>, vector<16x24x128xbf16>, vector<1x24x128xbf16> -> vector<18x24x128xbf16>
    %18 = vector.extract_strided_slice %17 {offsets = [0, 0, 0], sizes = [16, 24, 128], strides = [1, 1, 1]} : vector<18x24x128xbf16> to vector<16x24x128xbf16>
    %19 = vector.extract_strided_slice %17 {offsets = [1, 0, 0], sizes = [16, 24, 128], strides = [1, 1, 1]} : vector<18x24x128xbf16> to vector<16x24x128xbf16>
    %20 = vector.extract_strided_slice %17 {offsets = [2, 0, 0], sizes = [16, 24, 128], strides = [1, 1, 1]} : vector<18x24x128xbf16> to vector<16x24x128xbf16>
    %21 = tpu.concatenate %18, %19, %20 in 2 : vector<16x24x128xbf16>, vector<16x24x128xbf16>, vector<16x24x128xbf16> -> vector<16x24x384xbf16>
    %22 = vector.shape_cast %21 : vector<16x24x384xbf16> to vector<384x384xbf16>
    %c0_9 = arith.constant 0 : index
    %c0_10 = arith.constant 0 : index
    %23 = vector.load %arg4[%c0_9, %c0_10] : memref<1152x128xbf16, #tpu.memory_space<vmem>>, vector<384x128xbf16>
    %cst_11 = arith.constant dense<0.000000e+00> : vector<384x128xf32>
    %24 = tpu.matmul %22, %23, %cst_11 {dimension_numbers = #tpu.dot_dimension_numbers<[1], [0], [0], [1], [0, 0, 1, 1], [], []>} : vector<384x384xbf16>, vector<384x128xbf16>, vector<384x128xf32> -> vector<384x128xf32>
    %25 = vector.shape_cast %24 : vector<384x128xf32> to vector<16x24x128xf32>
    %c384 = arith.constant 384 : index
    %c0_12 = arith.constant 0 : index
    %26 = vector.load %arg4[%c384, %c0_12] : memref<1152x128xbf16, #tpu.memory_space<vmem>>, vector<384x128xbf16>
    %cst_13 = arith.constant dense<0.000000e+00> : vector<384x128xf32>
    %27 = tpu.matmul %22, %26, %cst_13 {dimension_numbers = #tpu.dot_dimension_numbers<[1], [0], [0], [1], [0, 0, 1, 1], [], []>} : vector<384x384xbf16>, vector<384x128xbf16>, vector<384x128xf32> -> vector<384x128xf32>
    %28 = vector.shape_cast %27 : vector<384x128xf32> to vector<16x24x128xf32>
    %c768 = arith.constant 768 : index
    %c0_14 = arith.constant 0 : index
    %29 = vector.load %arg4[%c768, %c0_14] : memref<1152x128xbf16, #tpu.memory_space<vmem>>, vector<384x128xbf16>
    %cst_15 = arith.constant dense<0.000000e+00> : vector<384x128xf32>
    %30 = tpu.matmul %22, %29, %cst_15 {dimension_numbers = #tpu.dot_dimension_numbers<[1], [0], [0], [1], [0, 0, 1, 1], [], []>} : vector<384x384xbf16>, vector<384x128xbf16>, vector<384x128xf32> -> vector<384x128xf32>
    %31 = vector.shape_cast %30 : vector<384x128xf32> to vector<16x24x128xf32>
    %c1_i32 = arith.constant 1 : i32
    %32 = tpu.dynamic_rotate %25 by %c1_i32 dim 1 : vector<16x24x128xf32>, i32 -> vector<16x24x128xf32>
    %33 = arith.addf %32, %28 : vector<16x24x128xf32>
    %c23_i32 = arith.constant 23 : i32
    %34 = tpu.dynamic_rotate %31 by %c23_i32 dim 1 : vector<16x24x128xf32>, i32 -> vector<16x24x128xf32>
    %35 = arith.addf %33, %34 : vector<16x24x128xf32>
    %36 = vector.extract_strided_slice %35 {offsets = [0, 0, 0], sizes = [16, 16, 128], strides = [1, 1, 1]} : vector<16x24x128xf32> to vector<16x16x128xf32>
    %cst_16 = arith.constant dense<0.000000e+00> : vector<128xf32>
    %37 = vector.multi_reduction <add>, %36, %cst_16 [0, 1] : vector<16x16x128xf32> to vector<128xf32>
    %38 = vector.shape_cast %37 : vector<128xf32> to vector<1x128xf32>
    %cst_17 = arith.constant 3.906250e-03 : f32
    %39 = vector.broadcast %cst_17 : f32 to vector<1x128xf32>
    %40 = arith.mulf %38, %39 : vector<1x128xf32>
    %41 = vector.shape_cast %40 : vector<1x128xf32> to vector<1x1x128xf32>
    %42 = vector.broadcast %41 : vector<1x1x128xf32> to vector<16x16x128xf32>
    %43 = arith.subf %36, %42 : vector<16x16x128xf32>
    %44 = arith.mulf %43, %43 : vector<16x16x128xf32>
    %cst_18 = arith.constant dense<0.000000e+00> : vector<128xf32>
    %45 = vector.multi_reduction <add>, %44, %cst_18 [0, 1] : vector<16x16x128xf32> to vector<128xf32>
    %46 = vector.shape_cast %45 : vector<128xf32> to vector<1x128xf32>
    %c0_19 = arith.constant 0 : index
    %c0_20 = arith.constant 0 : index
    %c0_21 = arith.constant 0 : index
    %47 = vector.load %arg6[%c0_19, %c0_20, %c0_21] : memref<1x1x128xf32, #tpu.memory_space<vmem>>, vector<1x1x128xf32>
    %48 = vector.shape_cast %47 : vector<1x1x128xf32> to vector<1x128xf32>
    %49 = vector.shape_cast %38 : vector<1x128xf32> to vector<1x1x128xf32>
    tpu.vector_store %arg6[%c0_19, %c0_20, %c0_21], %49 {strides = array<i32>} : memref<1x1x128xf32, #tpu.memory_space<vmem>>, vector<1x1x128xf32>,
    %c0_22 = arith.constant 0 : index
    %c0_23 = arith.constant 0 : index
    %c0_24 = arith.constant 0 : index
    %50 = vector.load %arg7[%c0_22, %c0_23, %c0_24] : memref<1x1x128xf32, #tpu.memory_space<vmem>>, vector<1x1x128xf32>
    %51 = vector.shape_cast %50 : vector<1x1x128xf32> to vector<1x128xf32>
    %52 = vector.shape_cast %46 : vector<1x128xf32> to vector<1x1x128xf32>
    tpu.vector_store %arg7[%c0_22, %c0_23, %c0_24], %52 {strides = array<i32>} : memref<1x1x128xf32, #tpu.memory_space<vmem>>, vector<1x1x128xf32>,
    %53 = arith.truncf %36 : vector<16x16x128xf32> to vector<16x16x128xbf16>
    %c0_25 = arith.constant 0 : index
    %c0_26 = arith.constant 0 : index
    %c0_27 = arith.constant 0 : index
    %c0_28 = arith.constant 0 : index
    %54 = vector.load %arg5[%c0_25, %c0_26, %c0_27, %c0_28] : memref<1x16x16x128xbf16, #tpu.memory_space<vmem>>, vector<1x16x16x128xbf16>
    %55 = vector.shape_cast %54 : vector<1x16x16x128xbf16> to vector<16x16x128xbf16>
    %56 = vector.shape_cast %53 : vector<16x16x128xbf16> to vector<1x16x16x128xbf16>
    tpu.vector_store %arg5[%c0_25, %c0_26, %c0_27, %c0_28], %56 {strides = array<i32>} : memref<1x16x16x128xbf16, #tpu.memory_space<vmem>>, vector<1x16x16x128xbf16>,
    return
  }
  func.func @transform_0(%arg0: i32) -> (i32, i32, i32, i32) {
    %c0_i32 = arith.constant 0 : i32
    %c0_i32_0 = arith.constant 0 : i32
    %c0_i32_1 = arith.constant 0 : i32
    %c0_i32_2 = arith.constant 0 : i32
    return %arg0, %c0_i32, %c0_i32_0, %c0_i32_1 : i32, i32, i32, i32
  }
  func.func @transform_1(%arg0: i32) -> (i32, i32) {
    %c0_i32 = arith.constant 0 : i32
    %c0_i32_0 = arith.constant 0 : i32
    %c0_i32_1 = arith.constant 0 : i32
    return %c0_i32, %c0_i32_0 : i32, i32
  }
  func.func @transform_2(%arg0: i32) -> (i32, i32) {
    %c0_i32 = arith.constant 0 : i32
    %c0_i32_0 = arith.constant 0 : i32
    %c0_i32_1 = arith.constant 0 : i32
    return %c0_i32, %c0_i32_0 : i32, i32
  }
  func.func @transform_3(%arg0: i32) -> (i32, i32) {
    %c0_i32 = arith.constant 0 : i32
    %c0_i32_0 = arith.constant 0 : i32
    %c0_i32_1 = arith.constant 0 : i32
    return %c0_i32, %c0_i32_0 : i32, i32
  }
  func.func @transform_4(%arg0: i32) -> (i32, i32, i32, i32) {
    %c0_i32 = arith.constant 0 : i32
    %c0_i32_0 = arith.constant 0 : i32
    %c0_i32_1 = arith.constant 0 : i32
    %c0_i32_2 = arith.constant 0 : i32
    return %arg0, %c0_i32, %c0_i32_0, %c0_i32_1 : i32, i32, i32, i32
  }
  func.func @transform_5(%arg0: i32) -> (i32, i32, i32) {
    %c0_i32 = arith.constant 0 : i32
    %c0_i32_0 = arith.constant 0 : i32
    %c0_i32_1 = arith.constant 0 : i32
    return %arg0, %c0_i32, %c0_i32_0 : i32, i32, i32
  }
  func.func @transform_6(%arg0: i32) -> (i32, i32, i32) {
    %c0_i32 = arith.constant 0 : i32
    %c0_i32_0 = arith.constant 0 : i32
    %c0_i32_1 = arith.constant 0 : i32
    return %arg0, %c0_i32, %c0_i32_0 : i32, i32, i32
  }
}

module attributes {stable_mosaic.version = 11 : i64} {
  func.func @conv1_kernel(%arg0: i32, %arg1: memref<1x16x16x128xbf16, #tpu.memory_space<vmem>>, %arg2: memref<1152x128xbf16, #tpu.memory_space<vmem>>, %arg3: memref<1x16x16x128xbf16, #tpu.memory_space<vmem>>, %arg4: memref<1x1x128xf32, #tpu.memory_space<vmem>>, %arg5: memref<1x1x128xf32, #tpu.memory_space<vmem>>) attributes {dimension_semantics = [#tpu.dimension_semantics<parallel>], iteration_bounds = array<i64: 2>, scalar_prefetch = 0 : i64, scratch_operands = 0 : i64, tpu.core_type = #tpu.core_type<tc>, window_params = [{transform_indices = @transform_0, window_bounds = array<i64: 1, 16, 16, 128>}, {pipeline_mode = #tpu.pipeline_mode<synchronous>, transform_indices = @transform_1, window_bounds = array<i64: 1152, 128>}, {transform_indices = @transform_2, window_bounds = array<i64: 1, 16, 16, 128>}, {transform_indices = @transform_3, window_bounds = array<i64: 1, 1, 128>}, {transform_indices = @transform_4, window_bounds = array<i64: 1, 1, 128>}]} {
    %c0 = arith.constant 0 : index
    %c0_0 = arith.constant 0 : index
    %c0_1 = arith.constant 0 : index
    %c0_2 = arith.constant 0 : index
    %0 = vector.load %arg1[%c0, %c0_0, %c0_1, %c0_2] : memref<1x16x16x128xbf16, #tpu.memory_space<vmem>>, vector<1x16x16x128xbf16>
    %1 = vector.shape_cast %0 : vector<1x16x16x128xbf16> to vector<16x16x128xbf16>
    %cst = arith.constant 0.000000e+00 : bf16
    %2 = vector.broadcast %cst : bf16 to vector<1x24x128xbf16>
    %cst_3 = arith.constant 0.000000e+00 : bf16
    %3 = vector.broadcast %cst_3 : bf16 to vector<16x8x128xbf16>
    %4 = tpu.concatenate %1, %3 in 1 : vector<16x16x128xbf16>, vector<16x8x128xbf16> -> vector<16x24x128xbf16>
    %5 = tpu.concatenate %2, %4, %2 in 0 : vector<1x24x128xbf16>, vector<16x24x128xbf16>, vector<1x24x128xbf16> -> vector<18x24x128xbf16>
    %6 = vector.extract_strided_slice %5 {offsets = [0, 0, 0], sizes = [16, 24, 128], strides = [1, 1, 1]} : vector<18x24x128xbf16> to vector<16x24x128xbf16>
    %7 = vector.extract_strided_slice %5 {offsets = [1, 0, 0], sizes = [16, 24, 128], strides = [1, 1, 1]} : vector<18x24x128xbf16> to vector<16x24x128xbf16>
    %8 = vector.extract_strided_slice %5 {offsets = [2, 0, 0], sizes = [16, 24, 128], strides = [1, 1, 1]} : vector<18x24x128xbf16> to vector<16x24x128xbf16>
    %9 = tpu.concatenate %6, %7, %8 in 2 : vector<16x24x128xbf16>, vector<16x24x128xbf16>, vector<16x24x128xbf16> -> vector<16x24x384xbf16>
    %10 = vector.shape_cast %9 : vector<16x24x384xbf16> to vector<384x384xbf16>
    %c0_4 = arith.constant 0 : index
    %c0_5 = arith.constant 0 : index
    %11 = vector.load %arg2[%c0_4, %c0_5] : memref<1152x128xbf16, #tpu.memory_space<vmem>>, vector<384x128xbf16>
    %cst_6 = arith.constant dense<0.000000e+00> : vector<384x128xf32>
    %12 = tpu.matmul %10, %11, %cst_6 {dimension_numbers = #tpu.dot_dimension_numbers<[1], [0], [0], [1], [0, 0, 1, 1], [], []>} : vector<384x384xbf16>, vector<384x128xbf16>, vector<384x128xf32> -> vector<384x128xf32>
    %13 = vector.shape_cast %12 : vector<384x128xf32> to vector<16x24x128xf32>
    %c384 = arith.constant 384 : index
    %c0_7 = arith.constant 0 : index
    %14 = vector.load %arg2[%c384, %c0_7] : memref<1152x128xbf16, #tpu.memory_space<vmem>>, vector<384x128xbf16>
    %cst_8 = arith.constant dense<0.000000e+00> : vector<384x128xf32>
    %15 = tpu.matmul %10, %14, %cst_8 {dimension_numbers = #tpu.dot_dimension_numbers<[1], [0], [0], [1], [0, 0, 1, 1], [], []>} : vector<384x384xbf16>, vector<384x128xbf16>, vector<384x128xf32> -> vector<384x128xf32>
    %16 = vector.shape_cast %15 : vector<384x128xf32> to vector<16x24x128xf32>
    %c768 = arith.constant 768 : index
    %c0_9 = arith.constant 0 : index
    %17 = vector.load %arg2[%c768, %c0_9] : memref<1152x128xbf16, #tpu.memory_space<vmem>>, vector<384x128xbf16>
    %cst_10 = arith.constant dense<0.000000e+00> : vector<384x128xf32>
    %18 = tpu.matmul %10, %17, %cst_10 {dimension_numbers = #tpu.dot_dimension_numbers<[1], [0], [0], [1], [0, 0, 1, 1], [], []>} : vector<384x384xbf16>, vector<384x128xbf16>, vector<384x128xf32> -> vector<384x128xf32>
    %19 = vector.shape_cast %18 : vector<384x128xf32> to vector<16x24x128xf32>
    %c1_i32 = arith.constant 1 : i32
    %20 = tpu.dynamic_rotate %13 by %c1_i32 dim 1 : vector<16x24x128xf32>, i32 -> vector<16x24x128xf32>
    %21 = arith.addf %20, %16 : vector<16x24x128xf32>
    %c23_i32 = arith.constant 23 : i32
    %22 = tpu.dynamic_rotate %19 by %c23_i32 dim 1 : vector<16x24x128xf32>, i32 -> vector<16x24x128xf32>
    %23 = arith.addf %21, %22 : vector<16x24x128xf32>
    %24 = vector.extract_strided_slice %23 {offsets = [0, 0, 0], sizes = [16, 16, 128], strides = [1, 1, 1]} : vector<16x24x128xf32> to vector<16x16x128xf32>
    %cst_11 = arith.constant dense<0.000000e+00> : vector<128xf32>
    %25 = vector.multi_reduction <add>, %24, %cst_11 [0, 1] : vector<16x16x128xf32> to vector<128xf32>
    %26 = vector.shape_cast %25 : vector<128xf32> to vector<1x128xf32>
    %cst_12 = arith.constant 3.906250e-03 : f32
    %27 = vector.broadcast %cst_12 : f32 to vector<1x128xf32>
    %28 = arith.mulf %26, %27 : vector<1x128xf32>
    %29 = vector.shape_cast %28 : vector<1x128xf32> to vector<1x1x128xf32>
    %30 = vector.broadcast %29 : vector<1x1x128xf32> to vector<16x16x128xf32>
    %31 = arith.subf %24, %30 : vector<16x16x128xf32>
    %32 = arith.mulf %31, %31 : vector<16x16x128xf32>
    %cst_13 = arith.constant dense<0.000000e+00> : vector<128xf32>
    %33 = vector.multi_reduction <add>, %32, %cst_13 [0, 1] : vector<16x16x128xf32> to vector<128xf32>
    %34 = vector.shape_cast %33 : vector<128xf32> to vector<1x128xf32>
    %c0_14 = arith.constant 0 : index
    %c0_15 = arith.constant 0 : index
    %c0_16 = arith.constant 0 : index
    %35 = vector.load %arg4[%c0_14, %c0_15, %c0_16] : memref<1x1x128xf32, #tpu.memory_space<vmem>>, vector<1x1x128xf32>
    %36 = vector.shape_cast %35 : vector<1x1x128xf32> to vector<1x128xf32>
    %37 = vector.shape_cast %26 : vector<1x128xf32> to vector<1x1x128xf32>
    tpu.vector_store %arg4[%c0_14, %c0_15, %c0_16], %37 {strides = array<i32>} : memref<1x1x128xf32, #tpu.memory_space<vmem>>, vector<1x1x128xf32>,
    %c0_17 = arith.constant 0 : index
    %c0_18 = arith.constant 0 : index
    %c0_19 = arith.constant 0 : index
    %38 = vector.load %arg5[%c0_17, %c0_18, %c0_19] : memref<1x1x128xf32, #tpu.memory_space<vmem>>, vector<1x1x128xf32>
    %39 = vector.shape_cast %38 : vector<1x1x128xf32> to vector<1x128xf32>
    %40 = vector.shape_cast %34 : vector<1x128xf32> to vector<1x1x128xf32>
    tpu.vector_store %arg5[%c0_17, %c0_18, %c0_19], %40 {strides = array<i32>} : memref<1x1x128xf32, #tpu.memory_space<vmem>>, vector<1x1x128xf32>,
    %41 = arith.truncf %24 : vector<16x16x128xf32> to vector<16x16x128xbf16>
    %c0_20 = arith.constant 0 : index
    %c0_21 = arith.constant 0 : index
    %c0_22 = arith.constant 0 : index
    %c0_23 = arith.constant 0 : index
    %42 = vector.load %arg3[%c0_20, %c0_21, %c0_22, %c0_23] : memref<1x16x16x128xbf16, #tpu.memory_space<vmem>>, vector<1x16x16x128xbf16>
    %43 = vector.shape_cast %42 : vector<1x16x16x128xbf16> to vector<16x16x128xbf16>
    %44 = vector.shape_cast %41 : vector<16x16x128xbf16> to vector<1x16x16x128xbf16>
    tpu.vector_store %arg3[%c0_20, %c0_21, %c0_22, %c0_23], %44 {strides = array<i32>} : memref<1x16x16x128xbf16, #tpu.memory_space<vmem>>, vector<1x16x16x128xbf16>,
    return
  }
  func.func @transform_0(%arg0: i32) -> (i32, i32, i32, i32) {
    %c0_i32 = arith.constant 0 : i32
    %c0_i32_0 = arith.constant 0 : i32
    %c0_i32_1 = arith.constant 0 : i32
    %c0_i32_2 = arith.constant 0 : i32
    return %arg0, %c0_i32, %c0_i32_0, %c0_i32_1 : i32, i32, i32, i32
  }
  func.func @transform_1(%arg0: i32) -> (i32, i32) {
    %c0_i32 = arith.constant 0 : i32
    %c0_i32_0 = arith.constant 0 : i32
    %c0_i32_1 = arith.constant 0 : i32
    return %c0_i32, %c0_i32_0 : i32, i32
  }
  func.func @transform_2(%arg0: i32) -> (i32, i32, i32, i32) {
    %c0_i32 = arith.constant 0 : i32
    %c0_i32_0 = arith.constant 0 : i32
    %c0_i32_1 = arith.constant 0 : i32
    %c0_i32_2 = arith.constant 0 : i32
    return %arg0, %c0_i32, %c0_i32_0, %c0_i32_1 : i32, i32, i32, i32
  }
  func.func @transform_3(%arg0: i32) -> (i32, i32, i32) {
    %c0_i32 = arith.constant 0 : i32
    %c0_i32_0 = arith.constant 0 : i32
    %c0_i32_1 = arith.constant 0 : i32
    return %arg0, %c0_i32, %c0_i32_0 : i32, i32, i32
  }
  func.func @transform_4(%arg0: i32) -> (i32, i32, i32) {
    %c0_i32 = arith.constant 0 : i32
    %c0_i32_0 = arith.constant 0 : i32
    %c0_i32_1 = arith.constant 0 : i32
    return %arg0, %c0_i32, %c0_i32_0 : i32, i32, i32
  }
}

module attributes {stable_mosaic.version = 11 : i64} {
  func.func @out_kernel(%arg0: i32, %arg1: memref<1x16x16x128xbf16, #tpu.memory_space<vmem>>, %arg2: memref<1x16x16x128xf32, #tpu.memory_space<vmem>>, %arg3: memref<1x128xf32, #tpu.memory_space<vmem>>, %arg4: memref<1x128xf32, #tpu.memory_space<vmem>>, %arg5: memref<1x16x16x128xbf16, #tpu.memory_space<vmem>>) attributes {dimension_semantics = [#tpu.dimension_semantics<parallel>], iteration_bounds = array<i64: 2>, scalar_prefetch = 0 : i64, scratch_operands = 0 : i64, tpu.core_type = #tpu.core_type<tc>, window_params = [{transform_indices = @transform_0, window_bounds = array<i64: 1, 16, 16, 128>}, {transform_indices = @transform_1, window_bounds = array<i64: 1, 16, 16, 128>}, {pipeline_mode = #tpu.pipeline_mode<synchronous>, transform_indices = @transform_2, window_bounds = array<i64: 1, 128>}, {pipeline_mode = #tpu.pipeline_mode<synchronous>, transform_indices = @transform_3, window_bounds = array<i64: 1, 128>}, {transform_indices = @transform_4, window_bounds = array<i64: 1, 16, 16, 128>}]} {
    %c0 = arith.constant 0 : index
    %c0_0 = arith.constant 0 : index
    %c0_1 = arith.constant 0 : index
    %c0_2 = arith.constant 0 : index
    %0 = vector.load %arg1[%c0, %c0_0, %c0_1, %c0_2] : memref<1x16x16x128xbf16, #tpu.memory_space<vmem>>, vector<1x16x16x128xbf16>
    %1 = vector.shape_cast %0 : vector<1x16x16x128xbf16> to vector<16x16x128xbf16>
    %2 = arith.extf %1 : vector<16x16x128xbf16> to vector<16x16x128xf32>
    %c0_3 = arith.constant 0 : index
    %c0_4 = arith.constant 0 : index
    %3 = vector.load %arg3[%c0_3, %c0_4] : memref<1x128xf32, #tpu.memory_space<vmem>>, vector<1x128xf32>
    %4 = vector.shape_cast %3 : vector<1x128xf32> to vector<1x1x128xf32>
    %5 = vector.broadcast %4 : vector<1x1x128xf32> to vector<16x16x128xf32>
    %6 = arith.mulf %2, %5 : vector<16x16x128xf32>
    %c0_5 = arith.constant 0 : index
    %c0_6 = arith.constant 0 : index
    %7 = vector.load %arg4[%c0_5, %c0_6] : memref<1x128xf32, #tpu.memory_space<vmem>>, vector<1x128xf32>
    %8 = vector.shape_cast %7 : vector<1x128xf32> to vector<1x1x128xf32>
    %9 = vector.broadcast %8 : vector<1x1x128xf32> to vector<16x16x128xf32>
    %10 = arith.addf %6, %9 : vector<16x16x128xf32>
    %c0_7 = arith.constant 0 : index
    %c0_8 = arith.constant 0 : index
    %c0_9 = arith.constant 0 : index
    %c0_10 = arith.constant 0 : index
    %11 = vector.load %arg2[%c0_7, %c0_8, %c0_9, %c0_10] : memref<1x16x16x128xf32, #tpu.memory_space<vmem>>, vector<1x16x16x128xf32>
    %12 = vector.shape_cast %11 : vector<1x16x16x128xf32> to vector<16x16x128xf32>
    %13 = arith.addf %10, %12 : vector<16x16x128xf32>
    %cst = arith.constant 0.000000e+00 : f32
    %14 = vector.broadcast %cst : f32 to vector<16x16x128xf32>
    %15 = arith.maximumf %13, %14 : vector<16x16x128xf32>
    %16 = arith.truncf %15 : vector<16x16x128xf32> to vector<16x16x128xbf16>
    %c0_11 = arith.constant 0 : index
    %c0_12 = arith.constant 0 : index
    %c0_13 = arith.constant 0 : index
    %c0_14 = arith.constant 0 : index
    %17 = vector.load %arg5[%c0_11, %c0_12, %c0_13, %c0_14] : memref<1x16x16x128xbf16, #tpu.memory_space<vmem>>, vector<1x16x16x128xbf16>
    %18 = vector.shape_cast %17 : vector<1x16x16x128xbf16> to vector<16x16x128xbf16>
    %19 = vector.shape_cast %16 : vector<16x16x128xbf16> to vector<1x16x16x128xbf16>
    tpu.vector_store %arg5[%c0_11, %c0_12, %c0_13, %c0_14], %19 {strides = array<i32>} : memref<1x16x16x128xbf16, #tpu.memory_space<vmem>>, vector<1x16x16x128xbf16>,
    return
  }
  func.func @transform_0(%arg0: i32) -> (i32, i32, i32, i32) {
    %c0_i32 = arith.constant 0 : i32
    %c0_i32_0 = arith.constant 0 : i32
    %c0_i32_1 = arith.constant 0 : i32
    %c0_i32_2 = arith.constant 0 : i32
    return %arg0, %c0_i32, %c0_i32_0, %c0_i32_1 : i32, i32, i32, i32
  }
  func.func @transform_1(%arg0: i32) -> (i32, i32, i32, i32) {
    %c0_i32 = arith.constant 0 : i32
    %c0_i32_0 = arith.constant 0 : i32
    %c0_i32_1 = arith.constant 0 : i32
    %c0_i32_2 = arith.constant 0 : i32
    return %arg0, %c0_i32, %c0_i32_0, %c0_i32_1 : i32, i32, i32, i32
  }
  func.func @transform_2(%arg0: i32) -> (i32, i32) {
    %c0_i32 = arith.constant 0 : i32
    %c0_i32_0 = arith.constant 0 : i32
    %c0_i32_1 = arith.constant 0 : i32
    return %c0_i32, %c0_i32_0 : i32, i32
  }
  func.func @transform_3(%arg0: i32) -> (i32, i32) {
    %c0_i32 = arith.constant 0 : i32
    %c0_i32_0 = arith.constant 0 : i32
    %c0_i32_1 = arith.constant 0 : i32
    return %c0_i32, %c0_i32_0 : i32, i32
  }
  func.func @transform_4(%arg0: i32) -> (i32, i32, i32, i32) {
    %c0_i32 = arith.constant 0 : i32
    %c0_i32_0 = arith.constant 0 : i32
    %c0_i32_1 = arith.constant 0 : i32
    %c0_i32_2 = arith.constant 0 : i32
    return %arg0, %c0_i32, %c0_i32_0, %c0_i32_1 : i32, i32, i32, i32
  }
}

</mosaic_0001>

<bundles_post_ra>
// kernel: basic_block.5
= control target key start
LH: loop header
LB: loop body
LE: loop exit
PB: predicated region body
PF: predicated region fallthrough
CT: control target
= control target key end

     0   :  { %s980_s15 = smov 0   ;;  %s1152_s0 = inlined_call_operand.vmem [shape: bf16[2,16,16,128], index: 0, kind: input, shape index: {}]   ;;  %s1153_s1 = inlined_call_operand.vmem [shape: f32[2,16,16,128], index: 1, kind: input, shape index: {}]   ;;  %s1154_s2 = inlined_call_operand.vmem [shape: f32[1,128], index: 2, kind: input, shape index: {}]   ;;  %s1155_s3 = inlined_call_operand.vmem [shape: f32[1,128], index: 3, kind: input, shape index: {}]   ;;  %s1156_s4 = inlined_call_operand.vmem [shape: bf16[2,16,16,128], index: 4, kind: output, shape index: {}]  }
   0x1 LB: > { %s683_s16 = sadd.s32 4294967295, %s953_s15   ;;  %p687_p0 = scmp.ge.s32.totalorder %s953_s15, 1  ;;  %s953_s15 = sphi %s980_s15, %s14_s15  }
   0x2   : > { %p172_p1 = scmp.lt.s32.totalorder %s953_s15, 3 }
   0x4   : > { %p173_p2 = pnand %p687_p0, %p172_p1 }
   0x5   : > { %p203_p3 = scmp.lt.s32.totalorder (!%p173_p2), %s683_s16, 1 }
   0x6   : > { %176 = sbr.rel (%p173_p2) target bundleno = 65 (0x41), region = 36 }
   0xb   : > { %s1158_s16 = smov (!%p203_p3, %s683_s16), 1  ;;  %v1003_v1 = vld [vmem:[%s1154_s2] ss:$0 sm:$0xff] }
   0xc   : > { %s730_s17 = sshll.u32 %s1158_s16, 7  ;;  %s731_s18 = sshll.u32 %s1158_s16, 8  ;;  %v1014_v5 = vld [vmem:[%s1155_s3] ss:$0 sm:$0xff] }
   0xd   : > { %s997_s21 = scalar_lea.vmem %s1152_s0, %s730_s17  ;;  %s1008_s26 = scalar_lea.vmem %s1153_s1, %s731_s18 }
   0xe   : > { %v766_v0 = vld [vmem:[%s997_s21] sm:$0xff]   ;;  %v909_v4 = vld [vmem:[%s997_s21 + $0x8] sm:$0xff]   ;;  %v910_v8 = vld [vmem:[%s997_s21 + $0x10] sm:$0xff]   ;;  %s1048_s5 = scalar_lea.vmem %s1156_s4, %s730_s17 }
   0xf   : > { %v767_v2 = vunpack.c.l.bf16 %v766_v0  ;;  %v768_v3 = vunpack.c.h.bf16 %v766_v0  ;;  %v771_v6 = vunpack.c.l.bf16 %v909_v4  ;;  %v772_v7 = vunpack.c.h.bf16 %v909_v4  ;;  %v911_v13 = vld [vmem:[%s997_s21 + $0x18] sm:$0xff]   ;;  %v360_v14 = vld [vmem:[%s1008_s26] sm:$0xff]  ;;  %v361_v15 = vld [vmem:[%s1008_s26 + $0x8] sm:$0xff] }
  0x10   : > { %v775_v11 = vunpack.c.l.bf16 %v910_v8  ;;  %v776_v12 = vunpack.c.h.bf16 %v910_v8  ;;  %v779_v18 = vunpack.c.l.bf16 %v911_v13  ;;  %v780_v19 = vunpack.c.h.bf16 %v911_v13  ;;  %v362_v22 = vld [vmem:[%s1008_s26 + $0x10] sm:$0xff]  ;;  %v363_v23 = vld [vmem:[%s1008_s26 + $0x18] sm:$0xff]  ;;  %v364_v28 = vld [vmem:[%s1008_s26 + $0x20] sm:$0xff] }
  0x11   : > { %v289_v9 = vmul.f32 %v767_v2, %v1003_v1  ;;  %v290_v10 = vmul.f32 %v768_v3, %v1003_v1  ;;  %v291_v16 = vmul.f32 %v771_v6, %v1003_v1  ;;  %v292_v17 = vmul.f32 %v772_v7, %v1003_v1  ;;  %v365_v29 = vld [vmem:[%s1008_s26 + $0x28] sm:$0xff]  ;;  %v366_v36 = vld [vmem:[%s1008_s26 + $0x30] sm:$0xff]  ;;  %v367_v37 = vld [vmem:[%s1008_s26 + $0x38] sm:$0xff] }
  0x12   : > { %v293_v24 = vmul.f32 %v775_v11, %v1003_v1  ;;  %v294_v25 = vmul.f32 %v776_v12, %v1003_v1  ;;  %v295_v30 = vmul.f32 %v779_v18, %v1003_v1  ;;  %v296_v31 = vmul.f32 %v780_v19, %v1003_v1  ;;  %v912_v42 = vld [vmem:[%s997_s21 + $0x20] sm:$0xff]   ;;  %v913_v51 = vld [vmem:[%s997_s21 + $0x28] sm:$0xff]   ;;  %v914_v56 = vld [vmem:[%s997_s21 + $0x30] sm:$0xff]  }
  0x13   : > { %v328_v20 = vadd.f32 %v1014_v5, %v289_v9  ;;  %v329_v21 = vadd.f32 %v1014_v5, %v290_v10  ;;  %v330_v26 = vadd.f32 %v1014_v5, %v291_v16  ;;  %v331_v27 = vadd.f32 %v1014_v5, %v292_v17  ;;  %v915_v61 = vld [vmem:[%s997_s21 + $0x38] sm:$0xff]   ;;  %v368_v6 = vld [vmem:[%s1008_s26 + $0x40] sm:$0xff]  ;;  %v369_v10 = vld [vmem:[%s1008_s26 + $0x48] sm:$0xff] }
  0x14   : > { %v332_v34 = vadd.f32 %v1014_v5, %v293_v24  ;;  %v333_v35 = vadd.f32 %v1014_v5, %v294_v25  ;;  %v334_v40 = vadd.f32 %v1014_v5, %v295_v30  ;;  %v335_v41 = vadd.f32 %v1014_v5, %v296_v31  ;;  %v371_v16 = vld [vmem:[%s1008_s26 + $0x58] sm:$0xff]  ;;  %v373_v24 = vld [vmem:[%s1008_s26 + $0x68] sm:$0xff]  ;;  %v374_v30 = vld [vmem:[%s1008_s26 + $0x70] sm:$0xff] }
  0x15   : > { %v392_v32 = vadd.f32 %v360_v14, %v328_v20  ;;  %v393_v33 = vadd.f32 %v361_v15, %v329_v21  ;;  %v394_v38 = vadd.f32 %v362_v22, %v330_v26  ;;  %v395_v39 = vadd.f32 %v363_v23, %v331_v27  ;;  %v370_v15 = vld [vmem:[%s1008_s26 + $0x50] sm:$0xff]  ;;  %v372_v23 = vld [vmem:[%s1008_s26 + $0x60] sm:$0xff] }
  0x16   : > { %v396_v45 = vadd.f32 %v364_v28, %v332_v34  ;;  %v397_v46 = vadd.f32 %v365_v29, %v333_v35  ;;  %v398_v49 = vadd.f32 %v366_v36, %v334_v40  ;;  %v399_v50 = vadd.f32 %v367_v37, %v335_v41  ;;  %v916_v31 = vld [vmem:[%s997_s21 + $0x40] sm:$0xff]   ;;  %v375_v36 = vld [vmem:[%s1008_s26 + $0x78] sm:$0xff] }
  0x17   : > { %v424_v43 = vmax.f32 %v392_v32, 0.0  ;;  %v425_v44 = vmax.f32 %v393_v33, 0.0  ;;  %v426_v47 = vmax.f32 %v394_v38, 0.0  ;;  %v427_v48 = vmax.f32 %v395_v39, 0.0 }
  0x18   : > { %v428_v53 = vmax.f32 %v396_v45, 0.0  ;;  %v429_v54 = vmax.f32 %v397_v46, 0.0  ;;  %v783_v55 = vunpack.c.l.bf16 %v912_v42  ;;  %v430_v58 = vmax.f32 %v398_v49, 0.0  ;;  %v917_v45 = vld [vmem:[%s997_s21 + $0x48] sm:$0xff]  }
  0x19   : > { %v832_v52 = vpack.c.bf16 %v425_v44, %v424_v43  ;;  %v837_v57 = vpack.c.bf16 %v427_v48, %v426_v47  ;;  %v431_v59 = vmax.f32 %v399_v50, 0.0  ;;  %v784_v60 = vunpack.c.h.bf16 %v912_v42  ;;  %v918_v50 = vld [vmem:[%s997_s21 + $0x50] sm:$0xff]  }
  0x1a   : > { %v842_v62 = vpack.c.bf16 %v429_v54, %v428_v53  ;;  %v297_v63 = vmul.f32 %v783_v55, %v1003_v1  ;;  %v787_v0 = vunpack.c.l.bf16 %v913_v51  ;;  %v788_v2 = vunpack.c.h.bf16 %v913_v51  ;;  %v919_v55 = vld [vmem:[%s997_s21 + $0x58] sm:$0xff]  }
  0x1b   : > { %833 = vst [vmem:[%s1048_s5] sm:$0xff] %v832_v52   ;;  %924 = vst [vmem:[%s1048_s5 + $0x8] sm:$0xff] %v837_v57   ;;  %v847_v3 = vpack.c.bf16 %v431_v59, %v430_v58  ;;  %v298_v4 = vmul.f32 %v784_v60, %v1003_v1  ;;  %v791_v7 = vunpack.c.l.bf16 %v914_v56  ;;  %v792_v8 = vunpack.c.h.bf16 %v914_v56  ;;  %v376_v58 = vld [vmem:[%s1008_s26 + $0x80] sm:$0xff] }
  0x1c   : > { %925 = vst [vmem:[%s1048_s5 + $0x10] sm:$0xff] %v842_v62   ;;  %v336_v9 = vadd.f32 %v1014_v5, %v297_v63  ;;  %v299_v11 = vmul.f32 %v787_v0, %v1003_v1  ;;  %v300_v12 = vmul.f32 %v788_v2, %v1003_v1  ;;  %v795_v13 = vunpack.c.l.bf16 %v915_v61 }
  0x1d   : > { %926 = vst [vmem:[%s1048_s5 + $0x18] sm:$0xff] %v847_v3   ;;  %v337_v14 = vadd.f32 %v1014_v5, %v298_v4  ;;  %v301_v17 = vmul.f32 %v791_v7, %v1003_v1  ;;  %v302_v18 = vmul.f32 %v792_v8, %v1003_v1  ;;  %v796_v19 = vunpack.c.h.bf16 %v915_v61  ;;  %v377_v3 = vld [vmem:[%s1008_s26 + $0x88] sm:$0xff] }
  0x1e   : > { %v400_v20 = vadd.f32 %v368_v6, %v336_v9  ;;  %v338_v21 = vadd.f32 %v1014_v5, %v299_v11  ;;  %v339_v22 = vadd.f32 %v1014_v5, %v300_v12  ;;  %v303_v25 = vmul.f32 %v795_v13, %v1003_v1  ;;  %v379_v11 = vld [vmem:[%s1008_s26 + $0x98] sm:$0xff] }
  0x1f   : > { %v401_v26 = vadd.f32 %v369_v10, %v337_v14  ;;  %v340_v27 = vadd.f32 %v1014_v5, %v301_v17  ;;  %v341_v28 = vadd.f32 %v1014_v5, %v302_v18  ;;  %v304_v29 = vmul.f32 %v796_v19, %v1003_v1  ;;  %v378_v10 = vld [vmem:[%s1008_s26 + $0x90] sm:$0xff]  ;;  %v381_v17 = vld [vmem:[%s1008_s26 + $0xa8] sm:$0xff] }
  0x20   : > { %v432_v32 = vmax.f32 %v400_v20, 0.0  ;;  %v402_v33 = vadd.f32 %v370_v15, %v338_v21  ;;  %v403_v34 = vadd.f32 %v371_v16, %v339_v22  ;;  %v342_v35 = vadd.f32 %v1014_v5, %v303_v25  ;;  %v380_v16 = vld [vmem:[%s1008_s26 + $0xa0] sm:$0xff]  ;;  %v382_v25 = vld [vmem:[%s1008_s26 + $0xb0] sm:$0xff] }
  0x21   : > { %v433_v37 = vmax.f32 %v401_v26, 0.0  ;;  %v404_v38 = vadd.f32 %v372_v23, %v340_v27  ;;  %v405_v39 = vadd.f32 %v373_v24, %v341_v28  ;;  %v343_v40 = vadd.f32 %v1014_v5, %v304_v29  ;;  %v920_v20 = vld [vmem:[%s997_s21 + $0x60] sm:$0xff]  }
  0x22   : > { %v434_v41 = vmax.f32 %v402_v33, 0.0  ;;  %v435_v42 = vmax.f32 %v403_v34, 0.0  ;;  %v406_v43 = vadd.f32 %v374_v30, %v342_v35  ;;  %v799_v44 = vunpack.c.l.bf16 %v916_v31  ;;  %v383_v33 = vld [vmem:[%s1008_s26 + $0xb8] sm:$0xff] }
  0x23   : > { %v852_v46 = vpack.c.bf16 %v433_v37, %v432_v32  ;;  %v436_v47 = vmax.f32 %v404_v38, 0.0  ;;  %v437_v48 = vmax.f32 %v405_v39, 0.0  ;;  %v407_v49 = vadd.f32 %v375_v36, %v343_v40  ;;  %v921_v39 = vld [vmem:[%s997_s21 + $0x68] sm:$0xff]  }
  0x24   : > { %v857_v51 = vpack.c.bf16 %v435_v42, %v434_v41  ;;  %v438_v52 = vmax.f32 %v406_v43, 0.0  ;;  %v800_v53 = vunpack.c.h.bf16 %v916_v31  ;;  %v305_v54 = vmul.f32 %v799_v44, %v1003_v1  ;;  %v922_v44 = vld [vmem:[%s997_s21 + $0x70] sm:$0xff]  }
  0x25   : > { %927 = vst [vmem:[%s1048_s5 + $0x20] sm:$0xff] %v852_v46   ;;  %v862_v56 = vpack.c.bf16 %v437_v48, %v436_v47  ;;  %v439_v57 = vmax.f32 %v407_v49, 0.0  ;;  %v803_v59 = vunpack.c.l.bf16 %v917_v45  ;;  %v804_v60 = vunpack.c.h.bf16 %v917_v45  ;;  %v923_v49 = vld [vmem:[%s997_s21 + $0x78] sm:$0xff]  }
  0x26   : > { %928 = vst [vmem:[%s1048_s5 + $0x28] sm:$0xff] %v857_v51   ;;  %v306_v61 = vmul.f32 %v800_v53, %v1003_v1  ;;  %v344_v62 = vadd.f32 %v1014_v5, %v305_v54  ;;  %v807_v63 = vunpack.c.l.bf16 %v918_v50  ;;  %v808_v0 = vunpack.c.h.bf16 %v918_v50 }
  0x27   : > { %929 = vst [vmem:[%s1048_s5 + $0x30] sm:$0xff] %v862_v56   ;;  %v867_v2 = vpack.c.bf16 %v439_v57, %v438_v52  ;;  %v307_v4 = vmul.f32 %v803_v59, %v1003_v1  ;;  %v308_v6 = vmul.f32 %v804_v60, %v1003_v1  ;;  %v811_v7 = vunpack.c.l.bf16 %v919_v55  ;;  %v384_v52 = vld [vmem:[%s1008_s26 + $0xc0] sm:$0xff]  ;;  %v385_v57 = vld [vmem:[%s1008_s26 + $0xc8] sm:$0xff] }
  0x28   : > { %v345_v8 = vadd.f32 %v1014_v5, %v306_v61  ;;  %v408_v9 = vadd.f32 %v376_v58, %v344_v62  ;;  %v309_v12 = vmul.f32 %v807_v63, %v1003_v1  ;;  %v310_v13 = vmul.f32 %v808_v0, %v1003_v1 }
  0x29   : > { %930 = vst [vmem:[%s1048_s5 + $0x38] sm:$0xff] %v867_v2   ;;  %v346_v14 = vadd.f32 %v1014_v5, %v307_v4  ;;  %v347_v15 = vadd.f32 %v1014_v5, %v308_v6  ;;  %v812_v18 = vunpack.c.h.bf16 %v919_v55  ;;  %v311_v19 = vmul.f32 %v811_v7, %v1003_v1  ;;  %v387_v4 = vld [vmem:[%s1008_s26 + $0xd8] sm:$0xff] }
  0x2a   : > { %v409_v21 = vadd.f32 %v377_v3, %v345_v8  ;;  %v440_v22 = vmax.f32 %v408_v9, 0.0  ;;  %v348_v23 = vadd.f32 %v1014_v5, %v309_v12  ;;  %v349_v24 = vadd.f32 %v1014_v5, %v310_v13  ;;  %v386_v3 = vld [vmem:[%s1008_s26 + $0xd0] sm:$0xff]  ;;  %v389_v12 = vld [vmem:[%s1008_s26 + $0xe8] sm:$0xff] }
  0x2b   : > { %v410_v26 = vadd.f32 %v378_v10, %v346_v14  ;;  %v411_v27 = vadd.f32 %v379_v11, %v347_v15  ;;  %v312_v28 = vmul.f32 %v812_v18, %v1003_v1  ;;  %v350_v29 = vadd.f32 %v1014_v5, %v311_v19  ;;  %v388_v11 = vld [vmem:[%s1008_s26 + $0xe0] sm:$0xff] }
  0x2c   : > { %v441_v30 = vmax.f32 %v409_v21, 0.0  ;;  %v412_v31 = vadd.f32 %v380_v16, %v348_v23  ;;  %v413_v32 = vadd.f32 %v381_v17, %v349_v24  ;;  %v815_v34 = vunpack.c.l.bf16 %v920_v20 }
  0x2d   : > { %v442_v35 = vmax.f32 %v410_v26, 0.0  ;;  %v443_v36 = vmax.f32 %v411_v27, 0.0  ;;  %v351_v37 = vadd.f32 %v1014_v5, %v312_v28  ;;  %v414_v38 = vadd.f32 %v382_v25, %v350_v29  ;;  %v391_v26 = vld [vmem:[%s1008_s26 + $0xf8] sm:$0xff] }
  0x2e   : > { %v872_v40 = vpack.c.bf16 %v441_v30, %v440_v22  ;;  %v444_v41 = vmax.f32 %v412_v31, 0.0  ;;  %v445_v42 = vmax.f32 %v413_v32, 0.0  ;;  %v816_v43 = vunpack.c.h.bf16 %v920_v20  ;;  %v390_v22 = vld [vmem:[%s1008_s26 + $0xf0] sm:$0xff] }
  0x2f   : > { %v877_v45 = vpack.c.bf16 %v443_v36, %v442_v35  ;;  %v415_v46 = vadd.f32 %v383_v33, %v351_v37  ;;  %v446_v47 = vmax.f32 %v414_v38, 0.0  ;;  %v313_v48 = vmul.f32 %v815_v34, %v1003_v1 }
  0x30   : > { %931 = vst [vmem:[%s1048_s5 + $0x40] sm:$0xff] %v872_v40   ;;  %v882_v50 = vpack.c.bf16 %v445_v42, %v444_v41  ;;  %v314_v51 = vmul.f32 %v816_v43, %v1003_v1  ;;  %v819_v53 = vunpack.c.l.bf16 %v921_v39  ;;  %v820_v54 = vunpack.c.h.bf16 %v921_v39 }
  0x31   : > { %932 = vst [vmem:[%s1048_s5 + $0x48] sm:$0xff] %v877_v45   ;;  %v447_v55 = vmax.f32 %v415_v46, 0.0  ;;  %v352_v56 = vadd.f32 %v1014_v5, %v313_v48  ;;  %v823_v58 = vunpack.c.l.bf16 %v922_v44  ;;  %v824_v59 = vunpack.c.h.bf16 %v922_v44 }
  0x32   : > { %933 = vst [vmem:[%s1048_s5 + $0x50] sm:$0xff] %v882_v50   ;;  %v353_v60 = vadd.f32 %v1014_v5, %v314_v51  ;;  %v315_v61 = vmul.f32 %v819_v53, %v1003_v1  ;;  %v316_v62 = vmul.f32 %v820_v54, %v1003_v1  ;;  %v827_v63 = vunpack.c.l.bf16 %v923_v49 }
  0x33   : > { %v887_v0 = vpack.c.bf16 %v447_v55, %v446_v47  ;;  %v416_v2 = vadd.f32 %v384_v52, %v352_v56  ;;  %v317_v6 = vmul.f32 %v823_v58, %v1003_v1  ;;  %v318_v7 = vmul.f32 %v824_v59, %v1003_v1 }
  0x34   : > { %v417_v8 = vadd.f32 %v385_v57, %v353_v60  ;;  %v354_v9 = vadd.f32 %v1014_v5, %v315_v61  ;;  %v355_v10 = vadd.f32 %v1014_v5, %v316_v62  ;;  %v828_v13 = vunpack.c.h.bf16 %v923_v49 }
  0x35   : > { %934 = vst [vmem:[%s1048_s5 + $0x58] sm:$0xff] %v887_v0   ;;  %v448_v14 = vmax.f32 %v416_v2, 0.0  ;;  %v356_v15 = vadd.f32 %v1014_v5, %v317_v6  ;;  %v357_v16 = vadd.f32 %v1014_v5, %v318_v7  ;;  %v319_v17 = vmul.f32 %v827_v63, %v1003_v1 }
  0x36   : > { %v449_v18 = vmax.f32 %v417_v8, 0.0  ;;  %v418_v19 = vadd.f32 %v386_v3, %v354_v9  ;;  %v419_v20 = vadd.f32 %v387_v4, %v355_v10  ;;  %v320_v21 = vmul.f32 %v828_v13, %v1003_v1 }
  0x37   : > { %v420_v23 = vadd.f32 %v388_v11, %v356_v15  ;;  %v421_v24 = vadd.f32 %v389_v12, %v357_v16  ;;  %v358_v25 = vadd.f32 %v1014_v5, %v319_v17 }
  0x38   : > { %v892_v27 = vpack.c.bf16 %v449_v18, %v448_v14  ;;  %v450_v28 = vmax.f32 %v418_v19, 0.0  ;;  %v451_v29 = vmax.f32 %v419_v20, 0.0  ;;  %v359_v30 = vadd.f32 %v1014_v5, %v320_v21 }
  0x39   : > { %v452_v31 = vmax.f32 %v420_v23, 0.0  ;;  %v453_v32 = vmax.f32 %v421_v24, 0.0  ;;  %v422_v33 = vadd.f32 %v390_v22, %v358_v25 }
  0x3a   : > { %935 = vst [vmem:[%s1048_s5 + $0x60] sm:$0xff] %v892_v27   ;;  %v897_v34 = vpack.c.bf16 %v451_v29, %v450_v28  ;;  %v423_v1 = vadd.f32 %v391_v26, %v359_v30 }
  0x3b   : > { %v902_v35 = vpack.c.bf16 %v453_v32, %v452_v31  ;;  %v454_v36 = vmax.f32 %v422_v33, 0.0 }
  0x3c   : > { %936 = vst [vmem:[%s1048_s5 + $0x68] sm:$0xff] %v897_v34   ;;  %v455_v37 = vmax.f32 %v423_v1, 0.0 }
  0x3d   : > { %937 = vst [vmem:[%s1048_s5 + $0x70] sm:$0xff] %v902_v35  }
  0x3e   : > { %v907_v38 = vpack.c.bf16 %v455_v37, %v454_v36 }
  0x40   : > { %938 = vst [vmem:[%s1048_s5 + $0x78] sm:$0xff] %v907_v38  }
  0x41 PF: > { %s14_s15 = sadd.s32 1, %s953_s15  }
  0x42   : > { %p11_p4 = scmp.ge.s32.totalorder %s14_s15, 4  }
  0x44   :  { %13 = sbr.rel (!%p11_p4) target bundleno = 1 (0x1), region = 69 }

// kernel: basic_block.3
= control target key start
LH: loop header
LB: loop body
LE: loop exit
PB: predicated region body
PF: predicated region fallthrough
CT: control target
= control target key end

     0   :  { %s3673_s15 = smov 0   ;;  %s5352_s0 = inlined_call_operand.vmem [shape: bf16[2,16,16,128], index: 0, kind: input, shape index: {}]   ;;  %s5353_s1 = inlined_call_operand.vmem [shape: bf16[1152,128], index: 1, kind: input, shape index: {}]   ;;  %s5354_s2 = inlined_call_operand.vmem [shape: bf16[2,16,16,128], index: 2, kind: output, shape index: {0}]   ;;  %s5355_s3 = inlined_call_operand.vmem [shape: f32[2,1,128], index: 3, kind: output, shape index: {1}]   ;;  %s5356_s4 = inlined_call_operand.vmem [shape: f32[2,1,128], index: 4, kind: output, shape index: {2}]  }
   0x1 LB: > { %s2945_s16 = sadd.s32 4294967295, %s3645_s15   ;;  %p2949_p0 = scmp.ge.s32.totalorder %s3645_s15, 1  ;;  %s3645_s15 = sphi %s3673_s15, %s15_s15  }
   0x2   : > { %p167_p1 = scmp.lt.s32.totalorder %s3645_s15, 3 }
   0x4   : > { %p168_p2 = pnand %p2949_p0, %p167_p1 }
   0x6   : > { %171 = sbr.rel (%p168_p2) target bundleno = 791 (0x317), region = 28 }
   0xb   : > { %v3551_v0 = vld [vmem:[%s5353_s1 + $0x38] sm:$0xff]   ;;  %v5357_v1 = vmov 0   ;;  %v3553_v3 = vld [vmem:[%s5353_s1 + $0x30] sm:$0xff]   ;;  %p199_p3 = scmp.lt.s32.totalorder %s2945_s16, 1  ;;  %v3705_v5 = vld [vmem:[%s5353_s1 + $0xa8] sm:$0xff]  }
   0xc   : > { %609 = vmatprep.subr.bf16.mxu0 %v5357_v1  ;;  %v3688_v2 = vld [vmem:[%s5353_s1 + $0xb8] sm:$0xff]   ;;  %v3698_v4 = vld [vmem:[%s5353_s1 + $0xb0] sm:$0xff]   ;;  %v3555_v6 = vld [vmem:[%s5353_s1 + $0x28] sm:$0xff]  }
   0xd   : > { %610 = vmatpush1.bf16.msra.mxu0 %v3551_v0  ;;  %3526 = vmatprep.subr.bf16.mxu1 %v3688_v2  ;;  %s5513_s16 = smov (!%p199_p3, %s2945_s16), 1  ;;  %v3718_v7 = vld [vmem:[%s5353_s1 + $0xa0] sm:$0xff]   ;;  %v3730_v9 = vld [vmem:[%s5353_s1 + $0x98] sm:$0xff]   ;;  %v3751_v12 = vld [vmem:[%s5353_s1 + $0x90] sm:$0xff]  }
   0xe   : > { %611 = vmatprep.subr.bf16.mxu0 %v5357_v1  ;;  %3534 = vmatpush3.bf16.msra.mxu1 %v3688_v2  ;;  %v3557_v8 = vld [vmem:[%s5353_s1 + $0x20] sm:$0xff]   ;;  %s3109_s7 = sshll.u32 %s5513_s16, 7  ;;  %v3559_v10 = vld [vmem:[%s5353_s1 + $0x18] sm:$0xff]   ;;  %v3561_v14 = vld [vmem:[%s5353_s1 + $0x10] sm:$0xff]   ;;  %s211_s6 = scalar_lea.vmem %s5355_s3, %s5513_s16 }
   0xf   : > { %3527 = vmatprep.subr.bf16.mxu1 %v3698_v4  ;;  %s3737_s12 = scalar_lea.vmem %s5352_s0, %s3109_s7  ;;  %v3767_v15 = vld [vmem:[%s5353_s1 + $0x88] sm:$0xff]   ;;  %v3565_v17 = vld [vmem:[%s5353_s1] sm:$0xff]   ;;  %v3567_v24 = vld [vmem:[%s5353_s1 + $0x78] sm:$0xff]   ;;  %s4986_s30 = scalar_lea.vmem %s5354_s2, %s3109_s7 }
  0x10   : > { %v3745_v11 = vld [vmem:[%s3737_s12 + $0x34] sm:$0xf]  ;;  %v3563_v16 = vld [vmem:[%s5353_s1 + $0x8] sm:$0xff]   ;;  %v3781_v18 = vld [vmem:[%s5353_s1 + $0x80] sm:$0xff]   ;;  %s214_s10 = scalar_lea.vmem %s5356_s4, %s5513_s16 }
  0x11   : > { %612 = vmatpush1.bf16.msra.mxu0 %v3553_v3  ;;  %v3755_v13 = vcombine.low %v3745_v11, %v5357_v1  ;;  %v232_v19 = vld [vmem:[%s3737_s12 + $0x40] sm:$0xf]  ;;  %v233_v20 = vld [vmem:[%s3737_s12 + $0x44] sm:$0xf]  ;;  %v3787_v21 = vld [vmem:[%s3737_s12 + $0x38] sm:$0xf] }
  0x12   : > { %613 = vmatprep.subr.bf16.mxu0 %v5357_v1  ;;  %3535 = vmatpush3.bf16.msra.mxu1 %v3698_v4  ;;  %v3789_v22 = vcombine.low %v232_v19, %v233_v20  ;;  %v3793_v23 = vld [vmem:[%s3737_s12 + $0x3c] sm:$0xf]  ;;  %v3809_v27 = vcombine.low %v5357_v1, %v232_v19  ;;  %v3570_v28 = vld [vmem:[%s5353_s1 + $0x70] sm:$0xff]   ;;  %v3818_v29 = vld [vmem:[%s3737_s12] sm:$0xf]  ;;  %v3843_v36 = vcombine.low %v233_v20, %v5357_v1 }
  0x13   : > { %3528 = vmatprep.subr.bf16.mxu1 %v3705_v5  ;;  %3366 = vmatprep.mubr.bf16.mxu1 %v3755_v13  ;;  %v3802_v25 = vcombine.low %v3787_v21, %v3793_v23  ;;  %v3569_v26 = vld [vmem:[%s5353_s1 + $0xf8] sm:$0xff]   ;;  %v3571_v30 = vld [vmem:[%s5353_s1 + $0xf0] sm:$0xff]   ;;  %v3825_v31 = vld [vmem:[%s3737_s12 + $0x48] sm:$0xf] }
  0x14   : > { %v3828_v32 = vld [vmem:[%s3737_s12 + $0x4] sm:$0xf]  ;;  %v3832_v33 = vld [vmem:[%s3737_s12 + $0x4c] sm:$0xf]  ;;  %v236_v41 = vld [vmem:[%s3737_s12 + $0x50] sm:$0xf] }
  0x15   : > { %614 = vmatpush1.bf16.msra.mxu0 %v3555_v6  ;;  %v3836_v34 = vcombine.low %v3818_v29, %v3828_v32  ;;  %v3572_v35 = vld [vmem:[%s5353_s1 + $0x68] sm:$0xff]   ;;  %v3851_v38 = vcombine.low %v3825_v31, %v3832_v33  ;;  %v3574_v39 = vld [vmem:[%s5353_s1 + $0x60] sm:$0xff]   ;;  %v237_v42 = vld [vmem:[%s3737_s12 + $0x54] sm:$0xf]  ;;  %v3871_v44 = vcombine.low %v5357_v1, %v236_v41 }
  0x16   : > { %615 = vmatprep.subr.bf16.mxu0 %v5357_v1  ;;  %3536 = vmatpush3.bf16.msra.mxu1 %v3705_v5  ;;  %v3573_v37 = vld [vmem:[%s5353_s1 + $0xe8] sm:$0xff]   ;;  %v3575_v40 = vld [vmem:[%s5353_s1 + $0xe0] sm:$0xff]   ;;  %v3577_v43 = vld [vmem:[%s5353_s1 + $0x58] sm:$0xff]   ;;  %v3877_v46 = vcombine.low %v237_v42, %v5357_v1  ;;  %v3895_v51 = vcombine.low %v236_v41, %v237_v42  ;;  %v4032_v42 = vcombine.low %v5357_v1, %v5357_v1 }
  0x17   : > { %3529 = vmatprep.subr.bf16.mxu1 %v3718_v7  ;;  %641 = vmatprep.mubr.bf16.mxu0 %v3836_v34  ;;  %v3578_v45 = vld [vmem:[%s5353_s1 + $0xd8] sm:$0xff]   ;;  %v3579_v47 = vld [vmem:[%s5353_s1 + $0x50] sm:$0xff]   ;;  %v240_v52 = vld [vmem:[%s3737_s12 + $0x60] sm:$0xf] }
  0x18   : > { %v3580_v48 = vld [vmem:[%s5353_s1 + $0xd0] sm:$0xff]   ;;  %v3889_v49 = vld [vmem:[%s3737_s12 + $0x58] sm:$0xf]  ;;  %v3893_v50 = vld [vmem:[%s3737_s12 + $0x5c] sm:$0xf]  ;;  %5369 = vst [vmem:[#allocation2_spill] sm:$0xff] %v3895_v51  ;;  %v3921_v59 = vcombine.low %v5357_v1, %v240_v52 }
  0x19   : > { %616 = vmatpush1.bf16.msra.mxu0 %v3557_v8  ;;  %v3900_v53 = vld [vmem:[%s3737_s12 + $0x30] sm:$0xf]  ;;  %v3581_v54 = vld [vmem:[%s5353_s1 + $0x48] sm:$0xff]   ;;  %v3912_v56 = vcombine.low %v3889_v49, %v3893_v50  ;;  %v3584_v58 = vld [vmem:[%s5353_s1 + $0x40] sm:$0xff]  }
  0x1a   : > { %617 = vmatprep.subr.bf16.mxu0 %v5357_v1  ;;  %3537 = vmatpush3.bf16.msra.mxu1 %v3718_v7  ;;  %v3907_v55 = vcombine.low %v3900_v53, %v3745_v11  ;;  %v3583_v57 = vld [vmem:[%s5353_s1 + $0xc8] sm:$0xff]   ;;  %v3585_v61 = vld [vmem:[%s5353_s1 + $0xc0] sm:$0xff]   ;;  %v3587_v3 = vld [vmem:[%s5353_s1 + $0x138] sm:$0xff]  }
  0x1b   : > { %3530 = vmatprep.subr.bf16.mxu1 %v3730_v9  ;;  %v3925_v60 = vld [vmem:[%s3737_s12 + $0x8] sm:$0xf]  ;;  %v241_v62 = vld [vmem:[%s3737_s12 + $0x64] sm:$0xf]  ;;  %v3937_v0 = vld [vmem:[%s3737_s12 + $0x6c] sm:$0xf] }
  0x1c   : > { %v3934_v63 = vld [vmem:[%s3737_s12 + $0x68] sm:$0xf]  ;;  %v3946_v6 = vcombine.low %v5357_v1, %v3925_v60  ;;  %v3950_v8 = vcombine.low %v241_v62, %v5357_v1  ;;  %v219_v11 = vld [vmem:[%s3737_s12 + $0xc] sm:$0xf]  ;;  %v3594_v41 = vld [vmem:[%s5353_s1 + $0x118] sm:$0xff]  }
  0x1d   : > { %618 = vmatpush1.bf16.msra.mxu0 %v3559_v10  ;;  %v3954_v10 = vcombine.low %v3934_v63, %v3937_v0  ;;  %v3590_v19 = vld [vmem:[%s5353_s1 + $0x128] sm:$0xff]   ;;  %v3982_v20 = vcombine.low %v219_v11, %v5357_v1 }
  0x1e   : > { %619 = vmatprep.subr.bf16.mxu0 %v5357_v1  ;;  %3538 = vmatpush3.bf16.msra.mxu1 %v3730_v9 }
  0x1f   : > { %3531 = vmatprep.subr.bf16.mxu1 %v3751_v12 }
  0x21   : > { %620 = vmatpush1.bf16.msra.mxu0 %v3561_v14  ;;  %v3588_v14 = vld [vmem:[%s5353_s1 + $0x130] sm:$0xff]  }
  0x22   : > { %621 = vmatprep.subr.bf16.mxu0 %v5357_v1  ;;  %3539 = vmatpush3.bf16.msra.mxu1 %v3751_v12 }
  0x23   : > { %3532 = vmatprep.subr.bf16.mxu1 %v3767_v15 }
  0x25   : > { %622 = vmatpush1.bf16.msra.mxu0 %v3563_v16  ;;  %v3965_v16 = vld [vmem:[%s3737_s12 + $0x70] sm:$0xf] }
  0x26   : > { %623 = vmatprep.subr.bf16.mxu0 %v5357_v1  ;;  %3540 = vmatpush3.bf16.msra.mxu1 %v3767_v15 }
  0x27   : > { %3533 = vmatprep.subr.bf16.mxu1 %v3781_v18 }
  0x29   : > { %624 = vmatpush1.bf16.msra.mxu0 %v3565_v17  ;;  %v3969_v17 = vld [vmem:[%s3737_s12 + $0x74] sm:$0xf] }
  0x2a   : > { %625 = vmatprep.subr.bf16.mxu0 %v5357_v1  ;;  %3541 = vmatpush3.bf16.msra.mxu1 %v3781_v18 }
  0x2b   : > { %1251 = vmatprep.subr.bf16.mxu1 %v5357_v1 }
  0x2d   : > { %626 = vmatpush2.bf16.msra.mxu0 %v3567_v24  ;;  %3367 = vmatmul.mubr.bf16.vlgmr.msra.gmra.mxu1 %v3802_v25  ;;  %v3987_v24 = vcombine.low %v5357_v1, %v3965_v16 }
  0x2e   : > { %627 = vmatprep.subr.bf16.mxu0 %v5357_v1  ;;  %1252 = vmatpush1.bf16.msra.mxu1 %v3569_v26  ;;  %v3992_v26 = vcombine.low %v3969_v17, %v5357_v1 }
  0x2f   : > { %3370 = vmatprep.mubr.bf16.mxu1 %v3809_v27  ;;  %1253 = vmatprep.subr.bf16.mxu1 %v5357_v1 }
  0x31   : > { %628 = vmatpush2.bf16.msra.mxu0 %v3570_v28  ;;  %v221_v28 = vld [vmem:[%s3737_s12 + $0x14] sm:$0xf] }
  0x32   : > { %629 = vmatprep.subr.bf16.mxu0 %v5357_v1  ;;  %1254 = vmatpush1.bf16.msra.mxu1 %v3571_v30  ;;  %v3591_v30 = vld [vmem:[%s5353_s1 + $0x120] sm:$0xff]  }
  0x33   : > { %1255 = vmatprep.subr.bf16.mxu1 %v5357_v1 }
  0x35   : > { %630 = vmatpush2.bf16.msra.mxu0 %v3572_v35  ;;  %3371 = vmatmul.mubr.bf16.gmra.mxu1 %v3843_v36  ;;  %v4009_v35 = vld [vmem:[%s3737_s12 + $0x78] sm:$0xf] }
  0x36   : > { %631 = vmatprep.subr.bf16.mxu0 %v5357_v1  ;;  %1256 = vmatpush1.bf16.msra.mxu1 %v3573_v37  ;;  %v4012_v37 = vld [vmem:[%s3737_s12 + $0x7c] sm:$0xf] }
  0x37   : > { %3374 = vmatprep.mubr.bf16.mxu1 %v3851_v38  ;;  %1257 = vmatprep.subr.bf16.mxu1 %v5357_v1 }
  0x39   : > { %632 = vmatpush2.bf16.msra.mxu0 %v3574_v39 }
  0x3a   : > { %633 = vmatprep.subr.bf16.mxu0 %v5357_v1  ;;  %1258 = vmatpush1.bf16.msra.mxu1 %v3575_v40  ;;  %v4024_v40 = vcombine.low %v4009_v35, %v4012_v37 }
  0x3b   : > { %1259 = vmatprep.subr.bf16.mxu1 %v5357_v1 }
  0x3d   : > { %634 = vmatpush2.bf16.msra.mxu0 %v3577_v43  ;;  %3375 = vmatmul.mubr.bf16.gmra.mxu1 %v3871_v44  ;;  %v222_v43 = vld [vmem:[%s3737_s12 + $0x18] sm:$0xf] }
  0x3e   : > { %635 = vmatprep.subr.bf16.mxu0 %v5357_v1  ;;  %1260 = vmatpush1.bf16.msra.mxu1 %v3578_v45  ;;  %v3595_v45 = vld [vmem:[%s5353_s1 + $0x110] sm:$0xff]  }
  0x3f   : > { %3378 = vmatprep.mubr.bf16.mxu1 %v3877_v46  ;;  %1261 = vmatprep.subr.bf16.mxu1 %v5357_v1 }
  0x41   : > { %636 = vmatpush2.bf16.msra.mxu0 %v3579_v47  ;;  %v4048_v47 = vcombine.low %v3925_v60, %v219_v11  ;;  %v224_v60 = vld [vmem:[%s3737_s12 + $0x20] sm:$0xf]  ;;  %v4101_v11 = vcombine.low %v3965_v16, %v3969_v17 }
  0x42   : > { %637 = vmatprep.subr.bf16.mxu0 %v5357_v1  ;;  %1262 = vmatpush1.bf16.msra.mxu1 %v3580_v48  ;;  %v3606_v16 = vld [vmem:[%s5353_s1 + $0x1a0] sm:$0xff]  }
  0x43   : > { %1263 = vmatprep.subr.bf16.mxu1 %v5357_v1  ;;  %5371 = vst [vmem:[#allocation4_spill] sm:$0xff] %v4101_v11 }
  0x45   : > { %638 = vmatpush2.bf16.msra.mxu0 %v3581_v54  ;;  %3379 = vmatmul.mubr.bf16.gmra.mxu1 %v3912_v56  ;;  %v3598_v54 = vld [vmem:[%s5353_s1 + $0x100] sm:$0xff]  }
  0x46   : > { %639 = vmatprep.subr.bf16.mxu0 %v5357_v1  ;;  %1264 = vmatpush1.bf16.msra.mxu1 %v3583_v57 }
  0x47   : > { %3382 = vmatprep.mubr.bf16.mxu1 %v3921_v59  ;;  %1265 = vmatprep.subr.bf16.mxu1 %v5357_v1 }
  0x49   : > { %640 = vmatpush2.bf16.msra.mxu0 %v3584_v58  ;;  %v3599_v58 = vld [vmem:[%s5353_s1 + $0x1b8] sm:$0xff]  }
  0x4a   : > { %3334 = vmatprep.subr.bf16.mxu0 %v3688_v2  ;;  %1266 = vmatpush1.bf16.msra.mxu1 %v3585_v61  ;;  %v225_v61 = vld [vmem:[%s3737_s12 + $0x24] sm:$0xf] }
  0x4b   : > { %1267 = vmatprep.subr.bf16.mxu1 %v5357_v1 }
  0x4c   : > { %642 = vmatmul.mubr.bf16.vlgmr.msra.gmra.mxu0 %v5357_v1 }
  0x4d   : > { %3335 = vmatpush3.bf16.msra.mxu0 %v3688_v2  ;;  %649 = vmatprep.mubr.bf16.mxu0 %v3946_v6  ;;  %v3976_v2 = vcombine.low %v5357_v1, %v3818_v29  ;;  %v4002_v29 = vcombine.low %v240_v52, %v241_v62  ;;  %v3597_v52 = vld [vmem:[%s5353_s1 + $0x108] sm:$0xff]   ;;  %v4094_v62 = vcombine.low %v221_v28, %v5357_v1 }
  0x4e   : > { %3383 = vmatmul.mubr.bf16.gmra.mxu1 %v3950_v8  ;;  %3336 = vmatprep.subr.bf16.mxu0 %v3698_v4 }
  0x4f   : > { %1268 = vmatpush2.bf16.msra.mxu1 %v3587_v3  ;;  %3386 = vmatprep.mubr.bf16.mxu1 %v3954_v10  ;;  %5370 = vst [vmem:[#allocation3_spill] sm:$0xff] %v4002_v29  ;;  %v4097_v3 = vcombine.low %v224_v60, %v225_v61 }
  0x50   : > { %1269 = vmatprep.subr.bf16.mxu1 %v5357_v1 }
  0x51   : > { %3337 = vmatpush3.bf16.msra.mxu0 %v3698_v4  ;;  %v220_v4 = vld [vmem:[%s3737_s12 + $0x10] sm:$0xf] }
  0x52   : > { %3338 = vmatprep.subr.bf16.mxu0 %v3705_v5  ;;  %v4019_v39 = vcombine.low %v220_v4, %v221_v28  ;;  %v4073_v57 = vcombine.low %v5357_v1, %v220_v4  ;;  %v3607_v28 = vld [vmem:[%s5353_s1 + $0x198] sm:$0xff]  }
  0x53   : > { %1270 = vmatpush2.bf16.msra.mxu1 %v3588_v14  ;;  %v3603_v14 = vld [vmem:[%s5353_s1 + $0x1a8] sm:$0xff]  }
  0x54   : > { %650 = vmatmul.mubr.bf16.gmra.mxu0 %v3976_v2  ;;  %1271 = vmatprep.subr.bf16.mxu1 %v5357_v1 }
  0x55   : > { %657 = vmatprep.mubr.bf16.mxu0 %v3982_v20  ;;  %3339 = vmatpush3.bf16.msra.mxu0 %v3705_v5  ;;  %v4017_v5 = vcombine.low %v3828_v32, %v5357_v1  ;;  %v314_v32 = vunpack.c.h.b16 %v5357_v1 }
  0x56   : > { %3387 = vmatmul.mubr.bf16.gmra.mxu1 %v3987_v24  ;;  %3340 = vmatprep.subr.bf16.mxu0 %v3718_v7 }
  0x57   : > { %1272 = vmatpush2.bf16.msra.mxu1 %v3590_v19  ;;  %3390 = vmatprep.mubr.bf16.mxu1 %v3992_v26  ;;  %v226_v19 = vld [vmem:[%s3737_s12 + $0x28] sm:$0xf] }
  0x58   : > { %1273 = vmatprep.subr.bf16.mxu1 %v5357_v1  ;;  %v4119_v4 = vcombine.low %v5357_v1, %v226_v19 }
  0x59   : > { %3341 = vmatpush3.bf16.msra.mxu0 %v3718_v7  ;;  %v313_v7 = vunpack.c.l.b16 %v5357_v1 }
  0x5a   : > { %3342 = vmatprep.subr.bf16.mxu0 %v3730_v9 }
  0x5b   : > { %1274 = vmatpush2.bf16.msra.mxu1 %v3591_v30  ;;  %v4055_v48 = vpack.c.b16 %v313_v7, %v314_v32  ;;  %v227_v30 = vld [vmem:[%s3737_s12 + $0x2c] sm:$0xf]  ;;  %v4134_v7 = vcombine.low %v5357_v1, %v224_v60 }
  0x5c   : > { %658 = vmatmul.mubr.bf16.gmra.mxu0 %v4017_v5  ;;  %1275 = vmatprep.subr.bf16.mxu1 %v5357_v1  ;;  %v4138_v32 = vcombine.low %v227_v30, %v5357_v1  ;;  %v4172_v60 = vcombine.low %v226_v19, %v227_v30  ;;  %v4197_v19 = vcombine.low %v3793_v23, %v5357_v1  ;;  %v3621_v23 = vld [vmem:[%s5353_s1 + $0x1d0] sm:$0xff]  }
  0x5d   : > { %665 = vmatprep.mubr.bf16.mxu0 %v4019_v39  ;;  %3343 = vmatpush3.bf16.msra.mxu0 %v3730_v9  ;;  %v4052_v9 = vcombine.low %v5357_v1, %v222_v43  ;;  %v4225_v30 = vcombine.low %v5357_v1, %v3825_v31  ;;  %v4245_v31 = vcombine.low %v5357_v1, %v3889_v49 }
  0x5e   : > { %3391 = vmatmul.mubr.bf16.gmra.mxu1 %v4024_v40  ;;  %3344 = vmatprep.subr.bf16.mxu0 %v3751_v12  ;;  %v4265_v49 = vcombine.low %v5357_v1, %v3934_v63 }
  0x5f   : > { %1276 = vmatpush2.bf16.msra.mxu1 %v3594_v41  ;;  %3394 = vmatprep.mubr.bf16.mxu1 %v4032_v42  ;;  %v3609_v41 = vld [vmem:[%s5353_s1 + $0x190] sm:$0xff]   ;;  %5372 = vst [vmem:[#allocation5_spill] sm:$0xff] %v4225_v30  ;;  %5374 = vst [vmem:[#allocation7_spill] sm:$0xff] %v4245_v31 }
  0x60   : > { %1277 = vmatprep.subr.bf16.mxu1 %v5357_v1  ;;  %5376 = vst [vmem:[#allocation9_spill] sm:$0xff] %v4265_v49 }
  0x61   : > { %3345 = vmatpush3.bf16.msra.mxu0 %v3751_v12  ;;  %v223_v12 = vld [vmem:[%s3737_s12 + $0x1c] sm:$0xf] }
  0x62   : > { %3346 = vmatprep.subr.bf16.mxu0 %v3767_v15  ;;  %v4115_v17 = vcombine.low %v222_v43, %v223_v12  ;;  %v3610_v43 = vld [vmem:[%s5353_s1 + $0x188] sm:$0xff]  }
  0x63   : > { %1278 = vmatpush2.bf16.msra.mxu1 %v3595_v45  ;;  %v3612_v45 = vld [vmem:[%s5353_s1 + $0x180] sm:$0xff]  }
  0x64   : > { %666 = vmatmul.mubr.bf16.gmra.mxu0 %v4048_v47  ;;  %1279 = vmatprep.subr.bf16.mxu1 %v5357_v1 }
  0x65   : > { %673 = vmatprep.mubr.bf16.mxu0 %v4052_v9  ;;  %3347 = vmatpush3.bf16.msra.mxu0 %v3767_v15  ;;  %v4077_v15 = vcombine.low %v223_v12, %v5357_v1  ;;  %v3613_v12 = vld [vmem:[%s5353_s1 + $0x1f8] sm:$0xff]  }
  0x66   : > { %3395 = vmatmul.mubr.bf16.gmra.mxu1 %v4055_v48  ;;  %3348 = vmatprep.subr.bf16.mxu0 %v3781_v18 }
  0x67   : > { %1280 = vmatpush2.bf16.msra.mxu1 %v3597_v52  ;;  %1283 = vmatprep.mubr.bf16.mxu1 %v3836_v34  ;;  %v4152_v52 = vcombine.low %v225_v61, %v5357_v1  ;;  %v4177_v61 = vcombine.low %v5357_v1, %v3787_v21  ;;  %v3618_v21 = vld [vmem:[%s5353_s1 + $0x1e0] sm:$0xff]  }
  0x68   : > { %1281 = vmatprep.subr.bf16.mxu1 %v5357_v1 }
  0x69   : > { %3349 = vmatpush3.bf16.msra.mxu0 %v3781_v18  ;;  %v3602_v18 = vld [vmem:[%s5353_s1 + $0x1b0] sm:$0xff]  }
  0x6b   : > { %1282 = vmatpush2.bf16.msra.mxu1 %v3598_v54  ;;  %v4161_v54 = vld [vmem:[%s5353_s1 + $0x178] sm:$0xff]  }
  0x6c   : > { %674 = vmatmul.mubr.bf16.gmra.mxu0 %v4073_v57  ;;  %1861 = vmatprep.subr.bf16.mxu1 %v5357_v1 }
  0x6d   : > { %681 = vmatprep.mubr.bf16.mxu0 %v4077_v15  ;;  %3398 = vmatprep.subr.bf16.mxu0 %v4161_v54 }
  0x6e   : > { %1284 = vmatmul.mubr.bf16.vlgmr.msra.gmra.mxu1 %v5357_v1 }
  0x6f   : > { %1862 = vmatpush1.bf16.msra.mxu1 %v3599_v58  ;;  %1291 = vmatprep.mubr.bf16.mxu1 %v3946_v6  ;;  %v3615_v58 = vld [vmem:[%s5353_s1 + $0x1f0] sm:$0xff]  }
  0x70   : > { %1863 = vmatprep.subr.bf16.mxu1 %v5357_v1 }
  0x73   : > { %1864 = vmatpush1.bf16.msra.mxu1 %v3602_v18  ;;  %v3616_v18 = vld [vmem:[%s5353_s1 + $0x1e8] sm:$0xff]  }
  0x74   : > { %682 = vmatmul.mubr.bf16.gmra.mxu0 %v4094_v62  ;;  %1865 = vmatprep.subr.bf16.mxu1 %v5357_v1 }
  0x75   : > { %689 = vmatprep.mubr.bf16.mxu0 %v4097_v3 }
  0x76   : > { %1292 = vmatmul.mubr.bf16.gmra.mxu1 %v3976_v2 }
  0x77   : > { %1298 = vmatprep.mubr.bf16.mxu1 %v3982_v20  ;;  %1866 = vmatpush1.bf16.msra.mxu1 %v3603_v14  ;;  %v4192_v14 = vcombine.low %v5357_v1, %v3900_v53  ;;  %v3625_v53 = vld [vmem:[%s5353_s1 + $0x1c8] sm:$0xff]  }
  0x78   : > { %1867 = vmatprep.subr.bf16.mxu1 %v5357_v1 }
  0x7b   : > { %1868 = vmatpush1.bf16.msra.mxu1 %v3606_v16  ;;  %v3619_v16 = vld [vmem:[%s5353_s1 + $0x1d8] sm:$0xff]  }
  0x7c   : > { %690 = vmatmul.mubr.bf16.gmra.mxu0 %v4115_v17  ;;  %1869 = vmatprep.subr.bf16.mxu1 %v5357_v1 }
  0x7d   : > { %697 = vmatprep.mubr.bf16.mxu0 %v4119_v4 }
  0x7e   : > { %1299 = vmatmul.mubr.bf16.gmra.mxu1 %v4017_v5 }
  0x7f   : > { %1305 = vmatprep.mubr.bf16.mxu1 %v4019_v39  ;;  %1870 = vmatpush1.bf16.msra.mxu1 %v3607_v28  ;;  %v3629_v28 = vld [vmem:[%s5353_s1 + $0x1c0] sm:$0xff]  }
  0x80   : > { %1871 = vmatprep.subr.bf16.mxu1 %v5357_v1 }
  0x83   : > { %1872 = vmatpush1.bf16.msra.mxu1 %v3609_v41  ;;  %v4233_v41 = vcombine.low %v3832_v33, %v5357_v1  ;;  %v4253_v33 = vcombine.low %v3893_v50, %v5357_v1  ;;  %v4273_v50 = vcombine.low %v3937_v0, %v5357_v1 }
  0x84   : > { %698 = vmatmul.mubr.bf16.gmra.mxu0 %v4134_v7  ;;  %1873 = vmatprep.subr.bf16.mxu1 %v5357_v1 }
  0x85   : > { %705 = vmatprep.mubr.bf16.mxu0 %v4138_v32  ;;  %5373 = vst [vmem:[#allocation6_spill] sm:$0xff] %v4233_v41  ;;  %5375 = vst [vmem:[#allocation8_spill] sm:$0xff] %v4253_v33 }
  0x86   : > { %1306 = vmatmul.mubr.bf16.gmra.mxu1 %v4048_v47  ;;  %5377 = vst [vmem:[#allocation10_spill] sm:$0xff] %v4273_v50 }
  0x87   : > { %1313 = vmatprep.mubr.bf16.mxu1 %v4052_v9  ;;  %1874 = vmatpush1.bf16.msra.mxu1 %v3610_v43  ;;  %v4289_v43 = vcombine.low %v5357_v1, %v4009_v35  ;;  %v4305_v35 = vcombine.low %v4012_v37, %v5357_v1 }
  0x88   : > { %1875 = vmatprep.subr.bf16.mxu1 %v5357_v1 }
  0x89   : > { %5379 = vst [vmem:[#allocation12_spill] sm:$0xff] %v4289_v43  ;;  %5381 = vst [vmem:[#allocation14_spill] sm:$0xff] %v4305_v35 }
  0x8b   : > { %1876 = vmatpush1.bf16.msra.mxu1 %v3612_v45 }
  0x8c   : > { %706 = vmatmul.mubr.bf16.gmra.mxu0 %v4152_v52  ;;  %1877 = vmatprep.subr.bf16.mxu1 %v5357_v1 }
  0x8d   : > { %713 = vmatprep.mubr.bf16.mxu0 %v3907_v55 }
  0x8e   : > { %1314 = vmatmul.mubr.bf16.gmra.mxu1 %v4073_v57 }
  0x8f   : > { %1320 = vmatprep.mubr.bf16.mxu1 %v4077_v15  ;;  %1878 = vmatpush2.bf16.msra.mxu1 %v3613_v12 }
  0x90   : > { %1879 = vmatprep.subr.bf16.mxu1 %v5357_v1 }
  0x93   : > { %1880 = vmatpush2.bf16.msra.mxu1 %v3615_v58 }
  0x94   : > { %714 = vmatmul.mubr.bf16.gmra.mxu0 %v4172_v60  ;;  %1881 = vmatprep.subr.bf16.mxu1 %v5357_v1 }
  0x95   : > { %721 = vmatprep.mubr.bf16.mxu0 %v4177_v61 }
  0x96   : > { %1321 = vmatmul.mubr.bf16.gmra.mxu1 %v4094_v62 }
  0x97   : > { %1327 = vmatprep.mubr.bf16.mxu1 %v4097_v3  ;;  %1882 = vmatpush2.bf16.msra.mxu1 %v3616_v18 }
  0x98   : > { %1883 = vmatprep.subr.bf16.mxu1 %v5357_v1 }
  0x9b   : > { %1884 = vmatpush2.bf16.msra.mxu1 %v3618_v21 }
  0x9c   : > { %722 = vmatmul.mubr.bf16.gmra.mxu0 %v4192_v14  ;;  %1885 = vmatprep.subr.bf16.mxu1 %v5357_v1 }
  0x9d   : > { %729 = vmatprep.mubr.bf16.mxu0 %v4197_v19 }
  0x9e   : > { %1328 = vmatmul.mubr.bf16.gmra.mxu1 %v4115_v17 }
  0x9f   : > { %1335 = vmatprep.mubr.bf16.mxu1 %v4119_v4  ;;  %1886 = vmatpush2.bf16.msra.mxu1 %v3619_v16 }
  0xa0   : > { %1887 = vmatprep.subr.bf16.mxu1 %v5357_v1 }
  0xa3   : > { %1888 = vmatpush2.bf16.msra.mxu1 %v3621_v23 }
  0xa4   : > { %730 = vmatmul.mubr.bf16.gmra.mxu0 %v3755_v13  ;;  %1889 = vmatprep.subr.bf16.mxu1 %v5357_v1 }
  0xa5   : > { %737 = vmatprep.mubr.bf16.mxu0 %v3789_v22 }
  0xa6   : > { %1336 = vmatmul.mubr.bf16.gmra.mxu1 %v4134_v7 }
  0xa7   : > { %1342 = vmatprep.mubr.bf16.mxu1 %v4138_v32  ;;  %1890 = vmatpush2.bf16.msra.mxu1 %v3625_v53 }
  0xa8   : > { %1891 = vmatprep.subr.bf16.mxu1 %v5357_v1 }
  0xab   : > { %1892 = vmatpush2.bf16.msra.mxu1 %v3629_v28 }
  0xac   : > { %738 = vmatmul.mubr.bf16.gmra.mxu0 %v3802_v25 }
  0xad   : > { %745 = vmatprep.mubr.bf16.mxu0 %v4225_v30 }
  0xae   : > { %1343 = vmatmul.mubr.bf16.gmra.mxu1 %v4152_v52 }
  0xaf   : > { %1349 = vmatprep.mubr.bf16.mxu1 %v3907_v55 }
  0xb4   : > { %746 = vmatmul.mubr.bf16.gmra.mxu0 %v3809_v27 }
  0xb5   : > { %753 = vmatprep.mubr.bf16.mxu0 %v4233_v41 }
  0xb6   : > { %1350 = vmatmul.mubr.bf16.gmra.mxu1 %v4172_v60 }
  0xb7   : > { %1357 = vmatprep.mubr.bf16.mxu1 %v4177_v61 }
  0xbc   : > { %754 = vmatmul.mubr.bf16.gmra.mxu0 %v3843_v36 }
  0xbd   : > { %761 = vmatprep.mubr.bf16.mxu0 %v3895_v51 }
  0xbe   : > { %1358 = vmatmul.mubr.bf16.gmra.mxu1 %v4192_v14 }
  0xbf   : > { %1364 = vmatprep.mubr.bf16.mxu1 %v4197_v19 }
  0xc4   : > { %762 = vmatmul.mubr.bf16.gmra.mxu0 %v3851_v38 }
  0xc5   : > { %769 = vmatprep.mubr.bf16.mxu0 %v4245_v31 }
  0xc6   : > { %1365 = vmatmul.mubr.bf16.gmra.mxu1 %v3755_v13 }
  0xc7   : > { %1371 = vmatprep.mubr.bf16.mxu1 %v3789_v22 }
  0xcc   : > { %770 = vmatmul.mubr.bf16.gmra.mxu0 %v3871_v44 }
  0xcd   : > { %777 = vmatprep.mubr.bf16.mxu0 %v4253_v33 }
  0xce   : > { %1372 = vmatmul.mubr.bf16.gmra.mxu1 %v3802_v25 }
  0xcf   : > { %1379 = vmatprep.mubr.bf16.mxu1 %v4225_v30 }
  0xd4   : > { %778 = vmatmul.mubr.bf16.gmra.mxu0 %v3877_v46 }
  0xd5   : > { %785 = vmatprep.mubr.bf16.mxu0 %v4002_v29 }
  0xd6   : > { %1380 = vmatmul.mubr.bf16.gmra.mxu1 %v3809_v27 }
  0xd7   : > { %1386 = vmatprep.mubr.bf16.mxu1 %v4233_v41 }
  0xdc   : > { %786 = vmatmul.mubr.bf16.gmra.mxu0 %v3912_v56 }
  0xdd   : > { %793 = vmatprep.mubr.bf16.mxu0 %v4265_v49 }
  0xde   : > { %1387 = vmatmul.mubr.bf16.gmra.mxu1 %v3843_v36 }
  0xdf   : > { %1393 = vmatprep.mubr.bf16.mxu1 %v3895_v51  ;;  %v3623_v51 = vld [vmem:[%s5353_s1 + $0x168] sm:$0xff]  }
  0xe4   : > { %794 = vmatmul.mubr.bf16.gmra.mxu0 %v3921_v59 }
  0xe5   : > { %801 = vmatprep.mubr.bf16.mxu0 %v4273_v50 }
  0xe6   : > { %1394 = vmatmul.mubr.bf16.gmra.mxu1 %v3851_v38 }
  0xe7   : > { %1401 = vmatprep.mubr.bf16.mxu1 %v4245_v31 }
  0xec   : > { %802 = vmatmul.mubr.bf16.gmra.mxu0 %v3950_v8 }
  0xed   : > { %809 = vmatprep.mubr.bf16.mxu0 %v4101_v11  ;;  %v4281_v63 = vpop.f32.mrf.mxu1 }
  0xee   : > { %1402 = vmatmul.mubr.bf16.gmra.mxu1 %v3871_v44 }
  0xef   : > { %1408 = vmatprep.mubr.bf16.mxu1 %v4253_v33  ;;  %v4285_v0 = vpop.f32.mrf.mxu1 }
  0xf0   : > { %5378 = vst [vmem:[#allocation11_spill] sm:$0xff] %v4285_v0 }
  0xf1   : > { %v4291_v45 = vpop.f32.mrf.mxu1 }
  0xf3   : > { %v4293_v12 = vpop.f32.mrf.mxu1 }
  0xf4   : > { %5380 = vst [vmem:[#allocation13_spill] sm:$0xff] %v4293_v12  ;;  %810 = vmatmul.mubr.bf16.gmra.mxu0 %v3954_v10 }
  0xf5   : > { %817 = vmatprep.mubr.bf16.mxu0 %v4289_v43  ;;  %v4297_v58 = vpop.f32.mrf.mxu1 }
  0xf6   : > { %1409 = vmatmul.mubr.bf16.gmra.mxu1 %v3877_v46 }
  0xf7   : > { %1415 = vmatprep.mubr.bf16.mxu1 %v4002_v29  ;;  %v4301_v18 = vpop.f32.mrf.mxu1 }
  0xf9   : > { %v4307_v21 = vpop.f32.mrf.mxu1 }
  0xfb   : > { %v4309_v16 = vpop.f32.mrf.mxu1 }
  0xfc   : > { %818 = vmatmul.mubr.bf16.gmra.mxu0 %v3987_v24 }
  0xfd   : > { %825 = vmatprep.mubr.bf16.mxu0 %v4305_v35  ;;  %v4313_v23 = vpop.f32.mrf.mxu1 }
  0xfe   : > { %1416 = vmatmul.mubr.bf16.gmra.mxu1 %v3912_v56 }
  0xff   : > { %1423 = vmatprep.mubr.bf16.mxu1 %v4265_v49  ;;  %v4317_v53 = vpop.f32.mrf.mxu1  ;;  %v3622_v49 = vld [vmem:[%s5353_s1 + $0x170] sm:$0xff]  }
 0x101   : > { %v4319_v28 = vpop.f32.mrf.mxu1 }
 0x103   : > { %v4321_v37 = vpop.f32.mrf.mxu1 }
 0x104   : > { %826 = vmatmul.mubr.bf16.gmra.mxu0 %v3992_v26 }
 0x105   : > { %3350 = vmatprep.mubr.bf16.mxu0 %v4048_v47  ;;  %v4325_v1 = vpop.f32.mrf.mxu1 }
 0x106   : > { %1424 = vmatmul.mubr.bf16.gmra.mxu1 %v3921_v59 }
 0x107   : > { %1430 = vmatprep.mubr.bf16.mxu1 %v4273_v50  ;;  %v4329_v12 = vpop.f32.mrf.mxu1 }
 0x109   : > { %v4331_v0 = vpop.f32.mrf.mxu1 }
 0x10a   : > { %5382 = vst [vmem:[#allocation15_spill] sm:$0xff] %v4331_v0 }
 0x10b   : > { %v4336_v29 = vpop.f32.mrf.mxu1 }
 0x10c   : > { %v4338_v33 = vpop.f32.mrf.mxu0  ;;  %3351 = vmatmul.mubr.bf16.vlgmr.msra.gmra.mxu0 %v4073_v57 }
 0x10d   : > { %5383 = vst [vmem:[#allocation16_spill] sm:$0xff] %v4338_v33  ;;  %3399 = vmatpush3.bf16.msra.mxu0 %v4161_v54  ;;  %3354 = vmatprep.mubr.bf16.mxu0 %v4094_v62 }
 0x10e   : > { %v4343_v31 = vpop.f32.mrf.mxu1  ;;  %1431 = vmatmul.mubr.bf16.gmra.mxu1 %v3950_v8  ;;  %v645_v50 = vpop.f32.mrf.mxu0  ;;  %3400 = vmatprep.subr.bf16.mxu0 %v3622_v49 }
 0x10f   : > { %5384 = vst [vmem:[#allocation17_spill] sm:$0xff] %v4343_v31  ;;  %1437 = vmatprep.mubr.bf16.mxu1 %v4101_v11  ;;  %v3624_v50 = vld [vmem:[%s5353_s1 + $0x160] sm:$0xff]  }
 0x110   : > { %v4350_v41 = vpop.f32.mrf.mxu1  ;;  %v4352_v33 = vpop.f32.mrf.mxu0 }
 0x111   : > { %5385 = vst [vmem:[#allocation18_spill] sm:$0xff] %v4352_v33  ;;  %3401 = vmatpush3.bf16.msra.mxu0 %v3622_v49 }
 0x112   : > { %v4354_v54 = vpop.f32.mrf.mxu1  ;;  %v648_v30 = vpop.f32.mrf.mxu0  ;;  %3402 = vmatprep.subr.bf16.mxu0 %v3623_v51 }
 0x113   : > { %5386 = vst [vmem:[#allocation19_spill] sm:$0xff] %v4354_v54  ;;  %v3626_v30 = vld [vmem:[%s5353_s1 + $0x158] sm:$0xff]  }
 0x114   : > { %v4359_v31 = vpop.f32.mrf.mxu1  ;;  %v4361_v0 = vpop.f32.mrf.mxu0  ;;  %3355 = vmatmul.mubr.bf16.gmra.mxu0 %v4115_v17 }
 0x115   : > { %5387 = vst [vmem:[#allocation20_spill] sm:$0xff] %v4359_v31  ;;  %5388 = vst [vmem:[#allocation21_spill] sm:$0xff] %v4361_v0  ;;  %3403 = vmatpush3.bf16.msra.mxu0 %v3623_v51  ;;  %3358 = vmatprep.mubr.bf16.mxu0 %v4134_v7 }
 0x116   : > { %v4365_v11 = vpop.f32.mrf.mxu1  ;;  %1438 = vmatmul.mubr.bf16.gmra.mxu1 %v3954_v10  ;;  %v653_v49 = vpop.f32.mrf.mxu0  ;;  %3404 = vmatprep.subr.bf16.mxu0 %v3624_v50 }
 0x117   : > { %5389 = vst [vmem:[#allocation22_spill] sm:$0xff] %v4365_v11  ;;  %1445 = vmatprep.mubr.bf16.mxu1 %v4289_v43  ;;  %v3627_v49 = vld [vmem:[%s5353_s1 + $0x150] sm:$0xff]  }
 0x118   : > { %v4372_v33 = vpop.f32.mrf.mxu1  ;;  %v4374_v0 = vpop.f32.mrf.mxu0 }
 0x119   : > { %5390 = vst [vmem:[#allocation23_spill] sm:$0xff] %v4374_v0  ;;  %3405 = vmatpush3.bf16.msra.mxu0 %v3624_v50 }
 0x11a   : > { %v4376_v51 = vpop.f32.mrf.mxu1  ;;  %v656_v54 = vpop.f32.mrf.mxu0  ;;  %3406 = vmatprep.subr.bf16.mxu0 %v3626_v30 }
 0x11b   : > { %5391 = vst [vmem:[#allocation24_spill] sm:$0xff] %v4376_v51  ;;  %v3628_v54 = vld [vmem:[%s5353_s1 + $0x148] sm:$0xff]  }
 0x11c   : > { %v4381_v11 = vpop.f32.mrf.mxu1  ;;  %v4383_v31 = vpop.f32.mrf.mxu0  ;;  %3359 = vmatmul.mubr.bf16.gmra.mxu0 %v4152_v52 }
 0x11d   : > { %5392 = vst [vmem:[#allocation25_spill] sm:$0xff] %v4381_v11  ;;  %5393 = vst [vmem:[#allocation26_spill] sm:$0xff] %v4383_v31  ;;  %3407 = vmatpush3.bf16.msra.mxu0 %v3626_v30  ;;  %3362 = vmatprep.mubr.bf16.mxu0 %v4172_v60 }
 0x11e   : > { %v4387_v43 = vpop.f32.mrf.mxu1  ;;  %1446 = vmatmul.mubr.bf16.gmra.mxu1 %v3987_v24  ;;  %v661_v50 = vpop.f32.mrf.mxu0  ;;  %3408 = vmatprep.subr.bf16.mxu0 %v3627_v49 }
 0x11f   : > { %5394 = vst [vmem:[#allocation27_spill] sm:$0xff] %v4387_v43  ;;  %1452 = vmatprep.mubr.bf16.mxu1 %v4305_v35  ;;  %v3630_v50 = vld [vmem:[%s5353_s1 + $0x140] sm:$0xff]  }
 0x120   : > { %v4394_v0 = vpop.f32.mrf.mxu1  ;;  %v4396_v31 = vpop.f32.mrf.mxu0 }
 0x121   : > { %5395 = vst [vmem:[#allocation28_spill] sm:$0xff] %v4396_v31  ;;  %3409 = vmatpush3.bf16.msra.mxu0 %v3627_v49 }
 0x122   : > { %v4398_v30 = vpop.f32.mrf.mxu1  ;;  %v664_v51 = vpop.f32.mrf.mxu0  ;;  %3410 = vmatprep.subr.bf16.mxu0 %v3628_v54 }
 0x123   : > { %5396 = vst [vmem:[#allocation29_spill] sm:$0xff] %v4398_v30  ;;  %v3631_v51 = vld [vmem:[%s5353_s1 + $0x238] sm:$0xff]  }
 0x124   : > { %v4403_v43 = vpop.f32.mrf.mxu1  ;;  %v4405_v11 = vpop.f32.mrf.mxu0  ;;  %3363 = vmatmul.mubr.bf16.gmra.mxu0 %v4192_v14 }
 0x125   : > { %5397 = vst [vmem:[#allocation30_spill] sm:$0xff] %v4403_v43  ;;  %5398 = vst [vmem:[#allocation31_spill] sm:$0xff] %v4405_v11  ;;  %3411 = vmatpush3.bf16.msra.mxu0 %v3628_v54  ;;  %3414 = vmatprep.mubr.bf16.mxu0 %v4048_v47 }
 0x126   : > { %v4409_v35 = vpop.f32.mrf.mxu1  ;;  %1453 = vmatmul.mubr.bf16.gmra.mxu1 %v3992_v26  ;;  %v669_v49 = vpop.f32.mrf.mxu0  ;;  %3412 = vmatprep.subr.bf16.mxu0 %v3630_v50 }
 0x127   : > { %5399 = vst [vmem:[#allocation32_spill] sm:$0xff] %v4409_v35  ;;  %1893 = vmatprep.mubr.bf16.mxu1 %v3836_v34  ;;  %v3632_v49 = vld [vmem:[%s5353_s1 + $0x230] sm:$0xff]  }
 0x128   : > { %v4416_v31 = vpop.f32.mrf.mxu1  ;;  %v4418_v11 = vpop.f32.mrf.mxu0 }
 0x129   : > { %5400 = vst [vmem:[#allocation33_spill] sm:$0xff] %v4418_v11  ;;  %3413 = vmatpush3.bf16.msra.mxu0 %v3630_v50  ;;  %v5405_v50 = vmov 0  }
 0x12a   : > { %v4420_v54 = vpop.f32.mrf.mxu1  ;;  %v672_v30 = vpop.f32.mrf.mxu0  ;;  %3462 = vmatprep.subr.bf16.mxu0 %v3631_v51 }
 0x12b   : > { %5401 = vst [vmem:[#allocation34_spill] sm:$0xff] %v4420_v54  ;;  %v3633_v30 = vld [vmem:[%s5353_s1 + $0x228] sm:$0xff]  }
 0x12c   : > { %v4425_v35 = vpop.f32.mrf.mxu1  ;;  %v4427_v43 = vpop.f32.mrf.mxu0  ;;  %3415 = vmatmul.mubr.bf16.vlgmr.msra.gmra.mxu0 %v4073_v57 }
 0x12d   : > { %5402 = vst [vmem:[#allocation35_spill] sm:$0xff] %v4425_v35  ;;  %5403 = vst [vmem:[#allocation36_spill] sm:$0xff] %v4427_v43  ;;  %3463 = vmatpush3.bf16.msra.mxu0 %v3631_v51  ;;  %3418 = vmatprep.mubr.bf16.mxu0 %v4094_v62 }
 0x12e   : > { %v4431_v34 = vpop.f32.mrf.mxu1  ;;  %1894 = vmatmul.mubr.bf16.vlgmr.msra.gmra.mxu1 %v5405_v50  ;;  %v677_v11 = vpop.f32.mrf.mxu0  ;;  %3464 = vmatprep.subr.bf16.mxu0 %v3632_v49  ;;  %v3634_v50 = vld [vmem:[%s5353_s1 + $0x220] sm:$0xff]  }
 0x12f   : > { %5404 = vst [vmem:[#allocation37_spill] sm:$0xff] %v4431_v34  ;;  %1901 = vmatprep.mubr.bf16.mxu1 %v3946_v6 }
 0x130   : > { %v1287_v54 = vpop.f32.mrf.mxu1  ;;  %v4438_v35 = vpop.f32.mrf.mxu0 }
 0x131   : > { %5406 = vst [vmem:[#allocation38_spill] sm:$0xff] %v4438_v35  ;;  %3465 = vmatpush3.bf16.msra.mxu0 %v3632_v49  ;;  %v3635_v49 = vld [vmem:[%s5353_s1 + $0x218] sm:$0xff]  }
 0x132   : > { %v4440_v43 = vpop.f32.mrf.mxu1  ;;  %v680_v51 = vpop.f32.mrf.mxu0  ;;  %3466 = vmatprep.subr.bf16.mxu0 %v3633_v30 }
 0x133   : > { %5407 = vst [vmem:[#allocation39_spill] sm:$0xff] %v4440_v43 }
 0x134   : > { %v1290_v11 = vpop.f32.mrf.mxu1  ;;  %v4445_v34 = vpop.f32.mrf.mxu0  ;;  %3419 = vmatmul.mubr.bf16.gmra.mxu0 %v4115_v17 }
 0x135   : > { %3422 = vmatprep.mubr.bf16.mxu0 %v4134_v7  ;;  %3467 = vmatpush3.bf16.msra.mxu0 %v3633_v30 }
 0x136   : > { %v1293_v6 = vpop.f32.mrf.mxu1  ;;  %1902 = vmatmul.mubr.bf16.gmra.mxu1 %v3976_v2  ;;  %v685_v54 = vpop.f32.mrf.mxu0  ;;  %3468 = vmatprep.subr.bf16.mxu0 %v3634_v50  ;;  %v3636_v2 = vld [vmem:[%s5353_s1 + $0x210] sm:$0xff]  }
 0x137   : > { %1909 = vmatprep.mubr.bf16.mxu1 %v3982_v20 }
 0x138   : > { %v1294_v51 = vpop.f32.mrf.mxu1  ;;  %v4454_v11 = vpop.f32.mrf.mxu0 }
 0x139   : > { %3469 = vmatpush3.bf16.msra.mxu0 %v3634_v50 }
 0x13a   : > { %v4456_v43 = vpop.f32.mrf.mxu1  ;;  %v688_v35 = vpop.f32.mrf.mxu0  ;;  %3470 = vmatprep.subr.bf16.mxu0 %v3635_v49 }
 0x13b   : > { %5408 = vst [vmem:[#allocation40_spill] sm:$0xff] %v4456_v43  ;;  %v3637_v35 = vld [vmem:[%s5353_s1 + $0x208] sm:$0xff]  }
 0x13c   : > { %v1297_v30 = vpop.f32.mrf.mxu1  ;;  %v4461_v6 = vpop.f32.mrf.mxu0  ;;  %3423 = vmatmul.mubr.bf16.gmra.mxu0 %v4152_v52 }
 0x13d   : > { %5409 = vst [vmem:[#allocation41_spill] sm:$0xff] %v4461_v6  ;;  %3426 = vmatprep.mubr.bf16.mxu0 %v4172_v60  ;;  %3471 = vmatpush3.bf16.msra.mxu0 %v3635_v49  ;;  %v3638_v49 = vld [vmem:[%s5353_s1 + $0x200] sm:$0xff]  }
 0x13e   : > { %v4465_v20 = vpop.f32.mrf.mxu1  ;;  %1910 = vmatmul.mubr.bf16.gmra.mxu1 %v4017_v5  ;;  %v693_v50 = vpop.f32.mrf.mxu0  ;;  %3472 = vmatprep.subr.bf16.mxu0 %v3636_v2 }
 0x13f   : > { %5410 = vst [vmem:[#allocation42_spill] sm:$0xff] %v4465_v20  ;;  %1917 = vmatprep.mubr.bf16.mxu1 %v4019_v39 }
 0x140   : > { %v1302_v54 = vpop.f32.mrf.mxu1  ;;  %v4472_v51 = vpop.f32.mrf.mxu0 }
 0x141   : > { %5411 = vst [vmem:[#allocation43_spill] sm:$0xff] %v4472_v51  ;;  %3473 = vmatpush3.bf16.msra.mxu0 %v3636_v2 }
 0x142   : > { %v1303_v30 = vpop.f32.mrf.mxu1  ;;  %v696_v43 = vpop.f32.mrf.mxu0  ;;  %3474 = vmatprep.subr.bf16.mxu0 %v3637_v35 }
 0x144   : > { %v1304_v5 = vpop.f32.mrf.mxu1  ;;  %v4477_v50 = vpop.f32.mrf.mxu0  ;;  %3427 = vmatmul.mubr.bf16.gmra.mxu0 %v4192_v14 }
 0x145   : > { %5412 = vst [vmem:[#allocation44_spill] sm:$0xff] %v4477_v50  ;;  %3430 = vmatprep.mubr.bf16.mxu0 %v3755_v13  ;;  %3475 = vmatpush3.bf16.msra.mxu0 %v3637_v35 }
 0x146   : > { %v4481_v39 = vpop.f32.mrf.mxu1  ;;  %1918 = vmatmul.mubr.bf16.gmra.mxu1 %v4048_v47  ;;  %v701_v2 = vpop.f32.mrf.mxu0  ;;  %3476 = vmatprep.subr.bf16.mxu0 %v3638_v49 }
 0x147   : > { %5413 = vst [vmem:[#allocation45_spill] sm:$0xff] %v4481_v39  ;;  %1925 = vmatprep.mubr.bf16.mxu1 %v4052_v9 }
 0x148   : > { %v1309_v43 = vpop.f32.mrf.mxu1  ;;  %v4485_v54 = vpop.f32.mrf.mxu0 }
 0x149   : > { %5414 = vst [vmem:[#allocation46_spill] sm:$0xff] %v4485_v54  ;;  %3477 = vmatpush3.bf16.msra.mxu0 %v3638_v49 }
 0x14a   : > { %v4487_v30 = vpop.f32.mrf.mxu1  ;;  %v704_v5 = vpop.f32.mrf.mxu0 }
 0x14b   : > { %5415 = vst [vmem:[#allocation47_spill] sm:$0xff] %v4487_v30  ;;  %v2359_v5 = vlaneseq }
 0x14c   : > { %v1312_v20 = vpop.f32.mrf.mxu1  ;;  %v4489_v51 = vpop.f32.mrf.mxu0  ;;  %3431 = vmatmul.mubr.bf16.gmra.mxu0 %v3802_v25 }
 0x14d   : > { %5416 = vst [vmem:[#allocation48_spill] sm:$0xff] %v4489_v51  ;;  %3434 = vmatprep.mubr.bf16.mxu0 %v3809_v27 }
 0x14e   : > { %v1315_v35 = vpop.f32.mrf.mxu1  ;;  %1926 = vmatmul.mubr.bf16.gmra.mxu1 %v4073_v57  ;;  %v709_v2 = vpop.f32.mrf.mxu0 }
 0x14f   : > { %1933 = vmatprep.mubr.bf16.mxu1 %v4077_v15  ;;  %v4504_v2 = vshrl.u32 %v2359_v5, 7 }
 0x150   : > { %v1316_v9 = vpop.f32.mrf.mxu1  ;;  %v4495_v43 = vpop.f32.mrf.mxu0 }
 0x151   : > { %5417 = vst [vmem:[#allocation49_spill] sm:$0xff] %v4495_v43  ;;  %vm2361_vm0 = vcmp.lt.s32.totalorder %v4504_v2, 1  ;;  %vm2474_vm1 = vcmp.lt.s32.totalorder %v4504_v2, 7 }
 0x152   : > { %v4497_v49 = vpop.f32.mrf.mxu1  ;;  %v712_v30 = vpop.f32.mrf.mxu0 }
 0x153   : > { %5418 = vst [vmem:[#allocation50_spill] sm:$0xff] %v4497_v49 }
 0x154   : > { %v1319_v20 = vpop.f32.mrf.mxu1  ;;  %v715_v39 = vpop.f32.mrf.mxu0  ;;  %3435 = vmatmul.mubr.bf16.gmra.mxu0 %v3843_v36 }
 0x155   : > { %3438 = vmatprep.mubr.bf16.mxu0 %v3851_v38  ;;  %v941_v15 = vadd.f32 %v4281_v63, %v715_v39 }
 0x156   : > { %v4501_v54 = vpop.f32.mrf.mxu1  ;;  %1934 = vmatmul.mubr.bf16.gmra.mxu1 %v4094_v62  ;;  %v717_v35 = vpop.f32.mrf.mxu0 }
 0x157   : > { %5419 = vst [vmem:[#allocation51_spill] sm:$0xff] %v4501_v54  ;;  %1941 = vmatprep.mubr.bf16.mxu1 %v4097_v3  ;;  %v2317_v43 = vrot.slane %v941_v15, 7 }
 0x158   : > { %v1324_v9 = vpop.f32.mrf.mxu1  ;;  %v718_v30 = vpop.f32.mrf.mxu0 }
 0x159   : > { %v944_v20 = vadd.f32 %v4291_v45, %v718_v30 }
 0x15a   : > { %v1325_v49 = vpop.f32.mrf.mxu1  ;;  %v720_v6 = vpop.f32.mrf.mxu0 }
 0x15b   : > { %v2333_v51 = vrot.slane %v944_v20, 7 }
 0x15c   : > { %v1326_v54 = vpop.f32.mrf.mxu1  ;;  %v723_v50 = vpop.f32.mrf.mxu0  ;;  %3439 = vmatmul.mubr.bf16.gmra.mxu0 %v3871_v44 }
 0x15d   : > { %v949_v5 = vadd.f32 %v4301_v18, %v723_v50  ;;  %3442 = vmatprep.mubr.bf16.mxu0 %v3877_v46  ;;  %v4515_v3 = vsel %vm2361_vm0, %v2317_v43, %v2333_v51 }
 0x15e   : > { %v4517_v63 = vpop.f32.mrf.mxu1  ;;  %1942 = vmatmul.mubr.bf16.gmra.mxu1 %v4115_v17  ;;  %v725_v45 = vpop.f32.mrf.mxu0 }
 0x15f   : > { %v2349_v6 = vrot.slane %v949_v5, 7  ;;  %1949 = vmatprep.mubr.bf16.mxu1 %v4119_v4 }
 0x160   : > { %v1331_v39 = vpop.f32.mrf.mxu1  ;;  %v726_v54 = vpop.f32.mrf.mxu0 }
 0x161   : > { %v4523_v49 = vsel %vm2361_vm0, %v2349_v6, %v2317_v43  ;;  %v952_v51 = vadd.f32 %v4309_v16, %v726_v54 }
 0x162   : > { %v4525_v18 = vpop.f32.mrf.mxu1  ;;  %v728_v50 = vpop.f32.mrf.mxu0 }
 0x163   : > { %v2318_v20 = vrot.slane %v952_v51, 7 }
 0x164   : > { %v1334_v35 = vpop.f32.mrf.mxu1  ;;  %v731_v15 = vpop.f32.mrf.mxu0  ;;  %3443 = vmatmul.mubr.bf16.gmra.mxu0 %v3912_v56 }
 0x165   : > { %v957_v9 = vadd.f32 %v4297_v58, %v731_v15  ;;  %3446 = vmatprep.mubr.bf16.mxu0 %v3921_v59 }
 0x166   : > { %v1337_v4 = vpop.f32.mrf.mxu1  ;;  %1950 = vmatmul.mubr.bf16.gmra.mxu1 %v4134_v7  ;;  %v733_v30 = vpop.f32.mrf.mxu0 }
 0x167   : > { %v2334_v43 = vrot.slane %v957_v9, 7  ;;  %1957 = vmatprep.mubr.bf16.mxu1 %v4138_v32 }
 0x168   : > { %v1338_v5 = vpop.f32.mrf.mxu1  ;;  %v734_v45 = vpop.f32.mrf.mxu0 }
 0x169   : > { %v960_v16 = vadd.f32 %v4307_v21, %v734_v45  ;;  %v4536_v6 = vsel %vm2361_vm0, %v2318_v20, %v2334_v43 }
 0x16a   : > { %v4538_v39 = vpop.f32.mrf.mxu1  ;;  %v736_v58 = vpop.f32.mrf.mxu0 }
 0x16b   : > { %v2350_v54 = vrot.slane %v960_v16, 7 }
 0x16c   : > { %v1341_v50 = vpop.f32.mrf.mxu1  ;;  %v739_v35 = vpop.f32.mrf.mxu0  ;;  %3447 = vmatmul.mubr.bf16.gmra.mxu0 %v3950_v8 }
 0x16d   : > { %3450 = vmatprep.mubr.bf16.mxu0 %v3954_v10  ;;  %v4544_v32 = vsel %vm2361_vm0, %v2350_v54, %v2318_v20  ;;  %v965_v15 = vadd.f32 %v4317_v53, %v739_v35 }
 0x16e   : > { %v4546_v51 = vpop.f32.mrf.mxu1  ;;  %1958 = vmatmul.mubr.bf16.gmra.mxu1 %v4152_v52  ;;  %v741_v21 = vpop.f32.mrf.mxu0 }
 0x16f   : > { %1965 = vmatprep.mubr.bf16.mxu1 %v3907_v55  ;;  %v2319_v45 = vrot.slane %v965_v15, 7 }
 0x170   : > { %v1346_v9 = vpop.f32.mrf.mxu1  ;;  %v742_v4 = vpop.f32.mrf.mxu0 }
 0x171   : > { %v968_v30 = vadd.f32 %v4321_v37, %v742_v4 }
 0x172   : > { %v1347_v43 = vpop.f32.mrf.mxu1  ;;  %v744_v5 = vpop.f32.mrf.mxu0 }
 0x173   : > { %v2335_v16 = vrot.slane %v968_v30, 7 }
 0x174   : > { %v1348_v58 = vpop.f32.mrf.mxu1  ;;  %v747_v20 = vpop.f32.mrf.mxu0  ;;  %3451 = vmatmul.mubr.bf16.gmra.mxu0 %v3987_v24 }
 0x175   : > { %v973_v54 = vadd.f32 %v4313_v23, %v747_v20  ;;  %3454 = vmatprep.mubr.bf16.mxu0 %v3992_v26  ;;  %v4557_v53 = vsel %vm2361_vm0, %v2319_v45, %v2335_v16 }
 0x176   : > { %v4559_v55 = vpop.f32.mrf.mxu1  ;;  %1966 = vmatmul.mubr.bf16.gmra.mxu1 %v4172_v60  ;;  %v749_v37 = vpop.f32.mrf.mxu0 }
 0x177   : > { %v2351_v50 = vrot.slane %v973_v54, 7  ;;  %1973 = vmatprep.mubr.bf16.mxu1 %v4177_v61 }
 0x178   : > { %v1353_v35 = vpop.f32.mrf.mxu1  ;;  %v750_v21 = vpop.f32.mrf.mxu0 }
 0x179   : > { %v4565_v15 = vsel %vm2361_vm0, %v2351_v50, %v2319_v45  ;;  %v976_v4 = vadd.f32 %v4319_v28, %v750_v21 }
 0x17a   : > { %v4567_v23 = vpop.f32.mrf.mxu1  ;;  %v752_v9 = vpop.f32.mrf.mxu0 }
 0x17b   : > { %v2320_v58 = vrot.slane %v976_v4, 7 }
 0x17c   : > { %v1356_v30 = vpop.f32.mrf.mxu1  ;;  %v755_v43 = vpop.f32.mrf.mxu0  ;;  %3455 = vmatmul.mubr.bf16.gmra.mxu0 %v4024_v40 }
 0x17d   : > { %v981_v5 = vadd.f32 %v4329_v12, %v755_v43  ;;  %3458 = vmatprep.mubr.bf16.mxu0 %v4032_v42 }
 0x17e   : > { %v1359_v61 = vpop.f32.mrf.mxu1  ;;  %1974 = vmatmul.mubr.bf16.gmra.mxu1 %v4192_v14  ;;  %v757_v16 = vpop.f32.mrf.mxu0 }
 0x17f   : > { %v2336_v45 = vrot.slane %v981_v5, 7  ;;  %1981 = vmatprep.mubr.bf16.mxu1 %v4197_v19  ;;  %v5420_v61 = vld [vmem:[#allocation15_spill] sm:$0xff] }
 0x180   : > { %v1360_v20 = vpop.f32.mrf.mxu1  ;;  %v758_v54 = vpop.f32.mrf.mxu0 }
 0x181   : > { %v984_v28 = vadd.f32 %v4336_v29, %v758_v54  ;;  %v4578_v37 = vsel %vm2361_vm0, %v2320_v58, %v2336_v45 }
 0x182   : > { %v4580_v50 = vpop.f32.mrf.mxu1  ;;  %v760_v12 = vpop.f32.mrf.mxu0 }
 0x183   : > { %v2352_v35 = vrot.slane %v984_v28, 7 }
 0x184   : > { %v1363_v21 = vpop.f32.mrf.mxu1  ;;  %v763_v9 = vpop.f32.mrf.mxu0  ;;  %3459 = vmatmul.mubr.bf16.gmra.mxu0 %v4055_v48 }
 0x185   : > { %3478 = vmatprep.mubr.bf16.mxu0 %v4048_v47  ;;  %v4586_v19 = vsel %vm2361_vm0, %v2352_v35, %v2320_v58  ;;  %v989_v30 = vadd.f32 %v4325_v1, %v763_v9  ;;  %v5421_v9 = vld [vmem:[#allocation5_spill] sm:$0xff] }
 0x186   : > { %v4588_v4 = vpop.f32.mrf.mxu1  ;;  %1982 = vmatmul.mubr.bf16.gmra.mxu1 %v3755_v13  ;;  %v765_v29 = vpop.f32.mrf.mxu0 }
 0x187   : > { %1989 = vmatprep.mubr.bf16.mxu1 %v3789_v22  ;;  %v2321_v47 = vrot.slane %v989_v30, 7 }
 0x188   : > { %v1368_v43 = vpop.f32.mrf.mxu1  ;;  %v766_v5 = vpop.f32.mrf.mxu0 }
 0x189   : > { %v992_v16 = vadd.f32 %v5420_v61, %v766_v5  ;;  %v5422_v43 = vld [vmem:[#allocation20_spill] sm:$0xff] }
 0x18a   : > { %v1369_v45 = vpop.f32.mrf.mxu1  ;;  %v768_v20 = vpop.f32.mrf.mxu0 }
 0x18b   : > { %v2337_v54 = vrot.slane %v992_v16, 7  ;;  %v5423_v45 = vld [vmem:[#allocation17_spill] sm:$0xff] }
 0x18c   : > { %v1370_v28 = vpop.f32.mrf.mxu1  ;;  %v771_v58 = vpop.f32.mrf.mxu0  ;;  %3479 = vmatmul.mubr.bf16.vlgmr.msra.gmra.mxu0 %v4073_v57 }
 0x18d   : > { %v997_v12 = vadd.f32 %v4350_v41, %v771_v58  ;;  %3482 = vmatprep.mubr.bf16.mxu0 %v4094_v62  ;;  %v4599_v1 = vsel %vm2361_vm0, %v2321_v47, %v2337_v54 }
 0x18e   : > { %v4601_v22 = vpop.f32.mrf.mxu1  ;;  %1990 = vmatmul.mubr.bf16.gmra.mxu1 %v3802_v25  ;;  %v773_v35 = vpop.f32.mrf.mxu0 }
 0x18f   : > { %v2353_v21 = vrot.slane %v997_v12, 7  ;;  %1997 = vmatprep.mubr.bf16.mxu1 %v5421_v9  ;;  %v5424_v12 = vld [vmem:[#allocation6_spill] sm:$0xff]  ;;  %v5425_v9 = vld [vmem:[#allocation19_spill] sm:$0xff] }
 0x190   : > { %v1375_v29 = vpop.f32.mrf.mxu1  ;;  %v774_v30 = vpop.f32.mrf.mxu0 }
 0x191   : > { %v4607_v57 = vsel %vm2361_vm0, %v2353_v21, %v2321_v47  ;;  %v1000_v5 = vadd.f32 %v5422_v43, %v774_v30 }
 0x192   : > { %v4609_v41 = vpop.f32.mrf.mxu1  ;;  %v776_v62 = vpop.f32.mrf.mxu0 }
 0x193   : > { %v2322_v58 = vrot.slane %v1000_v5, 7 }
 0x194   : > { %v1378_v61 = vpop.f32.mrf.mxu1  ;;  %v779_v16 = vpop.f32.mrf.mxu0  ;;  %3483 = vmatmul.mubr.bf16.gmra.mxu0 %v4115_v17 }
 0x195   : > { %v1005_v20 = vadd.f32 %v5423_v45, %v779_v16  ;;  %3486 = vmatprep.mubr.bf16.mxu0 %v4134_v7 }
 0x196   : > { %v1381_v54 = vpop.f32.mrf.mxu1  ;;  %1998 = vmatmul.mubr.bf16.gmra.mxu1 %v3809_v27  ;;  %v781_v28 = vpop.f32.mrf.mxu0 }
 0x197   : > { %v2338_v47 = vrot.slane %v1005_v20, 7  ;;  %2005 = vmatprep.mubr.bf16.mxu1 %v5424_v12  ;;  %v5426_v54 = vld [vmem:[#allocation2_spill] sm:$0xff]  ;;  %v5427_v12 = vld [vmem:[#allocation25_spill] sm:$0xff] }
 0x198   : > { %v1382_v35 = vpop.f32.mrf.mxu1  ;;  %v782_v21 = vpop.f32.mrf.mxu0 }
 0x199   : > { %v1008_v29 = vadd.f32 %v5425_v9, %v782_v21  ;;  %v4620_v30 = vsel %vm2361_vm0, %v2322_v58, %v2338_v47 }
 0x19a   : > { %v4622_v17 = vpop.f32.mrf.mxu1  ;;  %v784_v62 = vpop.f32.mrf.mxu0 }
 0x19b   : > { %v2354_v7 = vrot.slane %v1008_v29, 7  ;;  %v5428_v62 = vld [vmem:[#allocation22_spill] sm:$0xff] }
 0x19c   : > { %v1385_v43 = vpop.f32.mrf.mxu1  ;;  %v787_v61 = vpop.f32.mrf.mxu0  ;;  %3487 = vmatmul.mubr.bf16.gmra.mxu0 %v4152_v52 }
 0x19d   : > { %3490 = vmatprep.mubr.bf16.mxu0 %v4172_v60  ;;  %v4628_v5 = vsel %vm2361_vm0, %v2354_v7, %v2322_v58  ;;  %v1013_v20 = vadd.f32 %v4372_v33, %v787_v61 }
 0x19e   : > { %v4630_v16 = vpop.f32.mrf.mxu1  ;;  %2006 = vmatmul.mubr.bf16.gmra.mxu1 %v3843_v36  ;;  %v789_v45 = vpop.f32.mrf.mxu0 }
 0x19f   : > { %2013 = vmatprep.mubr.bf16.mxu1 %v5426_v54  ;;  %v2323_v60 = vrot.slane %v1013_v20, 7  ;;  %v5430_v20 = vld [vmem:[#allocation7_spill] sm:$0xff] }
 0x1a0   : > { %v1390_v28 = vpop.f32.mrf.mxu1  ;;  %v790_v47 = vpop.f32.mrf.mxu0 }
 0x1a1   : > { %v1016_v35 = vadd.f32 %v5427_v12, %v790_v47  ;;  %v5431_v12 = vld [vmem:[#allocation24_spill] sm:$0xff] }
 0x1a2   : > { %v1391_v52 = vpop.f32.mrf.mxu1  ;;  %v792_v21 = vpop.f32.mrf.mxu0 }
 0x1a3   : > { %v2339_v9 = vrot.slane %v1016_v35, 7 }
 0x1a4   : > { %v1392_v29 = vpop.f32.mrf.mxu1  ;;  %v795_v58 = vpop.f32.mrf.mxu0  ;;  %3491 = vmatmul.mubr.bf16.gmra.mxu0 %v4192_v14 }
 0x1a5   : > { %v1021_v7 = vadd.f32 %v5428_v62, %v795_v58  ;;  %3494 = vmatprep.mubr.bf16.mxu0 %v3755_v13  ;;  %v4641_v33 = vsel %vm2361_vm0, %v2323_v60, %v2339_v9 }
 0x1a6   : > { %5429 = vst [vmem:[#allocation15_spill] sm:$0xff] %v4641_v33  ;;  %v4643_v43 = vpop.f32.mrf.mxu1  ;;  %2014 = vmatmul.mubr.bf16.gmra.mxu1 %v3851_v38  ;;  %v797_v61 = vpop.f32.mrf.mxu0 }
 0x1a7   : > { %v2355_v45 = vrot.slane %v1021_v7, 7  ;;  %2021 = vmatprep.mubr.bf16.mxu1 %v5430_v20  ;;  %v5432_v7 = vld [vmem:[#allocation8_spill] sm:$0xff]  ;;  %v5433_v20 = vld [vmem:[#allocation30_spill] sm:$0xff] }
 0x1a8   : > { %v1397_v54 = vpop.f32.mrf.mxu1  ;;  %v798_v28 = vpop.f32.mrf.mxu0 }
 0x1a9   : > { %v4649_v14 = vsel %vm2361_vm0, %v2355_v45, %v2323_v60  ;;  %v1024_v35 = vadd.f32 %v5431_v12, %v798_v28 }
 0x1aa   : > { %v4651_v47 = vpop.f32.mrf.mxu1  ;;  %v800_v13 = vpop.f32.mrf.mxu0 }
 0x1ab   : > { %v2324_v62 = vrot.slane %v1024_v35, 7 }
 0x1ac   : > { %v1400_v52 = vpop.f32.mrf.mxu1  ;;  %v803_v21 = vpop.f32.mrf.mxu0  ;;  %3495 = vmatmul.mubr.bf16.gmra.mxu0 %v3802_v25 }
 0x1ad   : > { %v1029_v9 = vadd.f32 %v4394_v0, %v803_v21  ;;  %3498 = vmatprep.mubr.bf16.mxu0 %v3809_v27 }
 0x1ae   : > { %v1403_v29 = vpop.f32.mrf.mxu1  ;;  %2022 = vmatmul.mubr.bf16.gmra.mxu1 %v3871_v44  ;;  %v805_v58 = vpop.f32.mrf.mxu0 }
 0x1af   : > { %v2340_v60 = vrot.slane %v1029_v9, 7  ;;  %2029 = vmatprep.mubr.bf16.mxu1 %v5432_v7  ;;  %v5435_v9 = vld [vmem:[#allocation27_spill] sm:$0xff] }
 0x1b0   : > { %v1404_v61 = vpop.f32.mrf.mxu1  ;;  %v806_v45 = vpop.f32.mrf.mxu0  ;;  %v5436_v58 = vld [vmem:[#allocation3_spill] sm:$0xff] }
 0x1b1   : > { %v1032_v54 = vadd.f32 %v5433_v20, %v806_v45  ;;  %v4662_v28 = vsel %vm2361_vm0, %v2324_v62, %v2340_v60  ;;  %v5437_v61 = vld [vmem:[#allocation29_spill] sm:$0xff] }
 0x1b2   : > { %5434 = vst [vmem:[#allocation5_spill] sm:$0xff] %v4662_v28  ;;  %v4664_v25 = vpop.f32.mrf.mxu1  ;;  %v808_v0 = vpop.f32.mrf.mxu0 }
 0x1b3   : > { %v2356_v27 = vrot.slane %v1032_v54, 7 }
 0x1b4   : > { %v1407_v13 = vpop.f32.mrf.mxu1  ;;  %v811_v12 = vpop.f32.mrf.mxu0  ;;  %3499 = vmatmul.mubr.bf16.gmra.mxu0 %v3843_v36 }
 0x1b5   : > { %3502 = vmatprep.mubr.bf16.mxu0 %v3851_v38  ;;  %v4670_v35 = vsel %vm2361_vm0, %v2356_v27, %v2324_v62  ;;  %v1037_v29 = vadd.f32 %v5435_v9, %v811_v12 }
 0x1b6   : > { %v4672_v52 = vpop.f32.mrf.mxu1  ;;  %2030 = vmatmul.mubr.bf16.gmra.mxu1 %v3877_v46  ;;  %v813_v21 = vpop.f32.mrf.mxu0 }
 0x1b7   : > { %2037 = vmatprep.mubr.bf16.mxu1 %v5436_v58  ;;  %v2325_v38 = vrot.slane %v1037_v29, 7  ;;  %v5439_v29 = vld [vmem:[#allocation9_spill] sm:$0xff] }
 0x1b8   : > { %v1412_v60 = vpop.f32.mrf.mxu1  ;;  %v814_v7 = vpop.f32.mrf.mxu0 }
 0x1b9   : > { %v1040_v45 = vadd.f32 %v5437_v61, %v814_v7  ;;  %v5442_v7 = vld [vmem:[#allocation35_spill] sm:$0xff] }
 0x1ba   : > { %v1413_v36 = vpop.f32.mrf.mxu1  ;;  %v816_v20 = vpop.f32.mrf.mxu0 }
 0x1bb   : > { %v2341_v54 = vrot.slane %v1040_v45, 7  ;;  %v5443_v20 = vld [vmem:[#allocation32_spill] sm:$0xff] }
 0x1bc   : > { %v1414_v0 = vpop.f32.mrf.mxu1  ;;  %v819_v62 = vpop.f32.mrf.mxu0  ;;  %3503 = vmatmul.mubr.bf16.gmra.mxu0 %v3871_v44 }
 0x1bd   : > { %v1045_v27 = vadd.f32 %v4416_v31, %v819_v62  ;;  %3506 = vmatprep.mubr.bf16.mxu0 %v3877_v46  ;;  %v4683_v13 = vsel %vm2361_vm0, %v2325_v38, %v2341_v54 }
 0x1be   : > { %5438 = vst [vmem:[#allocation20_spill] sm:$0xff] %v4683_v13  ;;  %v4685_v12 = vpop.f32.mrf.mxu1  ;;  %2038 = vmatmul.mubr.bf16.gmra.mxu1 %v3912_v56  ;;  %v821_v21 = vpop.f32.mrf.mxu0  ;;  %v5458_v13 = vld [vmem:[#allocation33_spill] sm:$0xff] }
 0x1bf   : > { %v2357_v9 = vrot.slane %v1045_v27, 7  ;;  %2045 = vmatprep.mubr.bf16.mxu1 %v5439_v29  ;;  %v5444_v21 = vld [vmem:[#allocation10_spill] sm:$0xff] }
 0x1c0   : > { %v1419_v58 = vpop.f32.mrf.mxu1  ;;  %v822_v60 = vpop.f32.mrf.mxu0 }
 0x1c1   : > { %v4691_v44 = vsel %vm2361_vm0, %v2357_v9, %v2325_v38  ;;  %v1048_v61 = vadd.f32 %v5442_v7, %v822_v60  ;;  %v5445_v58 = vld [vmem:[#allocation34_spill] sm:$0xff] }
 0x1c2   : > { %5440 = vst [vmem:[#allocation17_spill] sm:$0xff] %v4691_v44  ;;  %v4693_v31 = vpop.f32.mrf.mxu1  ;;  %v824_v46 = vpop.f32.mrf.mxu0 }
 0x1c3   : > { %5441 = vst [vmem:[#allocation6_spill] sm:$0xff] %v4693_v31  ;;  %v2326_v27 = vrot.slane %v1048_v61, 7 }
 0x1c4   : > { %v1422_v45 = vpop.f32.mrf.mxu1  ;;  %v827_v36 = vpop.f32.mrf.mxu0  ;;  %3507 = vmatmul.mubr.bf16.gmra.mxu0 %v3912_v56 }
 0x1c5   : > { %v1053_v54 = vadd.f32 %v5443_v20, %v827_v36  ;;  %3510 = vmatprep.mubr.bf16.mxu0 %v3921_v59 }
 0x1c6   : > { %v1425_v0 = vpop.f32.mrf.mxu1  ;;  %2046 = vmatmul.mubr.bf16.gmra.mxu1 %v3921_v59  ;;  %v829_v62 = vpop.f32.mrf.mxu0  ;;  %v5447_v59 = vld [vmem:[#allocation21_spill] sm:$0xff] }
 0x1c7   : > { %v2342_v38 = vrot.slane %v1053_v54, 7  ;;  %2053 = vmatprep.mubr.bf16.mxu1 %v5444_v21 }
 0x1c8   : > { %v1426_v9 = vpop.f32.mrf.mxu1  ;;  %v830_v29 = vpop.f32.mrf.mxu0 }
 0x1c9   : > { %v1056_v60 = vadd.f32 %v5445_v58, %v830_v29  ;;  %v4704_v46 = vsel %vm2361_vm0, %v2326_v27, %v2342_v38  ;;  %v5450_v38 = vld [vmem:[#allocation16_spill] sm:$0xff] }
 0x1ca   : > { %5446 = vst [vmem:[#allocation19_spill] sm:$0xff] %v4704_v46  ;;  %v4706_v56 = vpop.f32.mrf.mxu1  ;;  %v832_v7 = vpop.f32.mrf.mxu0  ;;  %v5451_v9 = vld [vmem:[#allocation4_spill] sm:$0xff] }
 0x1cb   : > { %v2358_v45 = vrot.slane %v1056_v60, 7 }
 0x1cc   : > { %v1429_v36 = vpop.f32.mrf.mxu1  ;;  %v3352_v20 = vpop.f32.mrf.mxu0  ;;  %3511 = vmatmul.mubr.bf16.gmra.mxu0 %v3950_v8 }
 0x1cd   : > { %v877_v61 = vadd.f32 %v3352_v20, %v5447_v59  ;;  %3514 = vmatprep.mubr.bf16.mxu0 %v3954_v10  ;;  %v4713_v54 = vsel %vm2361_vm0, %v2358_v45, %v2326_v27  ;;  %v5452_v59 = vld [vmem:[#allocation18_spill] sm:$0xff] }
 0x1ce   : > { %5448 = vst [vmem:[#allocation2_spill] sm:$0xff] %v4713_v54  ;;  %v4715_v0 = vpop.f32.mrf.mxu1  ;;  %2054 = vmatmul.mubr.bf16.gmra.mxu1 %v3950_v8  ;;  %v868_v62 = vpop.f32.mrf.mxu0  ;;  %v5453_v8 = vld [vmem:[#allocation23_spill] sm:$0xff] }
 0x1cf   : > { %5449 = vst [vmem:[#allocation25_spill] sm:$0xff] %v4715_v0  ;;  %v869_v21 = vadd.f32 %v868_v62, %v5450_v38  ;;  %2061 = vmatprep.mubr.bf16.mxu1 %v5451_v9  ;;  %v2343_v60 = vrot.slane %v877_v61, 7 }
 0x1d0   : > { %v1434_v29 = vpop.f32.mrf.mxu1  ;;  %v3353_v58 = vpop.f32.mrf.mxu0 }
 0x1d1   : > { %v2311_v7 = vrot.slane %v869_v21, 7  ;;  %v880_v62 = vadd.f32 %v3353_v58, %v5453_v8  ;;  %v5455_v21 = vld [vmem:[#allocation31_spill] sm:$0xff] }
 0x1d2   : > { %v1435_v36 = vpop.f32.mrf.mxu1  ;;  %v871_v20 = vpop.f32.mrf.mxu0 }
 0x1d3   : > { %v872_v46 = vadd.f32 %v871_v20, %v5452_v59  ;;  %v4723_v27 = vsel %vm2361_vm0, %v2343_v60, %v2311_v7  ;;  %v5456_v36 = vld [vmem:[#allocation26_spill] sm:$0xff]  ;;  %v5457_v60 = vld [vmem:[#allocation12_spill] sm:$0xff] }
 0x1d4   : > { %v1436_v45 = vpop.f32.mrf.mxu1  ;;  %v3356_v54 = vpop.f32.mrf.mxu0  ;;  %3515 = vmatmul.mubr.bf16.gmra.mxu0 %v3987_v24 }
 0x1d5   : > { %v2327_v38 = vrot.slane %v872_v46, 7  ;;  %3518 = vmatprep.mubr.bf16.mxu0 %v3992_v26  ;;  %v893_v29 = vadd.f32 %v3356_v54, %v5455_v21  ;;  %v2312_v46 = vrot.slane %v880_v62, 7  ;;  %v5460_v54 = vld [vmem:[#allocation28_spill] sm:$0xff] }
 0x1d6   : > { %v4728_v9 = vpop.f32.mrf.mxu1  ;;  %2062 = vmatmul.mubr.bf16.gmra.mxu1 %v3954_v10  ;;  %v884_v61 = vpop.f32.mrf.mxu0 }
 0x1d7   : > { %5454 = vst [vmem:[#allocation22_spill] sm:$0xff] %v4728_v9  ;;  %v885_v20 = vadd.f32 %v884_v61, %v5456_v36  ;;  %2069 = vmatprep.mubr.bf16.mxu1 %v5457_v60  ;;  %v4736_v59 = vsel %vm2361_vm0, %v2311_v7, %v2327_v38  ;;  %v2313_v44 = vrot.slane %v893_v29, 7  ;;  %v5461_v29 = vld [vmem:[#allocation36_spill] sm:$0xff]  ;;  %v5462_v60 = vld [vmem:[#allocation14_spill] sm:$0xff] }
 0x1d8   : > { %v1441_v45 = vpop.f32.mrf.mxu1  ;;  %v3357_v58 = vpop.f32.mrf.mxu0 }
 0x1d9   : > { %v2328_v8 = vrot.slane %v885_v20, 7  ;;  %v896_v28 = vadd.f32 %v3357_v58, %v5458_v13 }
 0x1da   : > { %v4739_v0 = vpop.f32.mrf.mxu1  ;;  %v887_v10 = vpop.f32.mrf.mxu0 }
 0x1db   : > { %5459 = vst [vmem:[#allocation7_spill] sm:$0xff] %v4739_v0  ;;  %v2329_v9 = vrot.slane %v896_v28, 7  ;;  %v888_v21 = vadd.f32 %v887_v10, %v5460_v54  ;;  %v4744_v61 = vsel %vm2361_vm0, %v2312_v46, %v2328_v8 }
 0x1dc   : > { %v1444_v36 = vpop.f32.mrf.mxu1  ;;  %v3360_v7 = vpop.f32.mrf.mxu0  ;;  %3519 = vmatmul.mubr.bf16.gmra.mxu0 %v4024_v40 }
 0x1dd   : > { %v2344_v38 = vrot.slane %v888_v21, 7  ;;  %3522 = vmatprep.mubr.bf16.mxu0 %v4032_v42  ;;  %v4750_v13 = vsel %vm2361_vm0, %v2313_v44, %v2329_v9  ;;  %v909_v8 = vadd.f32 %v3360_v7, %v4445_v34  ;;  %v5464_v21 = vld [vmem:[#allocation38_spill] sm:$0xff]  ;;  %v5466_v7 = vld [vmem:[#allocation48_spill] sm:$0xff] }
 0x1de   : > { %v1447_v62 = vpop.f32.mrf.mxu1  ;;  %2070 = vmatmul.mubr.bf16.gmra.mxu1 %v3987_v24  ;;  %v900_v28 = vpop.f32.mrf.mxu0 }
 0x1df   : > { %v901_v20 = vadd.f32 %v900_v28, %v5461_v29  ;;  %2077 = vmatprep.mubr.bf16.mxu1 %v5462_v60  ;;  %v2379_v45 = vsel %vm2361_vm0, %v2344_v38, %v2312_v46  ;;  %v2330_v46 = vrot.slane %v909_v8, 7  ;;  %v5465_v60 = vld [vmem:[#allocation44_spill] sm:$0xff] }
 0x1e0   : > { %v1448_v58 = vpop.f32.mrf.mxu1  ;;  %v3361_v40 = vpop.f32.mrf.mxu0 }
 0x1e1   : > { %v2345_v42 = vrot.slane %v901_v20, 7  ;;  %v912_v10 = vadd.f32 %v3361_v40, %v4454_v11  ;;  %v5467_v20 = vld [vmem:[#allocation11_spill] sm:$0xff] }
 0x1e2   : > { %v4759_v9 = vpop.f32.mrf.mxu1  ;;  %v903_v54 = vpop.f32.mrf.mxu0  ;;  %v933_v11 = vadd.f32 %v5467_v20, %v5466_v7  ;;  %v5472_v7 = vld [vmem:[#allocation46_spill] sm:$0xff] }
 0x1e3   : > { %5463 = vst [vmem:[#allocation24_spill] sm:$0xff] %v4759_v9  ;;  %v904_v24 = vadd.f32 %v903_v54, %v5464_v21  ;;  %v2380_v36 = vsel %vm2361_vm0, %v2345_v42, %v2313_v44  ;;  %v2346_v38 = vrot.slane %v912_v10, 7  ;;  %v5469_v54 = vld [vmem:[#allocation49_spill] sm:$0xff] }
 0x1e4   : > { %v1451_v62 = vpop.f32.mrf.mxu1  ;;  %v3364_v28 = vpop.f32.mrf.mxu0  ;;  %3523 = vmatmul.mubr.bf16.gmra.mxu0 %v4055_v48  ;;  %v5470_v21 = vld [vmem:[#allocation13_spill] sm:$0xff]  ;;  %v2332_v9 = vrot.slane %v933_v11, 7 }
 0x1e5   : > { %v2314_v29 = vrot.slane %v904_v24, 7  ;;  %v925_v34 = vadd.f32 %v3364_v28, %v5465_v60  ;;  %v936_v44 = vadd.f32 %v5470_v21, %v5469_v54  ;;  %v5471_v42 = vld [vmem:[#allocation41_spill] sm:$0xff]  ;;  %v5473_v54 = vld [vmem:[#allocation43_spill] sm:$0xff] }
 0x1e6   : > { %v4768_v58 = vpop.f32.mrf.mxu1  ;;  %2078 = vmatmul.mubr.bf16.gmra.mxu1 %v3992_v26  ;;  %v916_v40 = vpop.f32.mrf.mxu0 }
 0x1e7   : > { %5468 = vst [vmem:[#allocation8_spill] sm:$0xff] %v4768_v58  ;;  %v917_v62 = vadd.f32 %v916_v40, %v5471_v42  ;;  %v2365_v48 = vsel %vm2361_vm0, %v2314_v29, %v2330_v46  ;;  %v2381_v8 = vsel %vm2361_vm0, %v2346_v38, %v2314_v29  ;;  %v2347_v28 = vrot.slane %v925_v34, 7 }
 0x1e8   : > { %v1456_v10 = vpop.f32.mrf.mxu1  ;;  %v3365_v24 = vpop.f32.mrf.mxu0  ;;  %v2348_v0 = vrot.slane %v936_v44, 7  ;;  %v5474_v44 = vld [vmem:[#allocation37_spill] sm:$0xff] }
 0x1e9   : > { %v2315_v60 = vrot.slane %v917_v62, 7  ;;  %v928_v20 = vadd.f32 %v3365_v24, %v5472_v7  ;;  %v5475_v7 = vld [vmem:[#allocation40_spill] sm:$0xff] }
 0x1ea   : > { %v1457_v26 = vpop.f32.mrf.mxu1  ;;  %v919_v58 = vpop.f32.mrf.mxu0 }
 0x1eb   : > { %v2316_v33 = vrot.slane %v928_v20, 7  ;;  %v920_v21 = vadd.f32 %v919_v58, %v5473_v54  ;;  %v2382_v40 = vsel %vm2361_vm0, %v2347_v28, %v2315_v60 }
 0x1ec   : > { %v1458_v46 = vpop.f32.mrf.mxu1  ;;  %v3416_v42 = vpop.f32.mrf.mxu0 }
 0x1ed   : > { %v2331_v31 = vrot.slane %v920_v21, 7  ;;  %v2383_v38 = vsel %vm2361_vm0, %v2348_v0, %v2316_v33  ;;  %v4786_v29 = vsel %vm2361_vm0, %v2316_v33, %v2332_v9  ;;  %v5476_v9 = vld [vmem:[#allocation39_spill] sm:$0xff] }
 0x1ee   : > { %v4788_v34 = vpop.f32.mrf.mxu1  ;;  %v1494_v11 = vpop.f32.mrf.mxu0 }
 0x1ef   : > { %v1495_v62 = vadd.f32 %v1494_v11, %v5474_v44  ;;  %v2366_v58 = vsel %vm2361_vm0, %v2315_v60, %v2331_v31  ;;  %v5477_v31 = vld [vmem:[#allocation45_spill] sm:$0xff] }
 0x1f0   : > { %v1897_v10 = vpop.f32.mrf.mxu1  ;;  %v3417_v24 = vpop.f32.mrf.mxu0 }
 0x1f1   : > { %v4794_v28 = vadd.f32 %v4723_v27, %v1495_v62  ;;  %v1505_v20 = vadd.f32 %v3417_v24, %v5475_v7  ;;  %v5479_v62 = vld [vmem:[#allocation42_spill] sm:$0xff] }
 0x1f2   : > { %v4797_v0 = vpop.f32.mrf.mxu1  ;;  %v1497_v26 = vpop.f32.mrf.mxu0 }
 0x1f3   : > { %v4799_v33 = vadd.f32 %v2379_v45, %v1505_v20  ;;  %v1498_v54 = vadd.f32 %v1497_v26, %v5476_v9  ;;  %v5481_v20 = vld [vmem:[#allocation47_spill] sm:$0xff] }
 0x1f4   : > { %v1900_v21 = vpop.f32.mrf.mxu1  ;;  %v3420_v46 = vpop.f32.mrf.mxu0 }
 0x1f5   : > { %v4803_v42 = vadd.f32 %v4736_v59, %v1498_v54  ;;  %v1517_v60 = vadd.f32 %v3420_v46, %v5477_v31  ;;  %v5482_v31 = vld [vmem:[#allocation51_spill] sm:$0xff] }
 0x1f6   : > { %v4806_v11 = vpop.f32.mrf.mxu1  ;;  %v1509_v27 = vpop.f32.mrf.mxu0 }
 0x1f7   : > { %v4808_v44 = vadd.f32 %v2380_v36, %v1517_v60  ;;  %v1510_v10 = vadd.f32 %v1509_v27, %v5479_v62 }
 0x1f8   : > { %v1905_v24 = vpop.f32.mrf.mxu1  ;;  %v3421_v7 = vpop.f32.mrf.mxu0 }
 0x1f9   : > { %5478 = vst [vmem:[#allocation30_spill] sm:$0xff] %v4808_v44  ;;  %v4812_v45 = vadd.f32 %v4744_v61, %v1510_v10  ;;  %v1520_v26 = vadd.f32 %v3421_v7, %v5481_v20  ;;  %v5484_v20 = vld [vmem:[#allocation50_spill] sm:$0xff] }
 0x1fa   : > { %v4815_v9 = vpop.f32.mrf.mxu1  ;;  %v1512_v59 = vpop.f32.mrf.mxu0 }
 0x1fb   : > { %5480 = vst [vmem:[#allocation27_spill] sm:$0xff] %v4812_v45  ;;  %v4818_v54 = vadd.f32 %v4750_v13, %v1520_v26 }
 0x1fc   : > { %v1908_v21 = vpop.f32.mrf.mxu1  ;;  %v3424_v46 = vpop.f32.mrf.mxu0 }
 0x1fd   : > { %v1532_v36 = vadd.f32 %v3424_v46, %v5482_v31 }
 0x1fe   : > { %v4821_v60 = vpop.f32.mrf.mxu1  ;;  %v1524_v27 = vpop.f32.mrf.mxu0 }
 0x1ff   : > { %v4823_v62 = vadd.f32 %v2365_v48, %v1532_v36 }
 0x200   : > { %v1913_v24 = vpop.f32.mrf.mxu1  ;;  %v3425_v61 = vpop.f32.mrf.mxu0 }
 0x201   : > { %5483 = vst [vmem:[#allocation3_spill] sm:$0xff] %v4823_v62 }
 0x202   : > { %v4825_v10 = vpop.f32.mrf.mxu1  ;;  %v1526_v7 = vpop.f32.mrf.mxu0 }
 0x203   : > { %v1527_v44 = vadd.f32 %v1526_v7, %v5484_v20 }
 0x204   : > { %v1916_v59 = vpop.f32.mrf.mxu1  ;;  %v3428_v45 = vpop.f32.mrf.mxu0 }
 0x205   : > { %v4828_v13 = vadd.f32 %v2381_v8, %v1527_v44 }
 0x206   : > { %v4830_v26 = vpop.f32.mrf.mxu1  ;;  %v1538_v21 = vpop.f32.mrf.mxu0 }
 0x207   : > { %v1539_v46 = vadd.f32 %v1538_v21, %v4517_v63 }
 0x208   : > { %v1921_v31 = vpop.f32.mrf.mxu1  ;;  %v3429_v27 = vpop.f32.mrf.mxu0 }
 0x209   : > { %v4833_v48 = vadd.f32 %v2382_v40, %v1539_v46  ;;  %v1549_v36 = vadd.f32 %v3429_v27, %v4538_v39 }
 0x20a   : > { %v4836_v24 = vpop.f32.mrf.mxu1  ;;  %v1541_v61 = vpop.f32.mrf.mxu0 }
 0x20b   : > { %v4838_v62 = vadd.f32 %v2383_v38, %v1549_v36  ;;  %v1542_v45 = vadd.f32 %v1541_v61, %v4525_v18 }
 0x20c   : > { %v1924_v8 = vpop.f32.mrf.mxu1  ;;  %v3432_v44 = vpop.f32.mrf.mxu0 }
 0x20d   : > { %v4841_v7 = vadd.f32 %v2366_v58, %v1542_v45  ;;  %v1561_v20 = vadd.f32 %v3432_v44, %v4559_v55 }
 0x20e   : > { %v4844_v63 = vpop.f32.mrf.mxu1  ;;  %v1553_v59 = vpop.f32.mrf.mxu0 }
 0x20f   : > { %v4847_v40 = vadd.f32 %v4523_v49, %v1561_v20  ;;  %v1554_v39 = vadd.f32 %v1553_v59, %v4546_v51 }
 0x210   : > { %v1929_v21 = vpop.f32.mrf.mxu1  ;;  %v3433_v46 = vpop.f32.mrf.mxu0 }
 0x211   : > { %v4851_v38 = vadd.f32 %v4786_v29, %v1554_v39  ;;  %v1564_v18 = vadd.f32 %v3433_v46, %v4567_v23 }
 0x212   : > { %v4854_v31 = vpop.f32.mrf.mxu1  ;;  %v1556_v58 = vpop.f32.mrf.mxu0 }
 0x213   : > { %v4857_v55 = vadd.f32 %v4515_v3, %v1564_v18 }
 0x214   : > { %v1932_v27 = vpop.f32.mrf.mxu1  ;;  %v3436_v36 = vpop.f32.mrf.mxu0 }
 0x215   : > { %v1576_v49 = vadd.f32 %v3436_v36, %v4588_v4 }
 0x216   : > { %v4860_v61 = vpop.f32.mrf.mxu1  ;;  %v1568_v51 = vpop.f32.mrf.mxu0 }
 0x217   : > { %v4863_v45 = vadd.f32 %v4536_v6, %v1576_v49 }
 0x218   : > { %v1937_v29 = vpop.f32.mrf.mxu1  ;;  %v3437_v8 = vpop.f32.mrf.mxu0 }
 0x21a   : > { %v4865_v44 = vpop.f32.mrf.mxu1  ;;  %v1570_v23 = vpop.f32.mrf.mxu0 }
 0x21b   : > { %v1571_v20 = vadd.f32 %v1570_v23, %v4580_v50 }
 0x21c   : > { %v1940_v59 = vpop.f32.mrf.mxu1  ;;  %v3440_v3 = vpop.f32.mrf.mxu0 }
 0x21d   : > { %v4869_v39 = vadd.f32 %v4544_v32, %v1571_v20 }
 0x21e   : > { %v4871_v21 = vpop.f32.mrf.mxu1  ;;  %v1582_v4 = vpop.f32.mrf.mxu0 }
 0x21f   : > { %v1583_v46 = vadd.f32 %v1582_v4, %v4601_v22 }
 0x220   : > { %v1945_v18 = vpop.f32.mrf.mxu1  ;;  %v3441_v6 = vpop.f32.mrf.mxu0 }
 0x221   : > { %v4875_v58 = vadd.f32 %v4565_v15, %v1583_v46  ;;  %v1593_v27 = vadd.f32 %v3441_v6, %v4622_v17 }
 0x222   : > { %v4878_v36 = vpop.f32.mrf.mxu1  ;;  %v1585_v50 = vpop.f32.mrf.mxu0 }
 0x223   : > { %v4881_v49 = vadd.f32 %v4586_v19, %v1593_v27  ;;  %v1586_v32 = vadd.f32 %v1585_v50, %v4609_v41 }
 0x224   : > { %v1948_v51 = vpop.f32.mrf.mxu1  ;;  %v3444_v29 = vpop.f32.mrf.mxu0 }
 0x225   : > { %v4885_v8 = vadd.f32 %v4557_v53, %v1586_v32  ;;  %v1605_v22 = vadd.f32 %v3444_v29, %v4643_v43 }
 0x226   : > { %v4888_v23 = vpop.f32.mrf.mxu1  ;;  %v1597_v15 = vpop.f32.mrf.mxu0 }
 0x227   : > { %v4891_v17 = vadd.f32 %v4607_v57, %v1605_v22  ;;  %v1598_v20 = vadd.f32 %v1597_v15, %v4630_v16 }
 0x228   : > { %v1953_v59 = vpop.f32.mrf.mxu1  ;;  %v3445_v19 = vpop.f32.mrf.mxu0 }
 0x229   : > { %v4895_v3 = vadd.f32 %v4578_v37, %v1598_v20  ;;  %v1608_v41 = vadd.f32 %v3445_v19, %v4651_v47 }
 0x22a   : > { %v4898_v4 = vpop.f32.mrf.mxu1  ;;  %v1600_v53 = vpop.f32.mrf.mxu0 }
 0x22b   : > { %v4901_v43 = vadd.f32 %v4599_v1, %v1608_v41 }
 0x22c   : > { %v1956_v46 = vpop.f32.mrf.mxu1  ;;  %v3448_v18 = vpop.f32.mrf.mxu0 }
 0x22d   : > { %v1620_v57 = vadd.f32 %v3448_v18, %v4672_v52 }
 0x22e   : > { %v4904_v6 = vpop.f32.mrf.mxu1  ;;  %v1612_v16 = vpop.f32.mrf.mxu0 }
 0x22f   : > { %v4907_v27 = vadd.f32 %v4620_v30, %v1620_v57 }
 0x230   : > { %v1961_v37 = vpop.f32.mrf.mxu1  ;;  %v3449_v50 = vpop.f32.mrf.mxu0 }
 0x231   : > { %v5487_v37 = vld [vmem:[#allocation15_spill] sm:$0xff] }
 0x232   : > { %v4909_v32 = vpop.f32.mrf.mxu1  ;;  %v1614_v47 = vpop.f32.mrf.mxu0 }
 0x233   : > { %v1615_v51 = vadd.f32 %v1614_v47, %v4664_v25 }
 0x234   : > { %v1964_v29 = vpop.f32.mrf.mxu1  ;;  %v3452_v1 = vpop.f32.mrf.mxu0 }
 0x235   : > { %v4913_v22 = vadd.f32 %v4628_v5, %v1615_v51  ;;  %v5486_v5 = vld [vmem:[#allocation6_spill] sm:$0xff]  ;;  %v5489_v29 = vld [vmem:[#allocation17_spill] sm:$0xff] }
 0x236   : > { %v4915_v15 = vpop.f32.mrf.mxu1  ;;  %v1626_v52 = vpop.f32.mrf.mxu0  ;;  %v5491_v1 = vld [vmem:[#allocation25_spill] sm:$0xff] }
 0x237   : > { %v1627_v20 = vadd.f32 %v1626_v52, %v4685_v12  ;;  %v5488_v12 = vld [vmem:[#allocation22_spill] sm:$0xff] }
 0x238   : > { %v1969_v59 = vpop.f32.mrf.mxu1  ;;  %v3453_v30 = vpop.f32.mrf.mxu0 }
 0x239   : > { %v4919_v19 = vadd.f32 %v4649_v14, %v1627_v20  ;;  %v1637_v41 = vadd.f32 %v3453_v30, %v4706_v56  ;;  %v5492_v59 = vld [vmem:[#allocation5_spill] sm:$0xff] }
 0x23a   : > { %v4922_v53 = vpop.f32.mrf.mxu1  ;;  %v1629_v25 = vpop.f32.mrf.mxu0 }
 0x23b   : > { %v4925_v46 = vadd.f32 %v4670_v35, %v1637_v41  ;;  %v1630_v18 = vadd.f32 %v1629_v25, %v5486_v5  ;;  %v5494_v41 = vld [vmem:[#allocation7_spill] sm:$0xff] }
 0x23c   : > { %v1972_v57 = vpop.f32.mrf.mxu1  ;;  %v3456_v16 = vpop.f32.mrf.mxu0 }
 0x23d   : > { %5485 = vst [vmem:[#allocation29_spill] sm:$0xff] %v4925_v46  ;;  %v4929_v50 = vadd.f32 %v5487_v37, %v1630_v18  ;;  %v1649_v47 = vadd.f32 %v3456_v16, %v5488_v12  ;;  %v5495_v57 = vld [vmem:[#allocation20_spill] sm:$0xff] }
 0x23e   : > { %v4932_v51 = vpop.f32.mrf.mxu1  ;;  %v1641_v14 = vpop.f32.mrf.mxu0  ;;  %v5497_v46 = vld [vmem:[#allocation8_spill] sm:$0xff] }
 0x23f   : > { %v4935_v56 = vadd.f32 %v5489_v29, %v1649_v47  ;;  %v1642_v52 = vadd.f32 %v1641_v14, %v5491_v1  ;;  %v5498_v1 = vld [vmem:[#allocation19_spill] sm:$0xff] }
 0x240   : > { %v1977_v20 = vpop.f32.mrf.mxu1  ;;  %v3457_v35 = vpop.f32.mrf.mxu0 }
 0x241   : > { %5490 = vst [vmem:[#allocation9_spill] sm:$0xff] %v4935_v56  ;;  %v4939_v30 = vadd.f32 %v5492_v59, %v1642_v52  ;;  %v1652_v25 = vadd.f32 %v3457_v35, %v5494_v41  ;;  %v5500_v41 = vld [vmem:[#allocation24_spill] sm:$0xff] }
 0x242   : > { %v4942_v5 = vpop.f32.mrf.mxu1  ;;  %v1644_v18 = vpop.f32.mrf.mxu0 }
 0x243   : > { %5493 = vst [vmem:[#allocation35_spill] sm:$0xff] %v4939_v30  ;;  %v4945_v16 = vadd.f32 %v5495_v57, %v1652_v25  ;;  %v5501_v57 = vld [vmem:[#allocation2_spill] sm:$0xff] }
 0x244   : > { %v1980_v37 = vpop.f32.mrf.mxu1  ;;  %v3460_v12 = vpop.f32.mrf.mxu0 }
 0x245   : > { %5496 = vst [vmem:[#allocation32_spill] sm:$0xff] %v4945_v16  ;;  %v1664_v47 = vadd.f32 %v3460_v12, %v5497_v46 }
 0x246   : > { %v4948_v29 = vpop.f32.mrf.mxu1  ;;  %v1656_v14 = vpop.f32.mrf.mxu0 }
 0x247   : > { %v4951_v20 = vadd.f32 %v5498_v1, %v1664_v47 }
 0x248   : > { %v1985_v52 = vpop.f32.mrf.mxu1  ;;  %v3461_v59 = vpop.f32.mrf.mxu0 }
 0x249   : > { %5499 = vst [vmem:[#allocation10_spill] sm:$0xff] %v4951_v20 }
 0x24a   : > { %v4953_v56 = vpop.f32.mrf.mxu1  ;;  %v1658_v35 = vpop.f32.mrf.mxu0 }
 0x24b   : > { %v1659_v18 = vadd.f32 %v1658_v35, %v5500_v41 }
 0x24c   : > { %v1988_v30 = vpop.f32.mrf.mxu1  ;;  %v3480_v25 = vpop.f32.mrf.mxu0 }
 0x24d   : > { %v4957_v37 = vadd.f32 %v5501_v57, %v1659_v18  ;;  %v2129_v47 = vadd.f32 %v3480_v25, %v4806_v11 }
 0x24e   : > { %v4959_v16 = vpop.f32.mrf.mxu1  ;;  %v2120_v46 = vpop.f32.mrf.mxu0 }
 0x24f   : > { %5502 = vst [vmem:[#allocation34_spill] sm:$0xff] %v4957_v37  ;;  %v2121_v1 = vadd.f32 %v2120_v46, %v4788_v34  ;;  %v2458_v41 = vrot.slane %v2129_v47, 1 }
 0x250   : > { %v1993_v12 = vpop.f32.mrf.mxu1  ;;  %v3481_v14 = vpop.f32.mrf.mxu0 }
 0x251   : > { %v2426_v18 = vrot.slane %v2121_v1, 1  ;;  %v2132_v57 = vadd.f32 %v3481_v14, %v4815_v9 }
 0x252   : > { %v4963_v52 = vpop.f32.mrf.mxu1  ;;  %v2123_v59 = vpop.f32.mrf.mxu0 }
 0x253   : > { %v2124_v20 = vadd.f32 %v2123_v59, %v4797_v0 }
 0x254   : > { %v1996_v30 = vpop.f32.mrf.mxu1  ;;  %v3484_v35 = vpop.f32.mrf.mxu0 }
 0x255   : > { %v2442_v12 = vrot.slane %v2124_v20, 1  ;;  %v2427_v20 = vrot.slane %v2132_v57, 1  ;;  %v2145_v30 = vadd.f32 %v3484_v35, %v4830_v26 }
 0x256   : > { %v4968_v37 = vpop.f32.mrf.mxu1  ;;  %v2136_v11 = vpop.f32.mrf.mxu0 }
 0x257   : > { %v2475_v34 = vsel %vm2474_vm1, %v2442_v12, %v2458_v41  ;;  %v2491_v25 = vsel %vm2474_vm1, %v2426_v18, %v2442_v12  ;;  %v2137_v0 = vadd.f32 %v2136_v11, %v4821_v60  ;;  %v2428_v26 = vrot.slane %v2145_v30, 1 }
 0x258   : > { %v4976_v46 = vadd.f32 %v2491_v25, %v4794_v28  ;;  %v4979_v47 = vadd.f32 %v2475_v34, %v4803_v42  ;;  %v2001_v1 = vpop.f32.mrf.mxu1  ;;  %v3485_v9 = vpop.f32.mrf.mxu0 }
 0x259   : > { %v2443_v14 = vrot.slane %v2137_v0, 1  ;;  %v2148_v59 = vadd.f32 %v3485_v9, %v4836_v24 }
 0x25a   : > { %v3146_v28 = vpack.c.bf16 %v4979_v47, %v4976_v46  ;;  %v4991_v60 = vpop.f32.mrf.mxu1  ;;  %v2139_v42 = vpop.f32.mrf.mxu0  ;;  %v2539_v25 = vadd.f32 %v4979_v47, %v4976_v46 }
 0x25b   : > { %v2492_v41 = vsel %vm2474_vm1, %v2427_v20, %v2443_v14  ;;  %v2140_v18 = vadd.f32 %v2139_v42, %v4825_v10  ;;  %v2444_v24 = vrot.slane %v2148_v59, 1  ;;  %v5503_v20 = vld [vmem:[#allocation27_spill] sm:$0xff] }
 0x25c   : > { %3147 = vst [vmem:[%s4986_s30] sm:$0xff] %v3146_v28   ;;  %v4999_v57 = vadd.f32 %v2492_v41, %v4799_v33  ;;  %v2004_v12 = vpop.f32.mrf.mxu1  ;;  %v3488_v11 = vpop.f32.mrf.mxu0 }
 0x25d   : > { %v2459_v34 = vrot.slane %v2140_v18, 1  ;;  %v2161_v10 = vadd.f32 %v3488_v11, %v4860_v61  ;;  %v2493_v41 = vsel %vm2474_vm1, %v2428_v26, %v2444_v24  ;;  %v5504_v26 = vld [vmem:[#allocation30_spill] sm:$0xff] }
 0x25e   : > { %v5003_v0 = vpop.f32.mrf.mxu1  ;;  %v2152_v1 = vpop.f32.mrf.mxu0  ;;  %v2540_v33 = vadd.f32 %v2539_v25, %v4999_v57 }
 0x25f   : > { %v2476_v35 = vsel %vm2474_vm1, %v2443_v14, %v2459_v34  ;;  %v2153_v9 = vadd.f32 %v2152_v1, %v4844_v63  ;;  %v2445_v11 = vrot.slane %v2161_v10, 1 }
 0x260   : > { %v5011_v59 = vadd.f32 %v2476_v35, %v5503_v20  ;;  %v2009_v28 = vpop.f32.mrf.mxu1  ;;  %v3489_v42 = vpop.f32.mrf.mxu0  ;;  %v5025_v35 = vadd.f32 %v2493_v41, %v5504_v26 }
 0x261   : > { %v2460_v18 = vrot.slane %v2153_v9, 1  ;;  %v2164_v30 = vadd.f32 %v3489_v42, %v4865_v44 }
 0x262   : > { %v2541_v14 = vadd.f32 %v2540_v33, %v5011_v59  ;;  %v3151_v61 = vpack.c.bf16 %v5011_v59, %v4999_v57  ;;  %v5019_v63 = vpop.f32.mrf.mxu1  ;;  %v2155_v12 = vpop.f32.mrf.mxu0 }
 0x263   : > { %v2477_v34 = vsel %vm2474_vm1, %v2444_v24, %v2460_v18  ;;  %v2461_v25 = vrot.slane %v2164_v30, 1  ;;  %v2156_v1 = vadd.f32 %v2155_v12, %v4854_v31 }
 0x264   : > { %3223 = vst [vmem:[%s4986_s30 + $0x8] sm:$0xff] %v3151_v61   ;;  %v5029_v44 = vadd.f32 %v2477_v34, %v4818_v54  ;;  %v2012_v9 = vpop.f32.mrf.mxu1  ;;  %v3492_v33 = vpop.f32.mrf.mxu0  ;;  %v2542_v28 = vadd.f32 %v2541_v14, %v5025_v35  ;;  %v5505_v54 = vld [vmem:[#allocation3_spill] sm:$0xff] }
 0x265   : > { %v2478_v20 = vsel %vm2474_vm1, %v2445_v11, %v2461_v25  ;;  %v2429_v10 = vrot.slane %v2156_v1, 1  ;;  %v2177_v14 = vadd.f32 %v3492_v33, %v4888_v23 }
 0x266   : > { %v3156_v24 = vpack.c.bf16 %v5029_v44, %v5025_v35  ;;  %v5036_v42 = vpop.f32.mrf.mxu1  ;;  %v2168_v31 = vpop.f32.mrf.mxu0  ;;  %v5042_v18 = vadd.f32 %v2478_v20, %v5505_v54  ;;  %v2543_v25 = vadd.f32 %v2542_v28, %v5029_v44 }
 0x267   : > { %v2494_v41 = vsel %vm2474_vm1, %v2429_v10, %v2445_v11  ;;  %v2169_v34 = vadd.f32 %v2168_v31, %v4871_v21 }
 0x268   : > { %3224 = vst [vmem:[%s4986_s30 + $0x10] sm:$0xff] %v3156_v24   ;;  %v5045_v30 = vadd.f32 %v2494_v41, %v4828_v13  ;;  %v2017_v61 = vpop.f32.mrf.mxu1  ;;  %v3493_v12 = vpop.f32.mrf.mxu0  ;;  %v2462_v24 = vrot.slane %v2177_v14, 1 }
 0x269   : > { %v2430_v41 = vrot.slane %v2169_v34, 1  ;;  %v2180_v23 = vadd.f32 %v3493_v12, %v4898_v4 }
 0x26a   : > { %v3161_v1 = vpack.c.bf16 %v5042_v18, %v5045_v30  ;;  %v5052_v26 = vpop.f32.mrf.mxu1  ;;  %v2171_v11 = vpop.f32.mrf.mxu0  ;;  %v2544_v20 = vadd.f32 %v2543_v25, %v5045_v30 }
 0x26b   : > { %v2172_v9 = vadd.f32 %v2171_v11, %v4878_v36 }
 0x26c   : > { %3225 = vst [vmem:[%s4986_s30 + $0x18] sm:$0xff] %v3161_v1   ;;  %v2020_v13 = vpop.f32.mrf.mxu1  ;;  %v3496_v10 = vpop.f32.mrf.mxu0  ;;  %v2545_v4 = vadd.f32 %v2544_v20, %v5042_v18  ;;  %v2431_v1 = vrot.slane %v2180_v23, 1 }
 0x26d   : > { %v2446_v21 = vrot.slane %v2172_v9, 1  ;;  %v2193_v36 = vadd.f32 %v3496_v10, %v4915_v15 }
 0x26e   : > { %v5058_v33 = vpop.f32.mrf.mxu1  ;;  %v2184_v28 = vpop.f32.mrf.mxu0 }
 0x26f   : > { %v2479_v31 = vsel %vm2474_vm1, %v2446_v21, %v2462_v24  ;;  %v2495_v54 = vsel %vm2474_vm1, %v2430_v41, %v2446_v21  ;;  %v2185_v61 = vadd.f32 %v2184_v28, %v4904_v6  ;;  %v2432_v10 = vrot.slane %v2193_v36, 1 }
 0x270   : > { %v5067_v25 = vadd.f32 %v2495_v54, %v4833_v48  ;;  %v5070_v14 = vadd.f32 %v2479_v31, %v4841_v7  ;;  %v2025_v12 = vpop.f32.mrf.mxu1  ;;  %v3497_v34 = vpop.f32.mrf.mxu0 }
 0x271   : > { %v2447_v11 = vrot.slane %v2185_v61, 1  ;;  %v2196_v9 = vadd.f32 %v3497_v34, %v4922_v53 }
 0x272   : > { %v2546_v13 = vadd.f32 %v2545_v4, %v5067_v25  ;;  %v3166_v6 = vpack.c.bf16 %v5070_v14, %v5067_v25  ;;  %v5077_v15 = vpop.f32.mrf.mxu1  ;;  %v2187_v48 = vpop.f32.mrf.mxu0 }
 0x273   : > { %v2496_v7 = vsel %vm2474_vm1, %v2431_v1, %v2447_v11  ;;  %v2448_v24 = vrot.slane %v2196_v9, 1  ;;  %v2188_v20 = vadd.f32 %v2187_v48, %v4909_v32 }
 0x274   : > { %v2547_v41 = vadd.f32 %v2546_v13, %v5070_v14  ;;  %3226 = vst [vmem:[%s4986_s30 + $0x20] sm:$0xff] %v3166_v6   ;;  %v5085_v53 = vadd.f32 %v2496_v7, %v4838_v62  ;;  %v2028_v23 = vpop.f32.mrf.mxu1  ;;  %v3500_v21 = vpop.f32.mrf.mxu0 }
 0x275   : > { %v2497_v28 = vsel %vm2474_vm1, %v2432_v10, %v2448_v24  ;;  %v2463_v31 = vrot.slane %v2188_v20, 1  ;;  %v2209_v4 = vadd.f32 %v3500_v21, %v4948_v29 }
 0x276   : > { %v5090_v54 = vadd.f32 %v2497_v28, %v4847_v40  ;;  %v5092_v36 = vpop.f32.mrf.mxu1  ;;  %v2200_v61 = vpop.f32.mrf.mxu0  ;;  %v2548_v12 = vadd.f32 %v2547_v41, %v5085_v53 }
 0x277   : > { %v2480_v32 = vsel %vm2474_vm1, %v2447_v11, %v2463_v31  ;;  %v2201_v62 = vadd.f32 %v2200_v61, %v4932_v51  ;;  %v2449_v51 = vrot.slane %v2209_v4, 1 }
 0x278   : > { %v5100_v34 = vadd.f32 %v2480_v32, %v4851_v38  ;;  %v2033_v1 = vpop.f32.mrf.mxu1  ;;  %v3501_v9 = vpop.f32.mrf.mxu0 }
 0x279   : > { %v2464_v40 = vrot.slane %v2201_v62, 1  ;;  %v2212_v13 = vadd.f32 %v3501_v9, %v4953_v56 }
 0x27a   : > { %v2549_v6 = vadd.f32 %v2548_v12, %v5100_v34  ;;  %v3171_v11 = vpack.c.bf16 %v5100_v34, %v5085_v53  ;;  %v5106_v48 = vpop.f32.mrf.mxu1  ;;  %v2203_v29 = vpop.f32.mrf.mxu0 }
 0x27b   : > { %v2481_v10 = vsel %vm2474_vm1, %v2448_v24, %v2464_v40  ;;  %v2465_v38 = vrot.slane %v2212_v13, 1  ;;  %v2204_v7 = vadd.f32 %v2203_v29, %v4942_v5 }
 0x27c   : > { %3227 = vst [vmem:[%s4986_s30 + $0x28] sm:$0xff] %v3171_v11   ;;  %v5113_v20 = vadd.f32 %v2481_v10, %v4857_v55  ;;  %v2036_v56 = vpop.f32.mrf.mxu1  ;;  %v3504_v41 = vpop.f32.mrf.mxu0  ;;  %v2550_v28 = vadd.f32 %v2549_v6, %v5090_v54 }
 0x27d   : > { %v2482_v23 = vsel %vm2474_vm1, %v2449_v51, %v2465_v38  ;;  %v2433_v21 = vrot.slane %v2204_v7, 1  ;;  %v2225_v12 = vadd.f32 %v3504_v41, %v4968_v37 }
 0x27e   : > { %v3176_v31 = vpack.c.bf16 %v5113_v20, %v5090_v54  ;;  %v5120_v61 = vpop.f32.mrf.mxu1  ;;  %v2216_v24 = vpop.f32.mrf.mxu0  ;;  %v5126_v55 = vadd.f32 %v2482_v23, %v4863_v45  ;;  %v2551_v9 = vadd.f32 %v2550_v28, %v5113_v20 }
 0x27f   : > { %v2498_v5 = vsel %vm2474_vm1, %v2433_v21, %v2449_v51  ;;  %v2217_v1 = vadd.f32 %v2216_v24, %v4959_v16  ;;  %v2466_v51 = vrot.slane %v2225_v12, 1 }
 0x280   : > { %3228 = vst [vmem:[%s4986_s30 + $0x30] sm:$0xff] %v3176_v31   ;;  %v5129_v32 = vadd.f32 %v2498_v5, %v4869_v39  ;;  %v2041_v4 = vpop.f32.mrf.mxu1  ;;  %v3505_v62 = vpop.f32.mrf.mxu0 }
 0x281   : > { %v2434_v10 = vrot.slane %v2217_v1, 1  ;;  %v2228_v37 = vadd.f32 %v3505_v62, %v4991_v60 }
 0x282   : > { %v3181_v40 = vpack.c.bf16 %v5126_v55, %v5129_v32  ;;  %v5136_v13 = vpop.f32.mrf.mxu1  ;;  %v2219_v6 = vpop.f32.mrf.mxu0  ;;  %v2552_v11 = vadd.f32 %v2551_v9, %v5129_v32 }
 0x283   : > { %v2220_v45 = vadd.f32 %v2219_v6, %v4963_v52  ;;  %v2435_v24 = vrot.slane %v2228_v37, 1 }
 0x284   : > { %3229 = vst [vmem:[%s4986_s30 + $0x38] sm:$0xff] %v3181_v40   ;;  %v2044_v39 = vpop.f32.mrf.mxu1  ;;  %v3508_v29 = vpop.f32.mrf.mxu0  ;;  %v2553_v60 = vadd.f32 %v2552_v11, %v5126_v55 }
 0x285   : > { %v2450_v16 = vrot.slane %v2220_v45, 1  ;;  %v2241_v5 = vadd.f32 %v3508_v29, %v5036_v42 }
 0x286   : > { %v5142_v38 = vpop.f32.mrf.mxu1  ;;  %v2232_v7 = vpop.f32.mrf.mxu0 }
 0x287   : > { %v2483_v56 = vsel %vm2474_vm1, %v2450_v16, %v2466_v51  ;;  %v2499_v41 = vsel %vm2474_vm1, %v2434_v10, %v2450_v16  ;;  %v2233_v52 = vadd.f32 %v2232_v7, %v5003_v0  ;;  %v2436_v11 = vrot.slane %v2241_v5, 1 }
 0x288   : > { %v5150_v23 = vadd.f32 %v2499_v41, %v4875_v58  ;;  %v5153_v21 = vadd.f32 %v2483_v56, %v4885_v8  ;;  %v2049_v28 = vpop.f32.mrf.mxu1  ;;  %v3509_v31 = vpop.f32.mrf.mxu0 }
 0x289   : > { %v2451_v4 = vrot.slane %v2233_v52, 1  ;;  %v2244_v62 = vadd.f32 %v3509_v31, %v5052_v26 }
 0x28a   : > { %v2554_v12 = vadd.f32 %v2553_v60, %v5150_v23  ;;  %v3186_v58 = vpack.c.bf16 %v5153_v21, %v5150_v23  ;;  %v5161_v0 = vpop.f32.mrf.mxu1  ;;  %v2235_v8 = vpop.f32.mrf.mxu0 }
 0x28b   : > { %v2500_v1 = vsel %vm2474_vm1, %v2435_v24, %v2451_v4  ;;  %v2452_v9 = vrot.slane %v2244_v62, 1  ;;  %v2236_v40 = vadd.f32 %v2235_v8, %v5019_v63 }
 0x28c   : > { %v2555_v6 = vadd.f32 %v2554_v12, %v5153_v21  ;;  %3230 = vst [vmem:[%s4986_s30 + $0x40] sm:$0xff] %v3186_v58   ;;  %v5169_v42 = vadd.f32 %v2500_v1, %v4881_v49  ;;  %v2052_v26 = vpop.f32.mrf.mxu1  ;;  %v3512_v45 = vpop.f32.mrf.mxu0 }
 0x28d   : > { %v2467_v39 = vrot.slane %v2236_v40, 1  ;;  %v2501_v37 = vsel %vm2474_vm1, %v2436_v11, %v2452_v9  ;;  %v2257_v16 = vadd.f32 %v3512_v45, %v5092_v36 }
 0x28e   : > { %v2556_v29 = vadd.f32 %v2555_v6, %v5169_v42  ;;  %v2055_v51 = vpop.f32.mrf.mxu1  ;;  %v2248_v10 = vpop.f32.mrf.mxu0  ;;  %v5183_v28 = vadd.f32 %v2501_v37, %v4891_v17 }
 0x28f   : > { %v2484_v63 = vsel %vm2474_vm1, %v2451_v4, %v2467_v39  ;;  %v2249_v49 = vadd.f32 %v2248_v10, %v5058_v33  ;;  %v2453_v4 = vrot.slane %v2257_v16, 1 }
 0x290   : > { %v5179_v7 = vadd.f32 %v2484_v63, %v4895_v3  ;;  %v2057_v56 = vpop.f32.mrf.mxu1  ;;  %v3513_v41 = vpop.f32.mrf.mxu0 }
 0x291   : > { %v2468_v52 = vrot.slane %v2249_v49, 1  ;;  %v2260_v60 = vadd.f32 %v3513_v41, %v5106_v48 }
 0x292   : > { %v2557_v31 = vadd.f32 %v2556_v29, %v5179_v7  ;;  %v3191_v24 = vpack.c.bf16 %v5179_v7, %v5169_v42  ;;  %v2058_v36 = vpop.f32.mrf.mxu1  ;;  %v2251_v5 = vpop.f32.mrf.mxu0 }
 0x293   : > { %v2485_v3 = vsel %vm2474_vm1, %v2452_v9, %v2468_v52  ;;  %v2469_v33 = vrot.slane %v2260_v60, 1  ;;  %v2252_v62 = vadd.f32 %v2251_v5, %v5077_v15 }
 0x294   : > { %3231 = vst [vmem:[%s4986_s30 + $0x48] sm:$0xff] %v3191_v24   ;;  %v5193_v48 = vadd.f32 %v2485_v3, %v4901_v43  ;;  %v2558_v17 = vadd.f32 %v2557_v31, %v5183_v28  ;;  %v2060_v12 = vpop.f32.mrf.mxu1  ;;  %v3516_v58 = vpop.f32.mrf.mxu0 }
 0x295   : > { %v2486_v8 = vsel %vm2474_vm1, %v2453_v4, %v2469_v33  ;;  %v2437_v1 = vrot.slane %v2252_v62, 1  ;;  %v2273_v29 = vadd.f32 %v3516_v58, %v5142_v38 }
 0x296   : > { %v2559_v40 = vadd.f32 %v2558_v17, %v5193_v48  ;;  %v3196_v9 = vpack.c.bf16 %v5193_v48, %v5183_v28  ;;  %v2063_v6 = vpop.f32.mrf.mxu1  ;;  %v2264_v15 = vpop.f32.mrf.mxu0  ;;  %v5205_v26 = vadd.f32 %v2486_v8, %v4907_v27 }
 0x297   : > { %v2502_v43 = vsel %vm2474_vm1, %v2437_v1, %v2453_v4  ;;  %v2265_v10 = vadd.f32 %v2264_v15, %v5120_v61  ;;  %v2470_v52 = vrot.slane %v2273_v29, 1 }
 0x298   : > { %3232 = vst [vmem:[%s4986_s30 + $0x50] sm:$0xff] %v3196_v9   ;;  %v5208_v45 = vadd.f32 %v2502_v43, %v4913_v22  ;;  %v2065_v11 = vpop.f32.mrf.mxu1  ;;  %v3517_v39 = vpop.f32.mrf.mxu0 }
 0x299   : > { %v2438_v60 = vrot.slane %v2265_v10, 1  ;;  %v2276_v38 = vadd.f32 %v3517_v39, %v5161_v0  ;;  %v5506_v11 = vld [vmem:[#allocation29_spill] sm:$0xff] }
 0x29a   : > { %v2560_v37 = vadd.f32 %v2559_v40, %v5208_v45  ;;  %v3201_v63 = vpack.c.bf16 %v5205_v26, %v5208_v45  ;;  %v2066_v16 = vpop.f32.mrf.mxu1  ;;  %v2267_v49 = vpop.f32.mrf.mxu0 }
 0x29b   : > { %v2268_v56 = vadd.f32 %v2267_v49, %v5136_v13  ;;  %v2439_v0 = vrot.slane %v2276_v38, 1 }
 0x29c   : > { %3233 = vst [vmem:[%s4986_s30 + $0x58] sm:$0xff] %v3201_v63   ;;  %v2561_v27 = vadd.f32 %v2560_v37, %v5205_v26  ;;  %v2068_v22 = vpop.f32.mrf.mxu1  ;;  %v3520_v41 = vpop.f32.mrf.mxu0 }
 0x29d   : > { %v2454_v31 = vrot.slane %v2268_v56, 1  ;;  %v2289_v12 = vadd.f32 %v3520_v41, %v2063_v6  ;;  %v5507_v22 = vld [vmem:[#allocation35_spill] sm:$0xff] }
 0x29e   : > { %v2071_v61 = vpop.f32.mrf.mxu1  ;;  %v2280_v24 = vpop.f32.mrf.mxu0 }
 0x29f   : > { %v2487_v5 = vsel %vm2474_vm1, %v2454_v31, %v2470_v52  ;;  %v2503_v4 = vsel %vm2474_vm1, %v2438_v60, %v2454_v31  ;;  %v2281_v3 = vadd.f32 %v2280_v24, %v2055_v51  ;;  %v2440_v10 = vrot.slane %v2289_v12, 1  ;;  %v5508_v24 = vld [vmem:[#allocation9_spill] sm:$0xff] }
 0x2a0   : > { %v5224_v13 = vadd.f32 %v2503_v4, %v4919_v19  ;;  %v5227_v33 = vadd.f32 %v2487_v5, %v4929_v50  ;;  %v2073_v62 = vpop.f32.mrf.mxu1  ;;  %v3521_v17 = vpop.f32.mrf.mxu0 }
 0x2a1   : > { %v2455_v58 = vrot.slane %v2281_v3, 1  ;;  %v2292_v8 = vadd.f32 %v3521_v17, %v2066_v16 }
 0x2a2   : > { %v2562_v1 = vadd.f32 %v2561_v27, %v5224_v13  ;;  %v3206_v40 = vpack.c.bf16 %v5227_v33, %v5224_v13  ;;  %v2074_v9 = vpop.f32.mrf.mxu1  ;;  %v2283_v51 = vpop.f32.mrf.mxu0 }
 0x2a3   : > { %v2504_v19 = vsel %vm2474_vm1, %v2439_v0, %v2455_v58  ;;  %v2456_v15 = vrot.slane %v2292_v8, 1  ;;  %v2284_v43 = vadd.f32 %v2283_v51, %v2058_v36 }
 0x2a4   : > { %v2563_v50 = vadd.f32 %v2562_v1, %v5227_v33  ;;  %3234 = vst [vmem:[%s4986_s30 + $0x60] sm:$0xff] %v3206_v40   ;;  %v2533_v39 = vadd.f32 %v2504_v19, %v5506_v11  ;;  %v2076_v6 = vpop.f32.mrf.mxu1  ;;  %v3524_v29 = vpop.f32.mrf.mxu0 }
 0x2a5   : > { %v2471_v37 = vrot.slane %v2284_v43, 1  ;;  %v2505_v56 = vsel %vm2474_vm1, %v2440_v10, %v2456_v15  ;;  %v5511_v10 = vld [vmem:[#allocation34_spill] sm:$0xff] }
 0x2a6   : > { %v2564_v63 = vadd.f32 %v2563_v50, %v2533_v39  ;;  %v2079_v16 = vpop.f32.mrf.mxu1  ;;  %v2296_v49 = vpop.f32.mrf.mxu0  ;;  %v2535_v5 = vadd.f32 %v2505_v56, %v5508_v24 }
 0x2a7   : > { %v2488_v27 = vsel %vm2474_vm1, %v2455_v58, %v2471_v37  ;;  %v2297_v36 = vadd.f32 %v2296_v49, %v2071_v61  ;;  %v2305_v38 = vadd.f32 %v3524_v29, %v2079_v16  ;;  %v5509_v61 = vld [vmem:[#allocation32_spill] sm:$0xff] }
 0x2a8   : > { %v2534_v41 = vadd.f32 %v2488_v27, %v5507_v22  ;;  %v2081_v52 = vpop.f32.mrf.mxu1  ;;  %v3525_v60 = vpop.f32.mrf.mxu0 }
 0x2a9   : > { %v2472_v31 = vrot.slane %v2297_v36, 1  ;;  %v2457_v51 = vrot.slane %v2305_v38, 1 }
 0x2aa   : > { %v2565_v4 = vadd.f32 %v2564_v63, %v2534_v41  ;;  %v3211_v3 = vpack.c.bf16 %v2534_v41, %v2533_v39  ;;  %v2082_v62 = vpop.f32.mrf.mxu1  ;;  %v2299_v17 = vpop.f32.mrf.mxu0 }
 0x2ab   : > { %v2489_v0 = vsel %vm2474_vm1, %v2456_v15, %v2472_v31  ;;  %v2308_v12 = vadd.f32 %v3525_v60, %v2082_v62  ;;  %v2300_v8 = vadd.f32 %v2299_v17, %v2074_v9  ;;  %v5510_v9 = vld [vmem:[#allocation10_spill] sm:$0xff] }
 0x2ac   : > { %3235 = vst [vmem:[%s4986_s30 + $0x68] sm:$0xff] %v3211_v3   ;;  %v2536_v58 = vadd.f32 %v2489_v0, %v5509_v61  ;;  %v2566_v1 = vadd.f32 %v2565_v4, %v2535_v5  ;;  %v2084_v40 = vpop.f32.mrf.mxu1 }
 0x2ad   : > { %v2473_v19 = vrot.slane %v2308_v12, 1  ;;  %v2441_v43 = vrot.slane %v2300_v8, 1 }
 0x2ae   : > { %v2567_v50 = vadd.f32 %v2566_v1, %v2536_v58  ;;  %v3216_v11 = vpack.c.bf16 %v2536_v58, %v2535_v5 }
 0x2af   : > { %v2490_v6 = vsel %vm2474_vm1, %v2457_v51, %v2473_v19  ;;  %v2506_v15 = vsel %vm2474_vm1, %v2441_v43, %v2457_v51 }
 0x2b0   : > { %3236 = vst [vmem:[%s4986_s30 + $0x70] sm:$0xff] %v3216_v11   ;;  %v2538_v29 = vadd.f32 %v2490_v6, %v5510_v9  ;;  %v2537_v37 = vadd.f32 %v2506_v15, %v5511_v10 }
 0x2b2   : > { %v2568_v63 = vadd.f32 %v2567_v50, %v2537_v37  ;;  %v3221_v16 = vpack.c.bf16 %v2538_v29, %v2537_v37 }
 0x2b4   : > { %v2569_v49 = vadd.f32 %v2568_v63, %v2538_v29  ;;  %3237 = vst [vmem:[%s4986_s30 + $0x78] sm:$0xff] %v3221_v16  }
 0x2b6   : > { %v2570_v56 = vrot.slane %v2569_v49, 4 }
 0x2b8   : > { %v2571_v27 = vadd.f32 %v2570_v56, %v2569_v49 }
 0x2ba   : > { %v2572_v36 = vrot.slane %v2571_v27, 2 }
 0x2bc   : > { %v2573_v22 = vadd.f32 %v2572_v36, %v2571_v27 }
 0x2be   : > { %v2574_v52 = vrot.slane %v2573_v22, 1 }
 0x2c0   : > { %v2575_v2 = vadd.f32 %v2574_v52, %v2573_v22 }
 0x2c2   : > { %2678 = vst [vmem:[%s211_s6] sm:$0x1] %v2575_v2  ;;  %v2576_v60 = vmul.f32 0.00390625, %v2575_v2 }
 0x2c4   : > { %v2593_v38 = vsub.f32 %v5150_v23, %v2576_v60  ;;  %v5261_v31 = vsub.f32 %v5153_v21, %v2576_v60  ;;  %v5264_v24 = vsub.f32 %v5169_v42, %v2576_v60  ;;  %v5267_v4 = vsub.f32 %v5179_v7, %v2576_v60 }
 0x2c5   : > { %v5270_v3 = vsub.f32 %v5183_v28, %v2576_v60  ;;  %v5273_v62 = vsub.f32 %v5193_v48, %v2576_v60  ;;  %v5276_v17 = vsub.f32 %v5208_v45, %v2576_v60  ;;  %v5279_v23 = vsub.f32 %v5205_v26, %v2576_v60 }
 0x2c6   : > { %v5282_v21 = vsub.f32 %v5224_v13, %v2576_v60  ;;  %v5285_v42 = vsub.f32 %v5227_v33, %v2576_v60  ;;  %v5287_v7 = vsub.f32 %v2533_v39, %v2576_v60  ;;  %v5289_v0 = vsub.f32 %v2534_v41, %v2576_v60 }
 0x2c7   : > { %v5291_v28 = vsub.f32 %v2535_v5, %v2576_v60  ;;  %v5293_v48 = vsub.f32 %v2536_v58, %v2576_v60  ;;  %v5295_v12 = vsub.f32 %v2537_v37, %v2576_v60  ;;  %v5297_v45 = vsub.f32 %v2538_v29, %v2576_v60 }
 0x2c8   : > { %v2577_v26 = vsub.f32 %v4976_v46, %v2576_v60  ;;  %v2578_v13 = vsub.f32 %v4979_v47, %v2576_v60  ;;  %v2579_v8 = vsub.f32 %v4999_v57, %v2576_v60  ;;  %v2580_v39 = vsub.f32 %v5011_v59, %v2576_v60 }
 0x2c9   : > { %v2581_v41 = vsub.f32 %v5025_v35, %v2576_v60  ;;  %v2582_v58 = vsub.f32 %v5029_v44, %v2576_v60  ;;  %v2583_v19 = vsub.f32 %v5045_v30, %v2576_v60  ;;  %v2584_v47 = vsub.f32 %v5042_v18, %v2576_v60 }
 0x2ca   : > { %v2609_v33 = vmul.f32 %v2577_v26, %v2577_v26  ;;  %v2610_v61 = vmul.f32 %v2578_v13, %v2578_v13  ;;  %v2611_v5 = vmul.f32 %v2579_v8, %v2579_v8  ;;  %v2612_v40 = vmul.f32 %v2580_v39, %v2580_v39 }
 0x2cb   : > { %v2613_v43 = vmul.f32 %v2581_v41, %v2581_v41  ;;  %v2614_v50 = vmul.f32 %v2582_v58, %v2582_v58  ;;  %v2585_v11 = vsub.f32 %v5067_v25, %v2576_v60  ;;  %v2615_v6 = vmul.f32 %v2583_v19, %v2583_v19 }
 0x2cc   : > { %v2641_v1 = vadd.f32 %v2610_v61, %v2609_v33  ;;  %v2586_v35 = vsub.f32 %v5070_v14, %v2576_v60  ;;  %v2616_v15 = vmul.f32 %v2584_v47, %v2584_v47  ;;  %v2587_v44 = vsub.f32 %v5085_v53, %v2576_v60 }
 0x2cd   : > { %v2617_v29 = vmul.f32 %v2585_v11, %v2585_v11  ;;  %v2588_v30 = vsub.f32 %v5100_v34, %v2576_v60  ;;  %v2589_v18 = vsub.f32 %v5090_v54, %v2576_v60  ;;  %v2590_v25 = vsub.f32 %v5113_v20, %v2576_v60 }
 0x2ce   : > { %v2642_v51 = vadd.f32 %v2641_v1, %v2611_v5  ;;  %v2618_v37 = vmul.f32 %v2586_v35, %v2586_v35  ;;  %v2619_v16 = vmul.f32 %v2587_v44, %v2587_v44  ;;  %v2591_v14 = vsub.f32 %v5129_v32, %v2576_v60 }
 0x2cf   : > { %v2620_v56 = vmul.f32 %v2588_v30, %v2588_v30  ;;  %v2621_v36 = vmul.f32 %v2589_v18, %v2589_v18  ;;  %v2592_v53 = vsub.f32 %v5126_v55, %v2576_v60  ;;  %v2622_v52 = vmul.f32 %v2590_v25, %v2590_v25 }
 0x2d0   : > { %v2643_v46 = vadd.f32 %v2642_v51, %v2612_v40  ;;  %v2623_v26 = vmul.f32 %v2591_v14, %v2591_v14  ;;  %v2625_v33 = vmul.f32 %v2593_v38, %v2593_v38  ;;  %v2626_v61 = vmul.f32 %v5261_v31, %v5261_v31 }
 0x2d1   : > { %v2624_v13 = vmul.f32 %v2592_v53, %v2592_v53  ;;  %v2627_v39 = vmul.f32 %v5264_v24, %v5264_v24  ;;  %v2628_v41 = vmul.f32 %v5267_v4, %v5267_v4  ;;  %v2629_v60 = vmul.f32 %v5270_v3, %v5270_v3 }
 0x2d2   : > { %v2644_v57 = vadd.f32 %v2643_v46, %v2613_v43  ;;  %v2630_v38 = vmul.f32 %v5273_v62, %v5273_v62  ;;  %v2631_v31 = vmul.f32 %v5276_v17, %v5276_v17  ;;  %v2632_v24 = vmul.f32 %v5279_v23, %v5279_v23 }
 0x2d3   : > { %v2633_v4 = vmul.f32 %v5282_v21, %v5282_v21  ;;  %v2634_v3 = vmul.f32 %v5285_v42, %v5285_v42  ;;  %v2635_v62 = vmul.f32 %v5287_v7, %v5287_v7  ;;  %v2636_v17 = vmul.f32 %v5289_v0, %v5289_v0 }
 0x2d4   : > { %v2645_v59 = vadd.f32 %v2644_v57, %v2614_v50  ;;  %v2637_v23 = vmul.f32 %v5291_v28, %v5291_v28  ;;  %v2638_v21 = vmul.f32 %v5293_v48, %v5293_v48  ;;  %v2639_v42 = vmul.f32 %v5295_v12, %v5295_v12 }
 0x2d5   : > { %v2640_v7 = vmul.f32 %v5297_v45, %v5297_v45 }
 0x2d6   : > { %v2646_v9 = vadd.f32 %v2645_v59, %v2615_v6 }
 0x2d8   : > { %v2647_v10 = vadd.f32 %v2646_v9, %v2616_v15 }
 0x2da   : > { %v2648_v63 = vadd.f32 %v2647_v10, %v2617_v29 }
 0x2dc   : > { %v2649_v49 = vadd.f32 %v2648_v63, %v2618_v37 }
 0x2de   : > { %v2650_v27 = vadd.f32 %v2649_v49, %v2619_v16 }
 0x2e0   : > { %v2651_v22 = vadd.f32 %v2650_v27, %v2620_v56 }
 0x2e2   : > { %v2652_v2 = vadd.f32 %v2651_v22, %v2621_v36 }
 0x2e4   : > { %v2653_v34 = vadd.f32 %v2652_v2, %v2622_v52 }
 0x2e6   : > { %v2654_v8 = vadd.f32 %v2653_v34, %v2623_v26 }
 0x2e8   : > { %v2655_v54 = vadd.f32 %v2654_v8, %v2624_v13 }
 0x2ea   : > { %v2656_v20 = vadd.f32 %v2655_v54, %v2625_v33 }
 0x2ec   : > { %v2657_v32 = vadd.f32 %v2656_v20, %v2626_v61 }
 0x2ee   : > { %v2658_v55 = vadd.f32 %v2657_v32, %v2627_v39 }
 0x2f0   : > { %v2659_v5 = vadd.f32 %v2658_v55, %v2628_v41 }
 0x2f2   : > { %v2660_v1 = vadd.f32 %v2659_v5, %v2629_v60 }
 0x2f4   : > { %v2661_v58 = vadd.f32 %v2660_v1, %v2630_v38 }
 0x2f6   : > { %v2662_v40 = vadd.f32 %v2661_v58, %v2631_v31 }
 0x2f8   : > { %v2663_v51 = vadd.f32 %v2662_v40, %v2632_v24 }
 0x2fa   : > { %v2664_v19 = vadd.f32 %v2663_v51, %v2633_v4 }
 0x2fc   : > { %v2665_v43 = vadd.f32 %v2664_v19, %v2634_v3 }
 0x2fe   : > { %v2666_v46 = vadd.f32 %v2665_v43, %v2635_v62 }
 0x300   : > { %v2667_v47 = vadd.f32 %v2666_v46, %v2636_v17 }
 0x302   : > { %v2668_v50 = vadd.f32 %v2667_v47, %v2637_v23 }
 0x304   : > { %v2669_v57 = vadd.f32 %v2668_v50, %v2638_v21 }
 0x306   : > { %v2670_v11 = vadd.f32 %v2669_v57, %v2639_v42 }
 0x308   : > { %v2671_v6 = vadd.f32 %v2670_v11, %v2640_v7 }
 0x30a   : > { %v2672_v0 = vrot.slane %v2671_v6, 4 }
 0x30c   : > { %v2673_v59 = vadd.f32 %v2672_v0, %v2671_v6 }
 0x30e   : > { %v2674_v35 = vrot.slane %v2673_v59, 2 }
 0x310   : > { %v2675_v15 = vadd.f32 %v2674_v35, %v2673_v59 }
 0x312   : > { %v2676_v9 = vrot.slane %v2675_v15, 1 }
 0x314   : > { %v2677_v28 = vadd.f32 %v2676_v9, %v2675_v15 }
 0x316   : > { %2679 = vst [vmem:[%s214_s10] sm:$0x1] %v2677_v28 }
 0x317 PF: > { %s15_s15 = sadd.s32 1, %s3645_s15  }
 0x318   : > { %p12_p4 = scmp.ge.s32.totalorder %s15_s15, 4  }
 0x31a   :  { %14 = sbr.rel (!%p12_p4) target bundleno = 1 (0x1), region = 82 }

// kernel: basic_block.4
= control target key start
LH: loop header
LB: loop body
LE: loop exit
PB: predicated region body
PF: predicated region fallthrough
CT: control target
= control target key end

     0   :  { %s3912_s21 = smov 0   ;;  %s5616_s0 = inlined_call_operand.vmem [shape: bf16[2,16,16,128], index: 0, kind: input, shape index: {}]   ;;  %s5617_s1 = inlined_call_operand.vmem [shape: f32[1,128], index: 1, kind: input, shape index: {}]   ;;  %s5618_s2 = inlined_call_operand.vmem [shape: f32[1,128], index: 2, kind: input, shape index: {}]   ;;  %s5619_s3 = inlined_call_operand.vmem [shape: bf16[1152,128], index: 3, kind: input, shape index: {}]   ;;  %s5620_s4 = inlined_call_operand.vmem [shape: bf16[2,16,16,128], index: 4, kind: output, shape index: {0}]   ;;  %s5621_s5 = inlined_call_operand.vmem [shape: f32[2,1,128], index: 5, kind: output, shape index: {1}]   ;;  %s5622_s6 = inlined_call_operand.vmem [shape: f32[2,1,128], index: 6, kind: output, shape index: {2}]  }
   0x1 LB: > { %s3141_s22 = sadd.s32 4294967295, %s3874_s21   ;;  %p3145_p0 = scmp.ge.s32.totalorder %s3874_s21, 1  ;;  %s3874_s21 = sphi %s3912_s21, %s17_s21  }
   0x2   : > { %p217_p1 = scmp.lt.s32.totalorder %s3874_s21, 3 }
   0x4   : > { %p218_p2 = pnand %p3145_p0, %p217_p1 }
   0x6   : > { %221 = sbr.rel (%p218_p2) target bundleno = 791 (0x317), region = 36 }
   0xb   : > { %v3796_v0 = vld [vmem:[%s5619_s3 + $0x38] sm:$0xff]   ;;  %v5623_v1 = vmov 0   ;;  %v3798_v3 = vld [vmem:[%s5619_s3 + $0x30] sm:$0xff]   ;;  %p253_p3 = scmp.lt.s32.totalorder %s3141_s22, 1  ;;  %v3944_v5 = vld [vmem:[%s5619_s3 + $0xa8] sm:$0xff]  }
   0xc   : > { %805 = vmatprep.subr.bf16.mxu0 %v5623_v1  ;;  %v3927_v2 = vld [vmem:[%s5619_s3 + $0xb8] sm:$0xff]   ;;  %v3937_v4 = vld [vmem:[%s5619_s3 + $0xb0] sm:$0xff]   ;;  %v3800_v6 = vld [vmem:[%s5619_s3 + $0x28] sm:$0xff]   ;;  %v4037_v40 = vunpack.c.l.b16 %v5623_v1 }
   0xd   : > { %806 = vmatpush1.bf16.msra.mxu0 %v3796_v0  ;;  %3771 = vmatprep.subr.bf16.mxu1 %v3927_v2  ;;  %s5779_s22 = smov (!%p253_p3, %s3141_s22), 1  ;;  %v3957_v7 = vld [vmem:[%s5619_s3 + $0xa0] sm:$0xff]   ;;  %v3969_v9 = vld [vmem:[%s5619_s3 + $0x98] sm:$0xff]   ;;  %v3806_v11 = vld [vmem:[%s5619_s3 + $0x10] sm:$0xff]  }
   0xe   : > { %807 = vmatprep.subr.bf16.mxu0 %v5623_v1  ;;  %3779 = vmatpush3.bf16.msra.mxu1 %v3927_v2  ;;  %v3802_v8 = vld [vmem:[%s5619_s3 + $0x20] sm:$0xff]   ;;  %s3275_s15 = sshll.u32 %s5779_s22, 7  ;;  %v3804_v10 = vld [vmem:[%s5619_s3 + $0x18] sm:$0xff]   ;;  %v3989_v12 = vld [vmem:[%s5619_s3 + $0x90] sm:$0xff]   ;;  %s265_s9 = scalar_lea.vmem %s5621_s5, %s5779_s22 }
   0xf   : > { %3772 = vmatprep.subr.bf16.mxu1 %v3937_v4  ;;  %s3976_s20 = scalar_lea.vmem %s5616_s0, %s3275_s15  ;;  %v3995_v14 = vld [vmem:[%s5617_s1] ss:$0 sm:$0xff]  ;;  %v4012_v23 = vld [vmem:[%s5619_s3 + $0x88] sm:$0xff]   ;;  %v3812_v58 = vld [vmem:[%s5619_s3 + $0x78] sm:$0xff]   ;;  %s5250_s7 = scalar_lea.vmem %s5620_s4, %s3275_s15 }
  0x10   : > { %v3458_v13 = vld [vmem:[%s3976_s20 + $0x30] sm:$0xff]   ;;  %v4001_v17 = vld [vmem:[%s5618_s2] ss:$0 sm:$0xff]  ;;  %v3459_v18 = vld [vmem:[%s3976_s20 + $0x38] sm:$0xff]   ;;  %s268_s11 = scalar_lea.vmem %s5622_s6, %s5779_s22 }
  0x11   : > { %808 = vmatpush1.bf16.msra.mxu0 %v3798_v3  ;;  %v3335_v15 = vunpack.c.l.bf16 %v3458_v13  ;;  %v3336_v16 = vunpack.c.h.bf16 %v3458_v13  ;;  %v3339_v21 = vunpack.c.l.bf16 %v3459_v18  ;;  %v3340_v22 = vunpack.c.h.bf16 %v3459_v18  ;;  %v3460_v28 = vld [vmem:[%s3976_s20 + $0x40] sm:$0xff]   ;;  %v3808_v29 = vld [vmem:[%s5619_s3 + $0x8] sm:$0xff]   ;;  %v3462_v50 = vld [vmem:[%s3976_s20 + $0x50] sm:$0xff]  }
  0x12   : > { %809 = vmatprep.subr.bf16.mxu0 %v5623_v1  ;;  %3780 = vmatpush3.bf16.msra.mxu1 %v3937_v4  ;;  %v3343_v30 = vunpack.c.l.bf16 %v3460_v28  ;;  %v3344_v31 = vunpack.c.h.bf16 %v3460_v28  ;;  %v4032_v38 = vld [vmem:[%s5619_s3 + $0x80] sm:$0xff]   ;;  %v3461_v43 = vld [vmem:[%s3976_s20 + $0x48] sm:$0xff]   ;;  %v3351_v56 = vunpack.c.l.bf16 %v3462_v50  ;;  %v3352_v57 = vunpack.c.h.bf16 %v3462_v50  ;;  %v3813_v3 = vld [vmem:[%s5619_s3 + $0xf8] sm:$0xff]  }
  0x13   : > { %3773 = vmatprep.subr.bf16.mxu1 %v3944_v5  ;;  %v353_v19 = vmul.f32 %v3335_v15, %v3995_v14  ;;  %v354_v20 = vmul.f32 %v3336_v16, %v3995_v14  ;;  %v355_v26 = vmul.f32 %v3339_v21, %v3995_v14  ;;  %v356_v27 = vmul.f32 %v3340_v22, %v3995_v14  ;;  %v3810_v44 = vld [vmem:[%s5619_s3] sm:$0xff]   ;;  %v3463_v13 = vld [vmem:[%s3976_s20 + $0x58] sm:$0xff]   ;;  %v3815_v16 = vld [vmem:[%s5619_s3 + $0xf0] sm:$0xff]  }
  0x14   : > { %v357_v36 = vmul.f32 %v3343_v30, %v3995_v14  ;;  %v358_v37 = vmul.f32 %v3344_v31, %v3995_v14  ;;  %v3347_v47 = vunpack.c.l.bf16 %v3461_v43  ;;  %v3348_v48 = vunpack.c.h.bf16 %v3461_v43  ;;  %v3310_v15 = vld [vmem:[%s3976_s20] sm:$0xff]  }
  0x15   : > { %810 = vmatpush1.bf16.msra.mxu0 %v3800_v6  ;;  %v392_v24 = vadd.f32 %v4001_v17, %v353_v19  ;;  %v393_v25 = vadd.f32 %v4001_v17, %v354_v20  ;;  %v394_v34 = vadd.f32 %v4001_v17, %v355_v26  ;;  %v395_v35 = vadd.f32 %v4001_v17, %v356_v27  ;;  %v3814_v6 = vld [vmem:[%s5619_s3 + $0x70] sm:$0xff]   ;;  %v3464_v21 = vld [vmem:[%s3976_s20 + $0x60] sm:$0xff]   ;;  %v3816_v27 = vld [vmem:[%s5619_s3 + $0x68] sm:$0xff]  }
  0x16   : > { %811 = vmatprep.subr.bf16.mxu0 %v5623_v1  ;;  %3781 = vmatpush3.bf16.msra.mxu1 %v3944_v5  ;;  %v396_v45 = vadd.f32 %v4001_v17, %v357_v36  ;;  %v397_v46 = vadd.f32 %v4001_v17, %v358_v37  ;;  %v359_v53 = vmul.f32 %v3347_v47, %v3995_v14  ;;  %v3311_v22 = vunpack.c.l.bf16 %v3310_v15  ;;  %v3817_v37 = vld [vmem:[%s5619_s3 + $0xe8] sm:$0xff]  }
  0x17   : > { %3774 = vmatprep.subr.bf16.mxu1 %v3957_v7  ;;  %v424_v32 = vmax.f32 %v392_v24, 0.0  ;;  %v425_v33 = vmax.f32 %v393_v25, 0.0  ;;  %v426_v41 = vmax.f32 %v394_v34, 0.0  ;;  %v427_v42 = vmax.f32 %v395_v35, 0.0  ;;  %v3453_v34 = vld [vmem:[%s3976_s20 + $0x8] sm:$0xff]  }
  0x18   : > { %v428_v51 = vmax.f32 %v396_v45, 0.0  ;;  %v429_v52 = vmax.f32 %v397_v46, 0.0  ;;  %v360_v54 = vmul.f32 %v3348_v48, %v3995_v14  ;;  %v398_v61 = vadd.f32 %v4001_v17, %v359_v53  ;;  %v3818_v48 = vld [vmem:[%s5619_s3 + $0x60] sm:$0xff]  }
  0x19   : > { %812 = vmatpush1.bf16.msra.mxu0 %v3802_v8  ;;  %v4034_v39 = vpack.c.bf16 %v425_v33, %v424_v32  ;;  %v4058_v59 = vpack.c.bf16 %v427_v42, %v426_v41  ;;  %v361_v63 = vmul.f32 %v3351_v56, %v3995_v14  ;;  %v362_v0 = vmul.f32 %v3352_v57, %v3995_v14  ;;  %v3819_v53 = vld [vmem:[%s5619_s3 + $0xe0] sm:$0xff]  }
  0x1a   : > { %813 = vmatprep.subr.bf16.mxu0 %v5623_v1  ;;  %3782 = vmatpush3.bf16.msra.mxu1 %v3957_v7  ;;  %v4060_v60 = vpack.c.bf16 %v429_v52, %v428_v51  ;;  %v399_v62 = vadd.f32 %v4001_v17, %v360_v54  ;;  %v430_v19 = vmax.f32 %v398_v61, 0.0  ;;  %v3312_v24 = vunpack.c.h.bf16 %v3310_v15  ;;  %v3465_v54 = vld [vmem:[%s3976_s20 + $0x68] sm:$0xff]   ;;  %v3821_v15 = vld [vmem:[%s5619_s3 + $0xd8] sm:$0xff]  }
  0x1b   : > { %3775 = vmatprep.subr.bf16.mxu1 %v3969_v9  ;;  %v492_v49 = vunpack.c.h.b16 %v4034_v39  ;;  %v3359_v25 = vunpack.c.l.bf16 %v3464_v21  ;;  %v3360_v26 = vunpack.c.h.bf16 %v3464_v21  ;;  %v3356_v31 = vunpack.c.h.bf16 %v3463_v13 }
  0x1c   : > { %v4077_v8 = vcombine.low %v5623_v1, %v4060_v60  ;;  %v496_v18 = vunpack.c.h.b16 %v4060_v60  ;;  %v431_v20 = vmax.f32 %v399_v62, 0.0  ;;  %v341_v32 = vmul.f32 %v3311_v22, %v3995_v14  ;;  %v3466_v62 = vld [vmem:[%s3976_s20 + $0x70] sm:$0xff]  }
  0x1d   : > { %814 = vmatpush1.bf16.msra.mxu0 %v3804_v10  ;;  %v4053_v55 = vpack.c.b16 %v4037_v40, %v492_v49  ;;  %v400_v10 = vadd.f32 %v4001_v17, %v361_v63  ;;  %v342_v33 = vmul.f32 %v3312_v24, %v3995_v14  ;;  %v365_v43 = vmul.f32 %v3359_v25, %v3995_v14  ;;  %v3822_v24 = vld [vmem:[%s5619_s3 + $0x50] sm:$0xff]  }
  0x1e   : > { %815 = vmatprep.subr.bf16.mxu0 %v5623_v1  ;;  %3783 = vmatpush3.bf16.msra.mxu1 %v3969_v9  ;;  %v4101_v35 = vpack.c.b16 %v4037_v40, %v496_v18  ;;  %v4103_v36 = vpack.c.bf16 %v431_v20, %v430_v19  ;;  %v380_v41 = vadd.f32 %v4001_v17, %v341_v32  ;;  %v3315_v46 = vunpack.c.l.bf16 %v3453_v34 }
  0x1f   : > { %3776 = vmatprep.subr.bf16.mxu1 %v3989_v12  ;;  %3611 = vmatprep.mubr.bf16.mxu1 %v4053_v55  ;;  %v432_v28 = vmax.f32 %v400_v10, 0.0  ;;  %v381_v42 = vadd.f32 %v4001_v17, %v342_v33  ;;  %v3316_v47 = vunpack.c.h.bf16 %v3453_v34  ;;  %v364_v50 = vmul.f32 %v3356_v31, %v3995_v14  ;;  %v3824_v34 = vld [vmem:[%s5619_s3 + $0x48] sm:$0xff]  }
  0x20   : > { %v412_v51 = vmax.f32 %v380_v41, 0.0  ;;  %v343_v63 = vmul.f32 %v3315_v46, %v3995_v14  ;;  %v3367_v18 = vunpack.c.l.bf16 %v3466_v62  ;;  %v3368_v19 = vunpack.c.h.bf16 %v3466_v62  ;;  %v3456_v41 = vld [vmem:[%s3976_s20 + $0x20] sm:$0xff]   ;;  %v3825_v46 = vld [vmem:[%s5619_s3 + $0xc8] sm:$0xff]  }
  0x21   : > { %816 = vmatpush1.bf16.msra.mxu0 %v3806_v11  ;;  %v401_v11 = vadd.f32 %v4001_v17, %v362_v0  ;;  %v413_v52 = vmax.f32 %v381_v42, 0.0  ;;  %v344_v0 = vmul.f32 %v3316_v47, %v3995_v14  ;;  %v403_v10 = vadd.f32 %v4001_v17, %v364_v50 }
  0x22   : > { %817 = vmatprep.subr.bf16.mxu0 %v5623_v1  ;;  %3784 = vmatpush3.bf16.msra.mxu1 %v3989_v12  ;;  %v382_v25 = vadd.f32 %v4001_v17, %v343_v63  ;;  %v369_v32 = vmul.f32 %v3367_v18, %v3995_v14  ;;  %v370_v33 = vmul.f32 %v3368_v19, %v3995_v14 }
  0x23   : > { %3777 = vmatprep.subr.bf16.mxu1 %v4012_v23  ;;  %v433_v30 = vmax.f32 %v401_v11, 0.0  ;;  %v4128_v57 = vpack.c.bf16 %v413_v52, %v412_v51  ;;  %v3363_v11 = vunpack.c.l.bf16 %v3465_v54  ;;  %v3327_v51 = vunpack.c.l.bf16 %v3456_v41  ;;  %v3826_v52 = vld [vmem:[%s5619_s3 + $0x40] sm:$0xff]  }
  0x24   : > { %v414_v42 = vmax.f32 %v382_v25, 0.0  ;;  %v409_v50 = vadd.f32 %v4001_v17, %v370_v33 }
  0x25   : > { %818 = vmatpush1.bf16.msra.mxu0 %v3808_v29  ;;  %v3355_v29 = vunpack.c.l.bf16 %v3463_v13  ;;  %v4117_v49 = vpack.c.bf16 %v433_v30, %v432_v28  ;;  %837 = vmatprep.mubr.bf16.mxu0 %v4128_v57  ;;  %v367_v30 = vmul.f32 %v3363_v11, %v3995_v14 }
  0x26   : > { %819 = vmatprep.subr.bf16.mxu0 %v5623_v1  ;;  %3785 = vmatpush3.bf16.msra.mxu1 %v4012_v23  ;;  %v441_v11 = vmax.f32 %v409_v50, 0.0 }
  0x27   : > { %3778 = vmatprep.subr.bf16.mxu1 %v4032_v38  ;;  %v363_v45 = vmul.f32 %v3355_v29, %v3995_v14  ;;  %5635 = vst [vmem:[#allocation2_spill] sm:$0xff] %v4117_v49  ;;  %v500_v56 = vunpack.c.h.b16 %v4117_v49  ;;  %v4145_v13 = vcombine.low %v5623_v1, %v4117_v49  ;;  %v435_v29 = vmax.f32 %v403_v10, 0.0 }
  0x29   : > { %820 = vmatpush1.bf16.msra.mxu0 %v3810_v44  ;;  %v366_v44 = vmul.f32 %v3360_v26, %v3995_v14  ;;  %v4151_v20 = vpack.c.b16 %v4037_v40, %v500_v56  ;;  %v383_v26 = vadd.f32 %v4001_v17, %v344_v0  ;;  %v3454_v0 = vld [vmem:[%s3976_s20 + $0x10] sm:$0xff]  }
  0x2a   : > { %821 = vmatprep.subr.bf16.mxu0 %v5623_v1  ;;  %3786 = vmatpush3.bf16.msra.mxu1 %v4032_v38 }
  0x2b   : > { %1447 = vmatprep.subr.bf16.mxu1 %v5623_v1  ;;  %v405_v61 = vadd.f32 %v4001_v17, %v366_v44 }
  0x2d   : > { %822 = vmatpush2.bf16.msra.mxu0 %v3812_v58  ;;  %3612 = vmatmul.mubr.bf16.vlgmr.msra.gmra.mxu1 %v4058_v59  ;;  %v404_v58 = vadd.f32 %v4001_v17, %v365_v43  ;;  %v437_v22 = vmax.f32 %v405_v61, 0.0  ;;  %v415_v43 = vmax.f32 %v383_v26, 0.0  ;;  %v3827_v61 = vld [vmem:[%s5619_s3 + $0xc0] sm:$0xff]   ;;  %v3320_v26 = vunpack.c.h.bf16 %v3454_v0 }
  0x2e   : > { %823 = vmatprep.subr.bf16.mxu0 %v5623_v1  ;;  %1448 = vmatpush1.bf16.msra.mxu1 %v3813_v3  ;;  %v3820_v3 = vld [vmem:[%s5619_s3 + $0x58] sm:$0xff]  }
  0x2f   : > { %3615 = vmatprep.mubr.bf16.mxu1 %v4077_v8  ;;  %1449 = vmatprep.subr.bf16.mxu1 %v5623_v1  ;;  %v436_v21 = vmax.f32 %v404_v58, 0.0  ;;  %v4195_v56 = vpack.c.bf16 %v415_v43, %v414_v42  ;;  %v3328_v58 = vunpack.c.h.bf16 %v3456_v41  ;;  %v3828_v41 = vld [vmem:[%s5619_s3 + $0x138] sm:$0xff]  }
  0x31   : > { %824 = vmatpush2.bf16.msra.mxu0 %v3814_v6  ;;  %v402_v6 = vadd.f32 %v4001_v17, %v363_v45  ;;  %v406_v45 = vadd.f32 %v4001_v17, %v367_v30  ;;  %v482_v42 = vunpack.c.h.b16 %v4195_v56 }
  0x32   : > { %825 = vmatprep.subr.bf16.mxu0 %v5623_v1  ;;  %1450 = vmatpush1.bf16.msra.mxu1 %v3815_v16  ;;  %v3364_v16 = vunpack.c.h.bf16 %v3465_v54  ;;  %v3457_v54 = vld [vmem:[%s3976_s20 + $0x28] sm:$0xff]  }
  0x33   : > { %1451 = vmatprep.subr.bf16.mxu1 %v5623_v1  ;;  %v434_v28 = vmax.f32 %v402_v6, 0.0  ;;  %v438_v63 = vmax.f32 %v406_v45, 0.0  ;;  %v3331_v19 = vunpack.c.l.bf16 %v3457_v54 }
  0x34   : > { %v368_v31 = vmul.f32 %v3364_v16, %v3995_v14  ;;  %v350_v16 = vmul.f32 %v3328_v58, %v3995_v14 }
  0x35   : > { %826 = vmatpush2.bf16.msra.mxu0 %v3816_v27  ;;  %3616 = vmatmul.mubr.bf16.gmra.mxu1 %v4101_v35  ;;  %v3823_v27 = vld [vmem:[%s5619_s3 + $0xd0] sm:$0xff]   ;;  %v4176_v44 = vpack.c.bf16 %v435_v29, %v434_v28  ;;  %v351_v29 = vmul.f32 %v3331_v19, %v3995_v14 }
  0x36   : > { %827 = vmatprep.subr.bf16.mxu0 %v5623_v1  ;;  %1452 = vmatpush1.bf16.msra.mxu1 %v3817_v37  ;;  %v4172_v37 = vpack.c.bf16 %v437_v22, %v436_v21  ;;  %v407_v47 = vadd.f32 %v4001_v17, %v368_v31  ;;  %v3332_v21 = vunpack.c.h.bf16 %v3457_v54  ;;  %v4212_v22 = vcombine.low %v5623_v1, %v4195_v56 }
  0x37   : > { %3619 = vmatprep.mubr.bf16.mxu1 %v4103_v36  ;;  %1453 = vmatprep.subr.bf16.mxu1 %v5623_v1  ;;  %v389_v25 = vadd.f32 %v4001_v17, %v350_v16  ;;  %v390_v45 = vadd.f32 %v4001_v17, %v351_v29 }
  0x38   : > { %5636 = vst [vmem:[#allocation3_spill] sm:$0xff] %v4172_v37  ;;  %v504_v62 = vunpack.c.h.b16 %v4172_v37  ;;  %v439_v6 = vmax.f32 %v407_v47, 0.0  ;;  %v352_v30 = vmul.f32 %v3332_v21, %v3995_v14 }
  0x39   : > { %828 = vmatpush2.bf16.msra.mxu0 %v3818_v48  ;;  %v408_v48 = vadd.f32 %v4001_v17, %v369_v32  ;;  %v421_v43 = vmax.f32 %v389_v25, 0.0  ;;  %v422_v58 = vmax.f32 %v390_v45, 0.0  ;;  %v3832_v45 = vld [vmem:[%s5619_s3 + $0x118] sm:$0xff]  }
  0x3a   : > { %829 = vmatprep.subr.bf16.mxu0 %v5623_v1  ;;  %1454 = vmatpush1.bf16.msra.mxu1 %v3819_v53  ;;  %v4191_v53 = vcombine.low %v5623_v1, %v4172_v37  ;;  %v4220_v31 = vpack.c.b16 %v4037_v40, %v504_v62  ;;  %v4222_v32 = vpack.c.bf16 %v439_v6, %v438_v63  ;;  %v3829_v62 = vld [vmem:[%s5619_s3 + $0x130] sm:$0xff]  }
  0x3b   : > { %1455 = vmatprep.subr.bf16.mxu1 %v5623_v1  ;;  %v440_v10 = vmax.f32 %v408_v48, 0.0  ;;  %v4254_v6 = vcombine.low %v5623_v1, %v4128_v57 }
  0x3d   : > { %830 = vmatpush2.bf16.msra.mxu0 %v3820_v3  ;;  %3620 = vmatmul.mubr.bf16.gmra.mxu1 %v4145_v13  ;;  %v349_v3 = vmul.f32 %v3327_v51, %v3995_v14  ;;  %v4232_v47 = vpack.c.bf16 %v441_v11, %v440_v10  ;;  %v4257_v10 = vpack.c.b16 %v4037_v40, %v482_v42  ;;  %v3830_v11 = vld [vmem:[%s5619_s3 + $0x128] sm:$0xff]  }
  0x3e   : > { %831 = vmatprep.subr.bf16.mxu0 %v5623_v1  ;;  %1456 = vmatpush1.bf16.msra.mxu1 %v3821_v15  ;;  %v3467_v15 = vld [vmem:[%s3976_s20 + $0x78] sm:$0xff]  }
  0x3f   : > { %3623 = vmatprep.mubr.bf16.mxu1 %v4151_v20  ;;  %1457 = vmatprep.subr.bf16.mxu1 %v5623_v1  ;;  %v388_v18 = vadd.f32 %v4001_v17, %v349_v3  ;;  %v3371_v33 = vunpack.c.l.bf16 %v3467_v15  ;;  %5637 = vst [vmem:[#allocation4_spill] sm:$0xff] %v4232_v47  ;;  %v4269_v21 = vcombine.low %v5623_v1, %v4232_v47 }
  0x41   : > { %832 = vmatpush2.bf16.msra.mxu0 %v3822_v24  ;;  %v3319_v24 = vunpack.c.l.bf16 %v3454_v0  ;;  %v420_v28 = vmax.f32 %v388_v18, 0.0  ;;  %v371_v63 = vmul.f32 %v3371_v33, %v3995_v14 }
  0x42   : > { %833 = vmatprep.subr.bf16.mxu0 %v5623_v1  ;;  %1458 = vmatpush1.bf16.msra.mxu1 %v3823_v27  ;;  %v3455_v27 = vld [vmem:[%s3976_s20 + $0x18] sm:$0xff]  }
  0x43   : > { %1459 = vmatprep.subr.bf16.mxu1 %v5623_v1  ;;  %v345_v48 = vmul.f32 %v3319_v24, %v3995_v14  ;;  %v3323_v50 = vunpack.c.l.bf16 %v3455_v27  ;;  %v3324_v51 = vunpack.c.h.bf16 %v3455_v27  ;;  %v4238_v54 = vpack.c.bf16 %v421_v43, %v420_v28 }
  0x44   : > { %v410_v24 = vadd.f32 %v4001_v17, %v371_v63 }
  0x45   : > { %834 = vmatpush2.bf16.msra.mxu0 %v3824_v34  ;;  %3624 = vmatmul.mubr.bf16.gmra.mxu1 %v4176_v44  ;;  %v3372_v34 = vunpack.c.h.bf16 %v3467_v15  ;;  %v384_v15 = vadd.f32 %v4001_v17, %v345_v48  ;;  %v347_v18 = vmul.f32 %v3323_v50, %v3995_v14  ;;  %v348_v19 = vmul.f32 %v3324_v51, %v3995_v14  ;;  %v3833_v50 = vld [vmem:[%s5619_s3 + $0x110] sm:$0xff]  }
  0x46   : > { %835 = vmatprep.subr.bf16.mxu0 %v5623_v1  ;;  %1460 = vmatpush1.bf16.msra.mxu1 %v3825_v46  ;;  %v391_v46 = vadd.f32 %v4001_v17, %v352_v30  ;;  %v442_v30 = vmax.f32 %v410_v24, 0.0  ;;  %v480_v48 = vunpack.c.h.b16 %v5623_v1  ;;  %v4399_v24 = vcombine.low %v5623_v1, %v4238_v54 }
  0x47   : > { %3627 = vmatprep.mubr.bf16.mxu1 %v4191_v53  ;;  %1461 = vmatprep.subr.bf16.mxu1 %v5623_v1  ;;  %v372_v0 = vmul.f32 %v3372_v34, %v3995_v14  ;;  %v386_v28 = vadd.f32 %v4001_v17, %v347_v18  ;;  %v387_v29 = vadd.f32 %v4001_v17, %v348_v19  ;;  %v3831_v34 = vld [vmem:[%s5619_s3 + $0x120] sm:$0xff]   ;;  %v3841_v19 = vld [vmem:[%s5619_s3 + $0x190] sm:$0xff]  }
  0x49   : > { %836 = vmatpush2.bf16.msra.mxu0 %v3826_v52  ;;  %v346_v52 = vmul.f32 %v3320_v26, %v3995_v14  ;;  %v411_v25 = vadd.f32 %v4001_v17, %v372_v0  ;;  %v416_v14 = vmax.f32 %v384_v15, 0.0  ;;  %v419_v42 = vmax.f32 %v387_v29, 0.0  ;;  %v3844_v29 = vld [vmem:[%s5619_s3 + $0x1f8] sm:$0xff]  }
  0x4a   : > { %3579 = vmatprep.subr.bf16.mxu0 %v3927_v2  ;;  %1462 = vmatpush1.bf16.msra.mxu1 %v3827_v61  ;;  %v423_v61 = vmax.f32 %v391_v46, 0.0  ;;  %v4305_v46 = vcombine.low %v5623_v1, %v5623_v1 }
  0x4b   : > { %1463 = vmatprep.subr.bf16.mxu1 %v5623_v1  ;;  %v385_v16 = vadd.f32 %v4001_v17, %v346_v52  ;;  %v443_v33 = vmax.f32 %v411_v25, 0.0  ;;  %v3834_v52 = vld [vmem:[%s5619_s3 + $0x108] sm:$0xff]  }
  0x4c   : > { %838 = vmatmul.mubr.bf16.vlgmr.msra.gmra.mxu0 %v5623_v1  ;;  %v4249_v3 = vpack.c.bf16 %v423_v61, %v422_v58 }
  0x4d   : > { %3580 = vmatpush3.bf16.msra.mxu0 %v3927_v2  ;;  %845 = vmatprep.mubr.bf16.mxu0 %v4212_v22  ;;  %v508_v2 = vunpack.c.h.b16 %v4232_v47  ;;  %v417_v27 = vmax.f32 %v385_v16, 0.0  ;;  %v4297_v43 = vpack.c.bf16 %v443_v33, %v442_v30  ;;  %v3840_v16 = vld [vmem:[%s5619_s3 + $0x198] sm:$0xff]   ;;  %v3845_v33 = vld [vmem:[%s5619_s3 + $0x1f0] sm:$0xff]  }
  0x4e   : > { %3628 = vmatmul.mubr.bf16.gmra.mxu1 %v4220_v31  ;;  %3581 = vmatprep.subr.bf16.mxu0 %v3937_v4  ;;  %v4383_v15 = vcombine.low %v5623_v1, %v4249_v3  ;;  %v490_v18 = vunpack.c.h.b16 %v4249_v3  ;;  %v4427_v30 = vld [vmem:[%s5619_s3 + $0x178] sm:$0xff]  }
  0x4f   : > { %1464 = vmatpush2.bf16.msra.mxu1 %v3828_v41  ;;  %3631 = vmatprep.mubr.bf16.mxu1 %v4222_v32  ;;  %v4275_v26 = vpack.c.b16 %v4037_v40, %v508_v2  ;;  %v4294_v17 = vpack.c.bf16 %v417_v27, %v416_v14  ;;  %v3838_v2 = vld [vmem:[%s5619_s3 + $0x1a8] sm:$0xff]   ;;  %v488_v14 = vunpack.c.h.b16 %v4238_v54  ;;  %v3843_v27 = vld [vmem:[%s5619_s3 + $0x180] sm:$0xff]  }
  0x50   : > { %1465 = vmatprep.subr.bf16.mxu1 %v5623_v1  ;;  %v4403_v25 = vpack.c.b16 %v4037_v40, %v490_v18 }
  0x51   : > { %3582 = vmatpush3.bf16.msra.mxu0 %v3937_v4  ;;  %v481_v4 = vunpack.c.h.b16 %v4128_v57  ;;  %v4347_v61 = vcombine.low %v5623_v1, %v4294_v17  ;;  %v484_v63 = vunpack.c.h.b16 %v4294_v17 }
  0x52   : > { %3583 = vmatprep.subr.bf16.mxu0 %v3944_v5 }
  0x53   : > { %1466 = vmatpush2.bf16.msra.mxu1 %v3829_v62  ;;  %v4292_v41 = vpack.c.b16 %v4037_v40, %v481_v4  ;;  %v4366_v0 = vpack.c.b16 %v4037_v40, %v484_v63  ;;  %v3842_v4 = vld [vmem:[%s5619_s3 + $0x188] sm:$0xff]   ;;  %v4489_v63 = vcombine.low %v5623_v1, %v4103_v36 }
  0x54   : > { %846 = vmatmul.mubr.bf16.gmra.mxu0 %v4254_v6  ;;  %1467 = vmatprep.subr.bf16.mxu1 %v5623_v1 }
  0x55   : > { %853 = vmatprep.mubr.bf16.mxu0 %v4257_v10  ;;  %3584 = vmatpush3.bf16.msra.mxu0 %v3944_v5  ;;  %v418_v5 = vmax.f32 %v386_v28, 0.0  ;;  %v4418_v28 = vpack.c.b16 %v4037_v40, %v488_v14  ;;  %5638 = vst [vmem:[#allocation5_spill] sm:$0xff] %v4489_v63 }
  0x56   : > { %3632 = vmatmul.mubr.bf16.gmra.mxu1 %v4269_v21  ;;  %3585 = vmatprep.subr.bf16.mxu0 %v3957_v7 }
  0x57   : > { %1468 = vmatpush2.bf16.msra.mxu1 %v3830_v11  ;;  %3635 = vmatprep.mubr.bf16.mxu1 %v4275_v26  ;;  %v3839_v11 = vld [vmem:[%s5619_s3 + $0x1a0] sm:$0xff]  }
  0x58   : > { %1469 = vmatprep.subr.bf16.mxu1 %v5623_v1 }
  0x59   : > { %3586 = vmatpush3.bf16.msra.mxu0 %v3957_v7  ;;  %v4310_v7 = vpack.c.bf16 %v419_v42, %v418_v5  ;;  %v3846_v5 = vld [vmem:[%s5619_s3 + $0x1e8] sm:$0xff]   ;;  %v494_v42 = vunpack.c.h.b16 %v4058_v59 }
  0x5a   : > { %3587 = vmatprep.subr.bf16.mxu0 %v3969_v9 }
  0x5b   : > { %1470 = vmatpush2.bf16.msra.mxu1 %v3831_v34  ;;  %v4323_v51 = vcombine.low %v5623_v1, %v4310_v7  ;;  %v486_v58 = vunpack.c.h.b16 %v4310_v7  ;;  %v4441_v34 = vcombine.low %v5623_v1, %v4058_v59 }
  0x5c   : > { %854 = vmatmul.mubr.bf16.gmra.mxu0 %v4292_v41  ;;  %1471 = vmatprep.subr.bf16.mxu1 %v5623_v1 }
  0x5d   : > { %861 = vmatprep.mubr.bf16.mxu0 %v4294_v17  ;;  %3588 = vmatpush3.bf16.msra.mxu0 %v3969_v9  ;;  %v4327_v9 = vpack.c.b16 %v4037_v40, %v480_v48  ;;  %v4350_v62 = vpack.c.b16 %v4037_v40, %v486_v58  ;;  %v4457_v48 = vcombine.low %v5623_v1, %v4034_v39  ;;  %v3850_v58 = vld [vmem:[%s5619_s3 + $0x1d0] sm:$0xff]  }
  0x5e   : > { %3636 = vmatmul.mubr.bf16.gmra.mxu1 %v4297_v43  ;;  %3589 = vmatprep.subr.bf16.mxu0 %v3989_v12 }
  0x5f   : > { %1472 = vmatpush2.bf16.msra.mxu1 %v3832_v45  ;;  %3639 = vmatprep.mubr.bf16.mxu1 %v4305_v46  ;;  %v3847_v45 = vld [vmem:[%s5619_s3 + $0x1e0] sm:$0xff]  }
  0x60   : > { %1473 = vmatprep.subr.bf16.mxu1 %v5623_v1 }
  0x61   : > { %3590 = vmatpush3.bf16.msra.mxu0 %v3989_v12  ;;  %v3835_v12 = vld [vmem:[%s5619_s3 + $0x100] sm:$0xff]  }
  0x62   : > { %3591 = vmatprep.subr.bf16.mxu0 %v4012_v23 }
  0x63   : > { %1474 = vmatpush2.bf16.msra.mxu1 %v3833_v50  ;;  %v4461_v50 = vpack.c.b16 %v4037_v40, %v494_v42 }
  0x64   : > { %862 = vmatmul.mubr.bf16.gmra.mxu0 %v4195_v56  ;;  %1475 = vmatprep.subr.bf16.mxu1 %v5623_v1 }
  0x65   : > { %869 = vmatprep.mubr.bf16.mxu0 %v4323_v51  ;;  %3592 = vmatpush3.bf16.msra.mxu0 %v4012_v23  ;;  %v3836_v23 = vld [vmem:[%s5619_s3 + $0x1b8] sm:$0xff]  }
  0x66   : > { %3640 = vmatmul.mubr.bf16.gmra.mxu1 %v4327_v9  ;;  %3593 = vmatprep.subr.bf16.mxu0 %v4032_v38 }
  0x67   : > { %1476 = vmatpush2.bf16.msra.mxu1 %v3834_v52  ;;  %1479 = vmatprep.mubr.bf16.mxu1 %v4128_v57  ;;  %v3848_v52 = vld [vmem:[%s5619_s3 + $0x1d8] sm:$0xff]  }
  0x68   : > { %1477 = vmatprep.subr.bf16.mxu1 %v5623_v1 }
  0x69   : > { %3594 = vmatpush3.bf16.msra.mxu0 %v4032_v38  ;;  %v3837_v38 = vld [vmem:[%s5619_s3 + $0x1b0] sm:$0xff]  }
  0x6a   : > { %3643 = vmatprep.subr.bf16.mxu0 %v4427_v30 }
  0x6b   : > { %1478 = vmatpush2.bf16.msra.mxu1 %v3835_v12  ;;  %v3854_v12 = vld [vmem:[%s5619_s3 + $0x1c8] sm:$0xff]  }
  0x6c   : > { %870 = vmatmul.mubr.bf16.gmra.mxu0 %v4347_v61  ;;  %2057 = vmatprep.subr.bf16.mxu1 %v5623_v1 }
  0x6d   : > { %877 = vmatprep.mubr.bf16.mxu0 %v4350_v62 }
  0x6e   : > { %1480 = vmatmul.mubr.bf16.vlgmr.msra.gmra.mxu1 %v5623_v1 }
  0x6f   : > { %2058 = vmatpush1.bf16.msra.mxu1 %v3836_v23  ;;  %1487 = vmatprep.mubr.bf16.mxu1 %v4212_v22  ;;  %v3858_v23 = vld [vmem:[%s5619_s3 + $0x1c0] sm:$0xff]  }
  0x70   : > { %2059 = vmatprep.subr.bf16.mxu1 %v5623_v1 }
  0x73   : > { %2060 = vmatpush1.bf16.msra.mxu1 %v3837_v38  ;;  %v498_v38 = vunpack.c.h.b16 %v4103_v36 }
  0x74   : > { %878 = vmatmul.mubr.bf16.gmra.mxu0 %v4366_v0  ;;  %2061 = vmatprep.subr.bf16.mxu1 %v5623_v1 }
  0x75   : > { %885 = vmatprep.mubr.bf16.mxu0 %v4238_v54 }
  0x76   : > { %1488 = vmatmul.mubr.bf16.gmra.mxu1 %v4254_v6 }
  0x77   : > { %1494 = vmatprep.mubr.bf16.mxu1 %v4257_v10  ;;  %2062 = vmatpush1.bf16.msra.mxu1 %v3838_v2  ;;  %v4497_v2 = vpack.c.b16 %v4037_v40, %v498_v38 }
  0x78   : > { %2063 = vmatprep.subr.bf16.mxu1 %v5623_v1 }
  0x79   : > { %5639 = vst [vmem:[#allocation6_spill] sm:$0xff] %v4497_v2 }
  0x7b   : > { %2064 = vmatpush1.bf16.msra.mxu1 %v3839_v11  ;;  %v4509_v11 = vcombine.low %v5623_v1, %v4176_v44 }
  0x7c   : > { %886 = vmatmul.mubr.bf16.gmra.mxu0 %v4310_v7  ;;  %2065 = vmatprep.subr.bf16.mxu1 %v5623_v1 }
  0x7d   : > { %893 = vmatprep.mubr.bf16.mxu0 %v4383_v15  ;;  %5640 = vst [vmem:[#allocation7_spill] sm:$0xff] %v4509_v11 }
  0x7e   : > { %1495 = vmatmul.mubr.bf16.gmra.mxu1 %v4292_v41 }
  0x7f   : > { %1501 = vmatprep.mubr.bf16.mxu1 %v4294_v17  ;;  %2066 = vmatpush1.bf16.msra.mxu1 %v3840_v16  ;;  %v502_v16 = vunpack.c.h.b16 %v4176_v44 }
  0x80   : > { %2067 = vmatprep.subr.bf16.mxu1 %v5623_v1 }
  0x81   : > { %v4517_v18 = vpack.c.b16 %v4037_v40, %v502_v16 }
  0x83   : > { %2068 = vmatpush1.bf16.msra.mxu1 %v3841_v19  ;;  %5641 = vst [vmem:[#allocation8_spill] sm:$0xff] %v4517_v18  ;;  %v4529_v19 = vcombine.low %v5623_v1, %v4222_v32 }
  0x84   : > { %894 = vmatmul.mubr.bf16.gmra.mxu0 %v4399_v24  ;;  %2069 = vmatprep.subr.bf16.mxu1 %v5623_v1 }
  0x85   : > { %901 = vmatprep.mubr.bf16.mxu0 %v4403_v25  ;;  %5642 = vst [vmem:[#allocation9_spill] sm:$0xff] %v4529_v19 }
  0x86   : > { %1502 = vmatmul.mubr.bf16.gmra.mxu1 %v4195_v56 }
  0x87   : > { %1509 = vmatprep.mubr.bf16.mxu1 %v4323_v51  ;;  %2070 = vmatpush1.bf16.msra.mxu1 %v3842_v4  ;;  %v506_v4 = vunpack.c.h.b16 %v4222_v32 }
  0x88   : > { %2071 = vmatprep.subr.bf16.mxu1 %v5623_v1 }
  0x89   : > { %v4537_v14 = vpack.c.b16 %v4037_v40, %v506_v4 }
  0x8b   : > { %2072 = vmatpush1.bf16.msra.mxu1 %v3843_v27  ;;  %5643 = vst [vmem:[#allocation10_spill] sm:$0xff] %v4537_v14 }
  0x8c   : > { %902 = vmatmul.mubr.bf16.gmra.mxu0 %v4418_v28  ;;  %2073 = vmatprep.subr.bf16.mxu1 %v5623_v1 }
  0x8d   : > { %909 = vmatprep.mubr.bf16.mxu0 %v4034_v39 }
  0x8e   : > { %1510 = vmatmul.mubr.bf16.gmra.mxu1 %v4347_v61 }
  0x8f   : > { %1516 = vmatprep.mubr.bf16.mxu1 %v4350_v62  ;;  %2074 = vmatpush2.bf16.msra.mxu1 %v3844_v29 }
  0x90   : > { %2075 = vmatprep.subr.bf16.mxu1 %v5623_v1 }
  0x93   : > { %2076 = vmatpush2.bf16.msra.mxu1 %v3845_v33  ;;  %v4553_v33 = vcombine.low %v5623_v1, %v4297_v43 }
  0x94   : > { %910 = vmatmul.mubr.bf16.gmra.mxu0 %v4249_v3  ;;  %2077 = vmatprep.subr.bf16.mxu1 %v5623_v1 }
  0x95   : > { %917 = vmatprep.mubr.bf16.mxu0 %v4441_v34  ;;  %5645 = vst [vmem:[#allocation12_spill] sm:$0xff] %v4553_v33 }
  0x96   : > { %1517 = vmatmul.mubr.bf16.gmra.mxu1 %v4366_v0 }
  0x97   : > { %1523 = vmatprep.mubr.bf16.mxu1 %v4238_v54  ;;  %2078 = vmatpush2.bf16.msra.mxu1 %v3846_v5 }
  0x98   : > { %2079 = vmatprep.subr.bf16.mxu1 %v5623_v1 }
  0x9b   : > { %2080 = vmatpush2.bf16.msra.mxu1 %v3847_v45  ;;  %v510_v45 = vunpack.c.h.b16 %v4297_v43 }
  0x9c   : > { %918 = vmatmul.mubr.bf16.gmra.mxu0 %v4457_v48  ;;  %2081 = vmatprep.subr.bf16.mxu1 %v5623_v1 }
  0x9d   : > { %925 = vmatprep.mubr.bf16.mxu0 %v4461_v50 }
  0x9e   : > { %1524 = vmatmul.mubr.bf16.gmra.mxu1 %v4310_v7 }
  0x9f   : > { %1531 = vmatprep.mubr.bf16.mxu1 %v4383_v15  ;;  %2082 = vmatpush2.bf16.msra.mxu1 %v3848_v52 }
  0xa0   : > { %2083 = vmatprep.subr.bf16.mxu1 %v5623_v1 }
  0xa3   : > { %2084 = vmatpush2.bf16.msra.mxu1 %v3850_v58 }
  0xa4   : > { %926 = vmatmul.mubr.bf16.gmra.mxu0 %v4053_v55  ;;  %2085 = vmatprep.subr.bf16.mxu1 %v5623_v1 }
  0xa5   : > { %933 = vmatprep.mubr.bf16.mxu0 %v4060_v60 }
  0xa6   : > { %1532 = vmatmul.mubr.bf16.gmra.mxu1 %v4399_v24 }
  0xa7   : > { %1538 = vmatprep.mubr.bf16.mxu1 %v4403_v25  ;;  %2086 = vmatpush2.bf16.msra.mxu1 %v3854_v12  ;;  %v4569_v12 = vpack.c.b16 %v4037_v40, %v510_v45 }
  0xa8   : > { %2087 = vmatprep.subr.bf16.mxu1 %v5623_v1 }
  0xa9   : > { %5647 = vst [vmem:[#allocation14_spill] sm:$0xff] %v4569_v12 }
  0xab   : > { %2088 = vmatpush2.bf16.msra.mxu1 %v3858_v23 }
  0xac   : > { %934 = vmatmul.mubr.bf16.gmra.mxu0 %v4058_v59 }
  0xad   : > { %941 = vmatprep.mubr.bf16.mxu0 %v4489_v63 }
  0xae   : > { %1539 = vmatmul.mubr.bf16.gmra.mxu1 %v4418_v28 }
  0xaf   : > { %1545 = vmatprep.mubr.bf16.mxu1 %v4034_v39 }
  0xb4   : > { %942 = vmatmul.mubr.bf16.gmra.mxu0 %v4077_v8 }
  0xb5   : > { %949 = vmatprep.mubr.bf16.mxu0 %v4497_v2 }
  0xb6   : > { %1546 = vmatmul.mubr.bf16.gmra.mxu1 %v4249_v3 }
  0xb7   : > { %1553 = vmatprep.mubr.bf16.mxu1 %v4441_v34 }
  0xbc   : > { %950 = vmatmul.mubr.bf16.gmra.mxu0 %v4101_v35 }
  0xbd   : > { %957 = vmatprep.mubr.bf16.mxu0 %v4117_v49 }
  0xbe   : > { %1554 = vmatmul.mubr.bf16.gmra.mxu1 %v4457_v48 }
  0xbf   : > { %1560 = vmatprep.mubr.bf16.mxu1 %v4461_v50 }
  0xc4   : > { %958 = vmatmul.mubr.bf16.gmra.mxu0 %v4103_v36 }
  0xc5   : > { %965 = vmatprep.mubr.bf16.mxu0 %v4509_v11 }
  0xc6   : > { %1561 = vmatmul.mubr.bf16.gmra.mxu1 %v4053_v55 }
  0xc7   : > { %1567 = vmatprep.mubr.bf16.mxu1 %v4060_v60 }
  0xcc   : > { %966 = vmatmul.mubr.bf16.gmra.mxu0 %v4145_v13 }
  0xcd   : > { %973 = vmatprep.mubr.bf16.mxu0 %v4517_v18 }
  0xce   : > { %1568 = vmatmul.mubr.bf16.gmra.mxu1 %v4058_v59 }
  0xcf   : > { %1575 = vmatprep.mubr.bf16.mxu1 %v4489_v63 }
  0xd4   : > { %974 = vmatmul.mubr.bf16.gmra.mxu0 %v4151_v20 }
  0xd5   : > { %981 = vmatprep.mubr.bf16.mxu0 %v4172_v37 }
  0xd6   : > { %1576 = vmatmul.mubr.bf16.gmra.mxu1 %v4077_v8 }
  0xd7   : > { %1582 = vmatprep.mubr.bf16.mxu1 %v4497_v2 }
  0xdc   : > { %982 = vmatmul.mubr.bf16.gmra.mxu0 %v4176_v44 }
  0xdd   : > { %989 = vmatprep.mubr.bf16.mxu0 %v4529_v19 }
  0xde   : > { %1583 = vmatmul.mubr.bf16.gmra.mxu1 %v4101_v35 }
  0xdf   : > { %1589 = vmatprep.mubr.bf16.mxu1 %v4117_v49  ;;  %v3852_v49 = vld [vmem:[%s5619_s3 + $0x168] sm:$0xff]  }
  0xe4   : > { %990 = vmatmul.mubr.bf16.gmra.mxu0 %v4191_v53 }
  0xe5   : > { %997 = vmatprep.mubr.bf16.mxu0 %v4537_v14 }
  0xe6   : > { %1590 = vmatmul.mubr.bf16.gmra.mxu1 %v4103_v36 }
  0xe7   : > { %1597 = vmatprep.mubr.bf16.mxu1 %v4509_v11 }
  0xec   : > { %998 = vmatmul.mubr.bf16.gmra.mxu0 %v4220_v31 }
  0xed   : > { %1005 = vmatprep.mubr.bf16.mxu0 %v4232_v47  ;;  %v4545_v27 = vpop.f32.mrf.mxu1 }
  0xee   : > { %1598 = vmatmul.mubr.bf16.gmra.mxu1 %v4145_v13 }
  0xef   : > { %1604 = vmatprep.mubr.bf16.mxu1 %v4517_v18  ;;  %v4549_v29 = vpop.f32.mrf.mxu1 }
  0xf0   : > { %5644 = vst [vmem:[#allocation11_spill] sm:$0xff] %v4549_v29 }
  0xf1   : > { %v4555_v5 = vpop.f32.mrf.mxu1 }
  0xf3   : > { %v4557_v42 = vpop.f32.mrf.mxu1 }
  0xf4   : > { %5646 = vst [vmem:[#allocation13_spill] sm:$0xff] %v4557_v42  ;;  %1006 = vmatmul.mubr.bf16.gmra.mxu0 %v4222_v32 }
  0xf5   : > { %1013 = vmatprep.mubr.bf16.mxu0 %v4553_v33  ;;  %v4562_v52 = vpop.f32.mrf.mxu1 }
  0xf6   : > { %1605 = vmatmul.mubr.bf16.gmra.mxu1 %v4151_v20 }
  0xf7   : > { %1611 = vmatprep.mubr.bf16.mxu1 %v4172_v37  ;;  %v4566_v58 = vpop.f32.mrf.mxu1 }
  0xf9   : > { %v4571_v23 = vpop.f32.mrf.mxu1 }
  0xfb   : > { %v4573_v38 = vpop.f32.mrf.mxu1 }
  0xfc   : > { %1014 = vmatmul.mubr.bf16.gmra.mxu0 %v4269_v21 }
  0xfd   : > { %1021 = vmatprep.mubr.bf16.mxu0 %v4569_v12  ;;  %v4577_v16 = vpop.f32.mrf.mxu1 }
  0xfe   : > { %1612 = vmatmul.mubr.bf16.gmra.mxu1 %v4176_v44 }
  0xff   : > { %1619 = vmatprep.mubr.bf16.mxu1 %v4529_v19  ;;  %v4581_v4 = vpop.f32.mrf.mxu1  ;;  %v3851_v19 = vld [vmem:[%s5619_s3 + $0x170] sm:$0xff]  }
 0x101   : > { %v4583_v1 = vpop.f32.mrf.mxu1 }
 0x103   : > { %v4585_v40 = vpop.f32.mrf.mxu1 }
 0x104   : > { %1022 = vmatmul.mubr.bf16.gmra.mxu0 %v4275_v26 }
 0x105   : > { %3595 = vmatprep.mubr.bf16.mxu0 %v4195_v56  ;;  %v4589_v45 = vpop.f32.mrf.mxu1 }
 0x106   : > { %1620 = vmatmul.mubr.bf16.gmra.mxu1 %v4191_v53 }
 0x107   : > { %1626 = vmatprep.mubr.bf16.mxu1 %v4537_v14  ;;  %v4593_v42 = vpop.f32.mrf.mxu1 }
 0x109   : > { %v4595_v29 = vpop.f32.mrf.mxu1 }
 0x10a   : > { %5648 = vst [vmem:[#allocation15_spill] sm:$0xff] %v4595_v29 }
 0x10b   : > { %v4600_v37 = vpop.f32.mrf.mxu1 }
 0x10c   : > { %v4602_v18 = vpop.f32.mrf.mxu0  ;;  %3596 = vmatmul.mubr.bf16.vlgmr.msra.gmra.mxu0 %v4347_v61 }
 0x10d   : > { %5649 = vst [vmem:[#allocation16_spill] sm:$0xff] %v4602_v18  ;;  %3644 = vmatpush3.bf16.msra.mxu0 %v4427_v30  ;;  %3599 = vmatprep.mubr.bf16.mxu0 %v4366_v0 }
 0x10e   : > { %v4607_v11 = vpop.f32.mrf.mxu1  ;;  %1627 = vmatmul.mubr.bf16.gmra.mxu1 %v4220_v31  ;;  %v841_v14 = vpop.f32.mrf.mxu0  ;;  %3645 = vmatprep.subr.bf16.mxu0 %v3851_v19 }
 0x10f   : > { %5650 = vst [vmem:[#allocation17_spill] sm:$0xff] %v4607_v11  ;;  %1633 = vmatprep.mubr.bf16.mxu1 %v4232_v47  ;;  %v3853_v14 = vld [vmem:[%s5619_s3 + $0x160] sm:$0xff]  }
 0x110   : > { %v4614_v2 = vpop.f32.mrf.mxu1  ;;  %v4616_v18 = vpop.f32.mrf.mxu0 }
 0x111   : > { %5651 = vst [vmem:[#allocation18_spill] sm:$0xff] %v4616_v18  ;;  %3646 = vmatpush3.bf16.msra.mxu0 %v3851_v19 }
 0x112   : > { %v4618_v30 = vpop.f32.mrf.mxu1  ;;  %v844_v63 = vpop.f32.mrf.mxu0  ;;  %3647 = vmatprep.subr.bf16.mxu0 %v3852_v49 }
 0x113   : > { %5652 = vst [vmem:[#allocation19_spill] sm:$0xff] %v4618_v30  ;;  %v3855_v63 = vld [vmem:[%s5619_s3 + $0x158] sm:$0xff]  }
 0x114   : > { %v4623_v11 = vpop.f32.mrf.mxu1  ;;  %v4625_v29 = vpop.f32.mrf.mxu0  ;;  %3600 = vmatmul.mubr.bf16.gmra.mxu0 %v4310_v7 }
 0x115   : > { %5653 = vst [vmem:[#allocation20_spill] sm:$0xff] %v4623_v11  ;;  %5654 = vst [vmem:[#allocation21_spill] sm:$0xff] %v4625_v29  ;;  %3648 = vmatpush3.bf16.msra.mxu0 %v3852_v49  ;;  %3603 = vmatprep.mubr.bf16.mxu0 %v4399_v24 }
 0x116   : > { %v4629_v47 = vpop.f32.mrf.mxu1  ;;  %1634 = vmatmul.mubr.bf16.gmra.mxu1 %v4222_v32  ;;  %v849_v19 = vpop.f32.mrf.mxu0  ;;  %3649 = vmatprep.subr.bf16.mxu0 %v3853_v14 }
 0x117   : > { %5655 = vst [vmem:[#allocation22_spill] sm:$0xff] %v4629_v47  ;;  %1641 = vmatprep.mubr.bf16.mxu1 %v4553_v33  ;;  %v3856_v19 = vld [vmem:[%s5619_s3 + $0x150] sm:$0xff]  }
 0x118   : > { %v4636_v18 = vpop.f32.mrf.mxu1  ;;  %v4638_v29 = vpop.f32.mrf.mxu0 }
 0x119   : > { %5656 = vst [vmem:[#allocation23_spill] sm:$0xff] %v4638_v29  ;;  %3650 = vmatpush3.bf16.msra.mxu0 %v3853_v14 }
 0x11a   : > { %v4640_v49 = vpop.f32.mrf.mxu1  ;;  %v852_v30 = vpop.f32.mrf.mxu0  ;;  %3651 = vmatprep.subr.bf16.mxu0 %v3855_v63 }
 0x11b   : > { %5657 = vst [vmem:[#allocation24_spill] sm:$0xff] %v4640_v49  ;;  %v3857_v30 = vld [vmem:[%s5619_s3 + $0x148] sm:$0xff]  }
 0x11c   : > { %v4645_v47 = vpop.f32.mrf.mxu1  ;;  %v4647_v11 = vpop.f32.mrf.mxu0  ;;  %3604 = vmatmul.mubr.bf16.gmra.mxu0 %v4418_v28 }
 0x11d   : > { %5658 = vst [vmem:[#allocation25_spill] sm:$0xff] %v4645_v47  ;;  %5659 = vst [vmem:[#allocation26_spill] sm:$0xff] %v4647_v11  ;;  %3652 = vmatpush3.bf16.msra.mxu0 %v3855_v63  ;;  %3607 = vmatprep.mubr.bf16.mxu0 %v4249_v3 }
 0x11e   : > { %v4651_v33 = vpop.f32.mrf.mxu1  ;;  %1642 = vmatmul.mubr.bf16.gmra.mxu1 %v4269_v21  ;;  %v857_v14 = vpop.f32.mrf.mxu0  ;;  %3653 = vmatprep.subr.bf16.mxu0 %v3856_v19 }
 0x11f   : > { %5660 = vst [vmem:[#allocation27_spill] sm:$0xff] %v4651_v33  ;;  %1648 = vmatprep.mubr.bf16.mxu1 %v4569_v12  ;;  %v3859_v14 = vld [vmem:[%s5619_s3 + $0x140] sm:$0xff]  }
 0x120   : > { %v4658_v29 = vpop.f32.mrf.mxu1  ;;  %v4660_v11 = vpop.f32.mrf.mxu0 }
 0x121   : > { %5661 = vst [vmem:[#allocation28_spill] sm:$0xff] %v4660_v11  ;;  %3654 = vmatpush3.bf16.msra.mxu0 %v3856_v19 }
 0x122   : > { %v4662_v63 = vpop.f32.mrf.mxu1  ;;  %v860_v49 = vpop.f32.mrf.mxu0  ;;  %3655 = vmatprep.subr.bf16.mxu0 %v3857_v30 }
 0x123   : > { %5662 = vst [vmem:[#allocation29_spill] sm:$0xff] %v4662_v63  ;;  %v3860_v49 = vld [vmem:[%s5619_s3 + $0x238] sm:$0xff]  }
 0x124   : > { %v4667_v33 = vpop.f32.mrf.mxu1  ;;  %v4669_v47 = vpop.f32.mrf.mxu0  ;;  %3608 = vmatmul.mubr.bf16.gmra.mxu0 %v4457_v48 }
 0x125   : > { %5663 = vst [vmem:[#allocation30_spill] sm:$0xff] %v4667_v33  ;;  %5664 = vst [vmem:[#allocation31_spill] sm:$0xff] %v4669_v47  ;;  %3656 = vmatpush3.bf16.msra.mxu0 %v3857_v30  ;;  %3659 = vmatprep.mubr.bf16.mxu0 %v4195_v56 }
 0x126   : > { %v4673_v12 = vpop.f32.mrf.mxu1  ;;  %1649 = vmatmul.mubr.bf16.gmra.mxu1 %v4275_v26  ;;  %v865_v19 = vpop.f32.mrf.mxu0  ;;  %3657 = vmatprep.subr.bf16.mxu0 %v3859_v14 }
 0x127   : > { %5665 = vst [vmem:[#allocation32_spill] sm:$0xff] %v4673_v12  ;;  %2089 = vmatprep.mubr.bf16.mxu1 %v4128_v57  ;;  %v3861_v19 = vld [vmem:[%s5619_s3 + $0x230] sm:$0xff]  }
 0x128   : > { %v4680_v11 = vpop.f32.mrf.mxu1  ;;  %v4682_v47 = vpop.f32.mrf.mxu0 }
 0x129   : > { %5666 = vst [vmem:[#allocation33_spill] sm:$0xff] %v4682_v47  ;;  %3658 = vmatpush3.bf16.msra.mxu0 %v3859_v14  ;;  %v5671_v14 = vmov 0  }
 0x12a   : > { %v4684_v30 = vpop.f32.mrf.mxu1  ;;  %v868_v63 = vpop.f32.mrf.mxu0  ;;  %3707 = vmatprep.subr.bf16.mxu0 %v3860_v49 }
 0x12b   : > { %5667 = vst [vmem:[#allocation34_spill] sm:$0xff] %v4684_v30  ;;  %v3862_v63 = vld [vmem:[%s5619_s3 + $0x228] sm:$0xff]  }
 0x12c   : > { %v4689_v12 = vpop.f32.mrf.mxu1  ;;  %v4691_v33 = vpop.f32.mrf.mxu0  ;;  %3660 = vmatmul.mubr.bf16.vlgmr.msra.gmra.mxu0 %v4347_v61 }
 0x12d   : > { %5668 = vst [vmem:[#allocation35_spill] sm:$0xff] %v4689_v12  ;;  %5669 = vst [vmem:[#allocation36_spill] sm:$0xff] %v4691_v33  ;;  %3708 = vmatpush3.bf16.msra.mxu0 %v3860_v49  ;;  %3663 = vmatprep.mubr.bf16.mxu0 %v4366_v0 }
 0x12e   : > { %v4695_v57 = vpop.f32.mrf.mxu1  ;;  %2090 = vmatmul.mubr.bf16.vlgmr.msra.gmra.mxu1 %v5671_v14  ;;  %v873_v47 = vpop.f32.mrf.mxu0  ;;  %3709 = vmatprep.subr.bf16.mxu0 %v3861_v19  ;;  %v3863_v14 = vld [vmem:[%s5619_s3 + $0x220] sm:$0xff]  }
 0x12f   : > { %5670 = vst [vmem:[#allocation37_spill] sm:$0xff] %v4695_v57  ;;  %2097 = vmatprep.mubr.bf16.mxu1 %v4212_v22 }
 0x130   : > { %v1483_v30 = vpop.f32.mrf.mxu1  ;;  %v4702_v12 = vpop.f32.mrf.mxu0 }
 0x131   : > { %5672 = vst [vmem:[#allocation38_spill] sm:$0xff] %v4702_v12  ;;  %3710 = vmatpush3.bf16.msra.mxu0 %v3861_v19  ;;  %v3864_v19 = vld [vmem:[%s5619_s3 + $0x218] sm:$0xff]  }
 0x132   : > { %v4704_v33 = vpop.f32.mrf.mxu1  ;;  %v876_v49 = vpop.f32.mrf.mxu0  ;;  %3711 = vmatprep.subr.bf16.mxu0 %v3862_v63 }
 0x133   : > { %5673 = vst [vmem:[#allocation39_spill] sm:$0xff] %v4704_v33 }
 0x134   : > { %v1486_v47 = vpop.f32.mrf.mxu1  ;;  %v4709_v57 = vpop.f32.mrf.mxu0  ;;  %3664 = vmatmul.mubr.bf16.gmra.mxu0 %v4310_v7 }
 0x135   : > { %3667 = vmatprep.mubr.bf16.mxu0 %v4399_v24  ;;  %3712 = vmatpush3.bf16.msra.mxu0 %v3862_v63 }
 0x136   : > { %v1489_v22 = vpop.f32.mrf.mxu1  ;;  %2098 = vmatmul.mubr.bf16.gmra.mxu1 %v4254_v6  ;;  %v881_v30 = vpop.f32.mrf.mxu0  ;;  %3713 = vmatprep.subr.bf16.mxu0 %v3863_v14  ;;  %v3865_v6 = vld [vmem:[%s5619_s3 + $0x210] sm:$0xff]  }
 0x137   : > { %2105 = vmatprep.mubr.bf16.mxu1 %v4257_v10 }
 0x138   : > { %v1490_v49 = vpop.f32.mrf.mxu1  ;;  %v4718_v47 = vpop.f32.mrf.mxu0 }
 0x139   : > { %3714 = vmatpush3.bf16.msra.mxu0 %v3863_v14 }
 0x13a   : > { %v4720_v33 = vpop.f32.mrf.mxu1  ;;  %v884_v12 = vpop.f32.mrf.mxu0  ;;  %3715 = vmatprep.subr.bf16.mxu0 %v3864_v19 }
 0x13b   : > { %5674 = vst [vmem:[#allocation40_spill] sm:$0xff] %v4720_v33  ;;  %v3866_v12 = vld [vmem:[%s5619_s3 + $0x208] sm:$0xff]  }
 0x13c   : > { %v1493_v63 = vpop.f32.mrf.mxu1  ;;  %v4725_v22 = vpop.f32.mrf.mxu0  ;;  %3668 = vmatmul.mubr.bf16.gmra.mxu0 %v4418_v28 }
 0x13d   : > { %5675 = vst [vmem:[#allocation41_spill] sm:$0xff] %v4725_v22  ;;  %3671 = vmatprep.mubr.bf16.mxu0 %v4249_v3  ;;  %3716 = vmatpush3.bf16.msra.mxu0 %v3864_v19  ;;  %v3867_v19 = vld [vmem:[%s5619_s3 + $0x200] sm:$0xff]  }
 0x13e   : > { %v4729_v10 = vpop.f32.mrf.mxu1  ;;  %2106 = vmatmul.mubr.bf16.gmra.mxu1 %v4292_v41  ;;  %v889_v14 = vpop.f32.mrf.mxu0  ;;  %3717 = vmatprep.subr.bf16.mxu0 %v3865_v6 }
 0x13f   : > { %5676 = vst [vmem:[#allocation42_spill] sm:$0xff] %v4729_v10  ;;  %2113 = vmatprep.mubr.bf16.mxu1 %v4294_v17 }
 0x140   : > { %v1498_v30 = vpop.f32.mrf.mxu1  ;;  %v4736_v49 = vpop.f32.mrf.mxu0 }
 0x141   : > { %5677 = vst [vmem:[#allocation43_spill] sm:$0xff] %v4736_v49  ;;  %3718 = vmatpush3.bf16.msra.mxu0 %v3865_v6 }
 0x142   : > { %v1499_v63 = vpop.f32.mrf.mxu1  ;;  %v892_v33 = vpop.f32.mrf.mxu0  ;;  %3719 = vmatprep.subr.bf16.mxu0 %v3866_v12 }
 0x144   : > { %v1500_v41 = vpop.f32.mrf.mxu1  ;;  %v4741_v14 = vpop.f32.mrf.mxu0  ;;  %3672 = vmatmul.mubr.bf16.gmra.mxu0 %v4457_v48 }
 0x145   : > { %5678 = vst [vmem:[#allocation44_spill] sm:$0xff] %v4741_v14  ;;  %3675 = vmatprep.mubr.bf16.mxu0 %v4053_v55  ;;  %3720 = vmatpush3.bf16.msra.mxu0 %v3866_v12 }
 0x146   : > { %v4745_v17 = vpop.f32.mrf.mxu1  ;;  %2114 = vmatmul.mubr.bf16.gmra.mxu1 %v4195_v56  ;;  %v897_v6 = vpop.f32.mrf.mxu0  ;;  %3721 = vmatprep.subr.bf16.mxu0 %v3867_v19 }
 0x147   : > { %5679 = vst [vmem:[#allocation45_spill] sm:$0xff] %v4745_v17  ;;  %2121 = vmatprep.mubr.bf16.mxu1 %v4323_v51 }
 0x148   : > { %v1505_v33 = vpop.f32.mrf.mxu1  ;;  %v4749_v30 = vpop.f32.mrf.mxu0 }
 0x149   : > { %5680 = vst [vmem:[#allocation46_spill] sm:$0xff] %v4749_v30  ;;  %3722 = vmatpush3.bf16.msra.mxu0 %v3867_v19 }
 0x14a   : > { %v4751_v63 = vpop.f32.mrf.mxu1  ;;  %v900_v41 = vpop.f32.mrf.mxu0 }
 0x14b   : > { %5681 = vst [vmem:[#allocation47_spill] sm:$0xff] %v4751_v63  ;;  %v2555_v41 = vlaneseq }
 0x14c   : > { %v1508_v10 = vpop.f32.mrf.mxu1  ;;  %v4753_v49 = vpop.f32.mrf.mxu0  ;;  %3676 = vmatmul.mubr.bf16.gmra.mxu0 %v4058_v59 }
 0x14d   : > { %5682 = vst [vmem:[#allocation48_spill] sm:$0xff] %v4753_v49  ;;  %3679 = vmatprep.mubr.bf16.mxu0 %v4077_v8 }
 0x14e   : > { %v1511_v12 = vpop.f32.mrf.mxu1  ;;  %2122 = vmatmul.mubr.bf16.gmra.mxu1 %v4347_v61  ;;  %v905_v6 = vpop.f32.mrf.mxu0 }
 0x14f   : > { %2129 = vmatprep.mubr.bf16.mxu1 %v4350_v62  ;;  %v4768_v6 = vshrl.u32 %v2555_v41, 7 }
 0x150   : > { %v1512_v51 = vpop.f32.mrf.mxu1  ;;  %v4759_v33 = vpop.f32.mrf.mxu0 }
 0x151   : > { %5683 = vst [vmem:[#allocation49_spill] sm:$0xff] %v4759_v33  ;;  %vm2557_vm0 = vcmp.lt.s32.totalorder %v4768_v6, 1  ;;  %vm2670_vm1 = vcmp.lt.s32.totalorder %v4768_v6, 7 }
 0x152   : > { %v4761_v19 = vpop.f32.mrf.mxu1  ;;  %v908_v63 = vpop.f32.mrf.mxu0 }
 0x153   : > { %5684 = vst [vmem:[#allocation50_spill] sm:$0xff] %v4761_v19 }
 0x154   : > { %v1515_v10 = vpop.f32.mrf.mxu1  ;;  %v911_v17 = vpop.f32.mrf.mxu0  ;;  %3680 = vmatmul.mubr.bf16.gmra.mxu0 %v4101_v35 }
 0x155   : > { %3683 = vmatprep.mubr.bf16.mxu0 %v4103_v36  ;;  %v1137_v62 = vadd.f32 %v4545_v27, %v911_v17 }
 0x156   : > { %v4765_v30 = vpop.f32.mrf.mxu1  ;;  %2130 = vmatmul.mubr.bf16.gmra.mxu1 %v4366_v0  ;;  %v913_v12 = vpop.f32.mrf.mxu0 }
 0x157   : > { %5685 = vst [vmem:[#allocation51_spill] sm:$0xff] %v4765_v30  ;;  %2137 = vmatprep.mubr.bf16.mxu1 %v4238_v54  ;;  %v2513_v33 = vrot.slane %v1137_v62, 7 }
 0x158   : > { %v1520_v51 = vpop.f32.mrf.mxu1  ;;  %v914_v63 = vpop.f32.mrf.mxu0 }
 0x159   : > { %v1140_v10 = vadd.f32 %v4555_v5, %v914_v63 }
 0x15a   : > { %v1521_v19 = vpop.f32.mrf.mxu1  ;;  %v916_v22 = vpop.f32.mrf.mxu0 }
 0x15b   : > { %v2529_v49 = vrot.slane %v1140_v10, 7 }
 0x15c   : > { %v1522_v30 = vpop.f32.mrf.mxu1  ;;  %v919_v14 = vpop.f32.mrf.mxu0  ;;  %3684 = vmatmul.mubr.bf16.gmra.mxu0 %v4145_v13 }
 0x15d   : > { %v1145_v41 = vadd.f32 %v4566_v58, %v919_v14  ;;  %3687 = vmatprep.mubr.bf16.mxu0 %v4151_v20  ;;  %v4779_v54 = vsel %vm2557_vm0, %v2513_v33, %v2529_v49 }
 0x15e   : > { %v4781_v27 = vpop.f32.mrf.mxu1  ;;  %2138 = vmatmul.mubr.bf16.gmra.mxu1 %v4310_v7  ;;  %v921_v5 = vpop.f32.mrf.mxu0 }
 0x15f   : > { %v2545_v22 = vrot.slane %v1145_v41, 7  ;;  %2145 = vmatprep.mubr.bf16.mxu1 %v4383_v15 }
 0x160   : > { %v1527_v17 = vpop.f32.mrf.mxu1  ;;  %v922_v30 = vpop.f32.mrf.mxu0 }
 0x161   : > { %v4787_v19 = vsel %vm2557_vm0, %v2545_v22, %v2513_v33  ;;  %v1148_v49 = vadd.f32 %v4573_v38, %v922_v30 }
 0x162   : > { %v4789_v58 = vpop.f32.mrf.mxu1  ;;  %v924_v14 = vpop.f32.mrf.mxu0 }
 0x163   : > { %v2514_v10 = vrot.slane %v1148_v49, 7 }
 0x164   : > { %v1530_v12 = vpop.f32.mrf.mxu1  ;;  %v927_v62 = vpop.f32.mrf.mxu0  ;;  %3688 = vmatmul.mubr.bf16.gmra.mxu0 %v4176_v44 }
 0x165   : > { %v1153_v51 = vadd.f32 %v4562_v52, %v927_v62  ;;  %3691 = vmatprep.mubr.bf16.mxu0 %v4191_v53 }
 0x166   : > { %v1533_v15 = vpop.f32.mrf.mxu1  ;;  %2146 = vmatmul.mubr.bf16.gmra.mxu1 %v4399_v24  ;;  %v929_v63 = vpop.f32.mrf.mxu0 }
 0x167   : > { %v2530_v33 = vrot.slane %v1153_v51, 7  ;;  %2153 = vmatprep.mubr.bf16.mxu1 %v4403_v25 }
 0x168   : > { %v1534_v41 = vpop.f32.mrf.mxu1  ;;  %v930_v5 = vpop.f32.mrf.mxu0 }
 0x169   : > { %v1156_v38 = vadd.f32 %v4571_v23, %v930_v5  ;;  %v4800_v22 = vsel %vm2557_vm0, %v2514_v10, %v2530_v33 }
 0x16a   : > { %v4802_v17 = vpop.f32.mrf.mxu1  ;;  %v932_v52 = vpop.f32.mrf.mxu0 }
 0x16b   : > { %v2546_v30 = vrot.slane %v1156_v38, 7 }
 0x16c   : > { %v1537_v14 = vpop.f32.mrf.mxu1  ;;  %v935_v12 = vpop.f32.mrf.mxu0  ;;  %3692 = vmatmul.mubr.bf16.gmra.mxu0 %v4220_v31 }
 0x16d   : > { %3695 = vmatprep.mubr.bf16.mxu0 %v4222_v32  ;;  %v4808_v25 = vsel %vm2557_vm0, %v2546_v30, %v2514_v10  ;;  %v1161_v62 = vadd.f32 %v4581_v4, %v935_v12 }
 0x16e   : > { %v4810_v49 = vpop.f32.mrf.mxu1  ;;  %2154 = vmatmul.mubr.bf16.gmra.mxu1 %v4418_v28  ;;  %v937_v23 = vpop.f32.mrf.mxu0 }
 0x16f   : > { %2161 = vmatprep.mubr.bf16.mxu1 %v4034_v39  ;;  %v2515_v5 = vrot.slane %v1161_v62, 7 }
 0x170   : > { %v1542_v51 = vpop.f32.mrf.mxu1  ;;  %v938_v15 = vpop.f32.mrf.mxu0 }
 0x171   : > { %v1164_v63 = vadd.f32 %v4585_v40, %v938_v15 }
 0x172   : > { %v1543_v33 = vpop.f32.mrf.mxu1  ;;  %v940_v41 = vpop.f32.mrf.mxu0 }
 0x173   : > { %v2531_v38 = vrot.slane %v1164_v63, 7 }
 0x174   : > { %v1544_v52 = vpop.f32.mrf.mxu1  ;;  %v943_v10 = vpop.f32.mrf.mxu0  ;;  %3696 = vmatmul.mubr.bf16.gmra.mxu0 %v4269_v21 }
 0x175   : > { %v1169_v30 = vadd.f32 %v4577_v16, %v943_v10  ;;  %3699 = vmatprep.mubr.bf16.mxu0 %v4275_v26  ;;  %v4821_v4 = vsel %vm2557_vm0, %v2515_v5, %v2531_v38 }
 0x176   : > { %v4823_v39 = vpop.f32.mrf.mxu1  ;;  %2162 = vmatmul.mubr.bf16.gmra.mxu1 %v4249_v3  ;;  %v945_v40 = vpop.f32.mrf.mxu0 }
 0x177   : > { %v2547_v14 = vrot.slane %v1169_v30, 7  ;;  %2169 = vmatprep.mubr.bf16.mxu1 %v4441_v34 }
 0x178   : > { %v1549_v12 = vpop.f32.mrf.mxu1  ;;  %v946_v23 = vpop.f32.mrf.mxu0 }
 0x179   : > { %v4829_v62 = vsel %vm2557_vm0, %v2547_v14, %v2515_v5  ;;  %v1172_v15 = vadd.f32 %v4583_v1, %v946_v23 }
 0x17a   : > { %v4831_v16 = vpop.f32.mrf.mxu1  ;;  %v948_v51 = vpop.f32.mrf.mxu0 }
 0x17b   : > { %v2516_v52 = vrot.slane %v1172_v15, 7 }
 0x17c   : > { %v1552_v63 = vpop.f32.mrf.mxu1  ;;  %v951_v33 = vpop.f32.mrf.mxu0  ;;  %3700 = vmatmul.mubr.bf16.gmra.mxu0 %v4297_v43 }
 0x17d   : > { %v1177_v41 = vadd.f32 %v4593_v42, %v951_v33  ;;  %3703 = vmatprep.mubr.bf16.mxu0 %v4305_v46 }
 0x17e   : > { %v1555_v34 = vpop.f32.mrf.mxu1  ;;  %2170 = vmatmul.mubr.bf16.gmra.mxu1 %v4457_v48  ;;  %v953_v38 = vpop.f32.mrf.mxu0 }
 0x17f   : > { %v2532_v5 = vrot.slane %v1177_v41, 7  ;;  %2177 = vmatprep.mubr.bf16.mxu1 %v4461_v50  ;;  %v5686_v34 = vld [vmem:[#allocation15_spill] sm:$0xff] }
 0x180   : > { %v1556_v10 = vpop.f32.mrf.mxu1  ;;  %v954_v30 = vpop.f32.mrf.mxu0 }
 0x181   : > { %v1180_v1 = vadd.f32 %v4600_v37, %v954_v30  ;;  %v4842_v40 = vsel %vm2557_vm0, %v2516_v52, %v2532_v5 }
 0x182   : > { %v4844_v14 = vpop.f32.mrf.mxu1  ;;  %v956_v42 = vpop.f32.mrf.mxu0 }
 0x183   : > { %v2548_v12 = vrot.slane %v1180_v1, 7 }
 0x184   : > { %v1559_v23 = vpop.f32.mrf.mxu1  ;;  %v959_v51 = vpop.f32.mrf.mxu0  ;;  %3704 = vmatmul.mubr.bf16.gmra.mxu0 %v4327_v9 }
 0x185   : > { %3723 = vmatprep.mubr.bf16.mxu0 %v4195_v56  ;;  %v4850_v50 = vsel %vm2557_vm0, %v2548_v12, %v2516_v52  ;;  %v1185_v63 = vadd.f32 %v4589_v45, %v959_v51  ;;  %v5687_v51 = vld [vmem:[#allocation5_spill] sm:$0xff] }
 0x186   : > { %v4852_v15 = vpop.f32.mrf.mxu1  ;;  %2178 = vmatmul.mubr.bf16.gmra.mxu1 %v4053_v55  ;;  %v961_v37 = vpop.f32.mrf.mxu0 }
 0x187   : > { %2185 = vmatprep.mubr.bf16.mxu1 %v4060_v60  ;;  %v2517_v56 = vrot.slane %v1185_v63, 7 }
 0x188   : > { %v1564_v33 = vpop.f32.mrf.mxu1  ;;  %v962_v41 = vpop.f32.mrf.mxu0 }
 0x189   : > { %v1188_v38 = vadd.f32 %v5686_v34, %v962_v41  ;;  %v5688_v33 = vld [vmem:[#allocation20_spill] sm:$0xff] }
 0x18a   : > { %v1565_v5 = vpop.f32.mrf.mxu1  ;;  %v964_v10 = vpop.f32.mrf.mxu0 }
 0x18b   : > { %v2533_v30 = vrot.slane %v1188_v38, 7  ;;  %v5689_v5 = vld [vmem:[#allocation17_spill] sm:$0xff] }
 0x18c   : > { %v1566_v1 = vpop.f32.mrf.mxu1  ;;  %v967_v52 = vpop.f32.mrf.mxu0  ;;  %3724 = vmatmul.mubr.bf16.vlgmr.msra.gmra.mxu0 %v4347_v61 }
 0x18d   : > { %v1193_v42 = vadd.f32 %v4614_v2, %v967_v52  ;;  %3727 = vmatprep.mubr.bf16.mxu0 %v4366_v0  ;;  %v4863_v45 = vsel %vm2557_vm0, %v2517_v56, %v2533_v30 }
 0x18e   : > { %v4865_v60 = vpop.f32.mrf.mxu1  ;;  %2186 = vmatmul.mubr.bf16.gmra.mxu1 %v4058_v59  ;;  %v969_v12 = vpop.f32.mrf.mxu0 }
 0x18f   : > { %v2549_v23 = vrot.slane %v1193_v42, 7  ;;  %2193 = vmatprep.mubr.bf16.mxu1 %v5687_v51  ;;  %v5690_v42 = vld [vmem:[#allocation6_spill] sm:$0xff]  ;;  %v5691_v51 = vld [vmem:[#allocation19_spill] sm:$0xff] }
 0x190   : > { %v1571_v37 = vpop.f32.mrf.mxu1  ;;  %v970_v63 = vpop.f32.mrf.mxu0 }
 0x191   : > { %v4871_v61 = vsel %vm2557_vm0, %v2549_v23, %v2517_v56  ;;  %v1196_v41 = vadd.f32 %v5688_v33, %v970_v63 }
 0x192   : > { %v4873_v2 = vpop.f32.mrf.mxu1  ;;  %v972_v0 = vpop.f32.mrf.mxu0 }
 0x193   : > { %v2518_v52 = vrot.slane %v1196_v41, 7 }
 0x194   : > { %v1574_v34 = vpop.f32.mrf.mxu1  ;;  %v975_v38 = vpop.f32.mrf.mxu0  ;;  %3728 = vmatmul.mubr.bf16.gmra.mxu0 %v4310_v7 }
 0x195   : > { %v1201_v10 = vadd.f32 %v5689_v5, %v975_v38  ;;  %3731 = vmatprep.mubr.bf16.mxu0 %v4399_v24 }
 0x196   : > { %v1577_v30 = vpop.f32.mrf.mxu1  ;;  %2194 = vmatmul.mubr.bf16.gmra.mxu1 %v4077_v8  ;;  %v977_v1 = vpop.f32.mrf.mxu0 }
 0x197   : > { %v2534_v56 = vrot.slane %v1201_v10, 7  ;;  %2201 = vmatprep.mubr.bf16.mxu1 %v5690_v42  ;;  %v5692_v30 = vld [vmem:[#allocation2_spill] sm:$0xff]  ;;  %v5693_v42 = vld [vmem:[#allocation25_spill] sm:$0xff] }
 0x198   : > { %v1578_v12 = vpop.f32.mrf.mxu1  ;;  %v978_v23 = vpop.f32.mrf.mxu0 }
 0x199   : > { %v1204_v37 = vadd.f32 %v5691_v51, %v978_v23  ;;  %v4884_v63 = vsel %vm2557_vm0, %v2518_v52, %v2534_v56 }
 0x19a   : > { %v4886_v7 = vpop.f32.mrf.mxu1  ;;  %v980_v0 = vpop.f32.mrf.mxu0 }
 0x19b   : > { %v2550_v24 = vrot.slane %v1204_v37, 7  ;;  %v5694_v0 = vld [vmem:[#allocation22_spill] sm:$0xff] }
 0x19c   : > { %v1581_v33 = vpop.f32.mrf.mxu1  ;;  %v983_v34 = vpop.f32.mrf.mxu0  ;;  %3732 = vmatmul.mubr.bf16.gmra.mxu0 %v4418_v28 }
 0x19d   : > { %3735 = vmatprep.mubr.bf16.mxu0 %v4249_v3  ;;  %v4892_v41 = vsel %vm2557_vm0, %v2550_v24, %v2518_v52  ;;  %v1209_v10 = vadd.f32 %v4636_v18, %v983_v34 }
 0x19e   : > { %v4894_v38 = vpop.f32.mrf.mxu1  ;;  %2202 = vmatmul.mubr.bf16.gmra.mxu1 %v4101_v35  ;;  %v985_v5 = vpop.f32.mrf.mxu0 }
 0x19f   : > { %2209 = vmatprep.mubr.bf16.mxu1 %v5692_v30  ;;  %v2519_v3 = vrot.slane %v1209_v10, 7  ;;  %v5696_v10 = vld [vmem:[#allocation7_spill] sm:$0xff] }
 0x1a0   : > { %v1586_v1 = vpop.f32.mrf.mxu1  ;;  %v986_v56 = vpop.f32.mrf.mxu0 }
 0x1a1   : > { %v1212_v12 = vadd.f32 %v5693_v42, %v986_v56  ;;  %v5697_v42 = vld [vmem:[#allocation24_spill] sm:$0xff] }
 0x1a2   : > { %v1587_v28 = vpop.f32.mrf.mxu1  ;;  %v988_v23 = vpop.f32.mrf.mxu0 }
 0x1a3   : > { %v2535_v51 = vrot.slane %v1212_v12, 7 }
 0x1a4   : > { %v1588_v37 = vpop.f32.mrf.mxu1  ;;  %v991_v52 = vpop.f32.mrf.mxu0  ;;  %3736 = vmatmul.mubr.bf16.gmra.mxu0 %v4457_v48 }
 0x1a5   : > { %v1217_v24 = vadd.f32 %v5694_v0, %v991_v52  ;;  %3739 = vmatprep.mubr.bf16.mxu0 %v4053_v55  ;;  %v4905_v18 = vsel %vm2557_vm0, %v2519_v3, %v2535_v51 }
 0x1a6   : > { %5695 = vst [vmem:[#allocation15_spill] sm:$0xff] %v4905_v18  ;;  %v4907_v33 = vpop.f32.mrf.mxu1  ;;  %2210 = vmatmul.mubr.bf16.gmra.mxu1 %v4103_v36  ;;  %v993_v34 = vpop.f32.mrf.mxu0 }
 0x1a7   : > { %v2551_v5 = vrot.slane %v1217_v24, 7  ;;  %2217 = vmatprep.mubr.bf16.mxu1 %v5696_v10  ;;  %v5698_v24 = vld [vmem:[#allocation8_spill] sm:$0xff]  ;;  %v5699_v10 = vld [vmem:[#allocation30_spill] sm:$0xff] }
 0x1a8   : > { %v1593_v30 = vpop.f32.mrf.mxu1  ;;  %v994_v1 = vpop.f32.mrf.mxu0 }
 0x1a9   : > { %v4913_v48 = vsel %vm2557_vm0, %v2551_v5, %v2519_v3  ;;  %v1220_v12 = vadd.f32 %v5697_v42, %v994_v1 }
 0x1aa   : > { %v4915_v56 = vpop.f32.mrf.mxu1  ;;  %v996_v55 = vpop.f32.mrf.mxu0 }
 0x1ab   : > { %v2520_v0 = vrot.slane %v1220_v12, 7 }
 0x1ac   : > { %v1596_v28 = vpop.f32.mrf.mxu1  ;;  %v999_v23 = vpop.f32.mrf.mxu0  ;;  %3740 = vmatmul.mubr.bf16.gmra.mxu0 %v4058_v59 }
 0x1ad   : > { %v1225_v51 = vadd.f32 %v4658_v29, %v999_v23  ;;  %3743 = vmatprep.mubr.bf16.mxu0 %v4077_v8 }
 0x1ae   : > { %v1599_v37 = vpop.f32.mrf.mxu1  ;;  %2218 = vmatmul.mubr.bf16.gmra.mxu1 %v4145_v13  ;;  %v1001_v52 = vpop.f32.mrf.mxu0 }
 0x1af   : > { %v2536_v3 = vrot.slane %v1225_v51, 7  ;;  %2225 = vmatprep.mubr.bf16.mxu1 %v5698_v24  ;;  %v5701_v51 = vld [vmem:[#allocation27_spill] sm:$0xff] }
 0x1b0   : > { %v1600_v34 = vpop.f32.mrf.mxu1  ;;  %v1002_v5 = vpop.f32.mrf.mxu0  ;;  %v5702_v52 = vld [vmem:[#allocation3_spill] sm:$0xff] }
 0x1b1   : > { %v1228_v30 = vadd.f32 %v5699_v10, %v1002_v5  ;;  %v4926_v1 = vsel %vm2557_vm0, %v2520_v0, %v2536_v3  ;;  %v5703_v34 = vld [vmem:[#allocation29_spill] sm:$0xff] }
 0x1b2   : > { %5700 = vst [vmem:[#allocation5_spill] sm:$0xff] %v4926_v1  ;;  %v4928_v59 = vpop.f32.mrf.mxu1  ;;  %v1004_v29 = vpop.f32.mrf.mxu0 }
 0x1b3   : > { %v2552_v8 = vrot.slane %v1228_v30, 7 }
 0x1b4   : > { %v1603_v55 = vpop.f32.mrf.mxu1  ;;  %v1007_v42 = vpop.f32.mrf.mxu0  ;;  %3744 = vmatmul.mubr.bf16.gmra.mxu0 %v4101_v35 }
 0x1b5   : > { %3747 = vmatprep.mubr.bf16.mxu0 %v4103_v36  ;;  %v4934_v12 = vsel %vm2557_vm0, %v2552_v8, %v2520_v0  ;;  %v1233_v37 = vadd.f32 %v5701_v51, %v1007_v42 }
 0x1b6   : > { %v4936_v28 = vpop.f32.mrf.mxu1  ;;  %2226 = vmatmul.mubr.bf16.gmra.mxu1 %v4151_v20  ;;  %v1009_v23 = vpop.f32.mrf.mxu0 }
 0x1b7   : > { %2233 = vmatprep.mubr.bf16.mxu1 %v5702_v52  ;;  %v2521_v36 = vrot.slane %v1233_v37, 7  ;;  %v5705_v37 = vld [vmem:[#allocation9_spill] sm:$0xff] }
 0x1b8   : > { %v1608_v3 = vpop.f32.mrf.mxu1  ;;  %v1010_v24 = vpop.f32.mrf.mxu0 }
 0x1b9   : > { %v1236_v5 = vadd.f32 %v5703_v34, %v1010_v24  ;;  %v5708_v24 = vld [vmem:[#allocation35_spill] sm:$0xff] }
 0x1ba   : > { %v1609_v35 = vpop.f32.mrf.mxu1  ;;  %v1012_v10 = vpop.f32.mrf.mxu0 }
 0x1bb   : > { %v2537_v30 = vrot.slane %v1236_v5, 7  ;;  %v5709_v10 = vld [vmem:[#allocation32_spill] sm:$0xff] }
 0x1bc   : > { %v1610_v29 = vpop.f32.mrf.mxu1  ;;  %v1015_v0 = vpop.f32.mrf.mxu0  ;;  %3748 = vmatmul.mubr.bf16.gmra.mxu0 %v4145_v13 }
 0x1bd   : > { %v1241_v8 = vadd.f32 %v4680_v11, %v1015_v0  ;;  %3751 = vmatprep.mubr.bf16.mxu0 %v4151_v20  ;;  %v4947_v55 = vsel %vm2557_vm0, %v2521_v36, %v2537_v30 }
 0x1be   : > { %5704 = vst [vmem:[#allocation20_spill] sm:$0xff] %v4947_v55  ;;  %v4949_v42 = vpop.f32.mrf.mxu1  ;;  %2234 = vmatmul.mubr.bf16.gmra.mxu1 %v4176_v44  ;;  %v1017_v23 = vpop.f32.mrf.mxu0  ;;  %v5724_v55 = vld [vmem:[#allocation33_spill] sm:$0xff] }
 0x1bf   : > { %v2553_v51 = vrot.slane %v1241_v8, 7  ;;  %2241 = vmatprep.mubr.bf16.mxu1 %v5705_v37  ;;  %v5710_v23 = vld [vmem:[#allocation10_spill] sm:$0xff] }
 0x1c0   : > { %v1615_v52 = vpop.f32.mrf.mxu1  ;;  %v1018_v3 = vpop.f32.mrf.mxu0 }
 0x1c1   : > { %v4955_v13 = vsel %vm2557_vm0, %v2553_v51, %v2521_v36  ;;  %v1244_v34 = vadd.f32 %v5708_v24, %v1018_v3  ;;  %v5711_v52 = vld [vmem:[#allocation34_spill] sm:$0xff] }
 0x1c2   : > { %5706 = vst [vmem:[#allocation17_spill] sm:$0xff] %v4955_v13  ;;  %v4957_v11 = vpop.f32.mrf.mxu1  ;;  %v1020_v20 = vpop.f32.mrf.mxu0 }
 0x1c3   : > { %5707 = vst [vmem:[#allocation6_spill] sm:$0xff] %v4957_v11  ;;  %v2522_v8 = vrot.slane %v1244_v34, 7 }
 0x1c4   : > { %v1618_v5 = vpop.f32.mrf.mxu1  ;;  %v1023_v35 = vpop.f32.mrf.mxu0  ;;  %3752 = vmatmul.mubr.bf16.gmra.mxu0 %v4176_v44 }
 0x1c5   : > { %v1249_v30 = vadd.f32 %v5709_v10, %v1023_v35  ;;  %3755 = vmatprep.mubr.bf16.mxu0 %v4191_v53 }
 0x1c6   : > { %v1621_v29 = vpop.f32.mrf.mxu1  ;;  %2242 = vmatmul.mubr.bf16.gmra.mxu1 %v4191_v53  ;;  %v1025_v0 = vpop.f32.mrf.mxu0  ;;  %v5713_v53 = vld [vmem:[#allocation21_spill] sm:$0xff] }
 0x1c7   : > { %v2538_v36 = vrot.slane %v1249_v30, 7  ;;  %2249 = vmatprep.mubr.bf16.mxu1 %v5710_v23 }
 0x1c8   : > { %v1622_v51 = vpop.f32.mrf.mxu1  ;;  %v1026_v37 = vpop.f32.mrf.mxu0 }
 0x1c9   : > { %v1252_v3 = vadd.f32 %v5711_v52, %v1026_v37  ;;  %v4968_v20 = vsel %vm2557_vm0, %v2522_v8, %v2538_v36  ;;  %v5716_v36 = vld [vmem:[#allocation16_spill] sm:$0xff] }
 0x1ca   : > { %5712 = vst [vmem:[#allocation19_spill] sm:$0xff] %v4968_v20  ;;  %v4970_v44 = vpop.f32.mrf.mxu1  ;;  %v1028_v24 = vpop.f32.mrf.mxu0  ;;  %v5717_v51 = vld [vmem:[#allocation4_spill] sm:$0xff] }
 0x1cb   : > { %v2554_v5 = vrot.slane %v1252_v3, 7 }
 0x1cc   : > { %v1625_v35 = vpop.f32.mrf.mxu1  ;;  %v3597_v10 = vpop.f32.mrf.mxu0  ;;  %3756 = vmatmul.mubr.bf16.gmra.mxu0 %v4220_v31 }
 0x1cd   : > { %v1073_v34 = vadd.f32 %v3597_v10, %v5713_v53  ;;  %3759 = vmatprep.mubr.bf16.mxu0 %v4222_v32  ;;  %v4977_v30 = vsel %vm2557_vm0, %v2554_v5, %v2522_v8  ;;  %v5718_v53 = vld [vmem:[#allocation18_spill] sm:$0xff] }
 0x1ce   : > { %5714 = vst [vmem:[#allocation2_spill] sm:$0xff] %v4977_v30  ;;  %v4979_v29 = vpop.f32.mrf.mxu1  ;;  %2250 = vmatmul.mubr.bf16.gmra.mxu1 %v4220_v31  ;;  %v1064_v0 = vpop.f32.mrf.mxu0  ;;  %v5719_v31 = vld [vmem:[#allocation23_spill] sm:$0xff] }
 0x1cf   : > { %5715 = vst [vmem:[#allocation25_spill] sm:$0xff] %v4979_v29  ;;  %v1065_v23 = vadd.f32 %v1064_v0, %v5716_v36  ;;  %2257 = vmatprep.mubr.bf16.mxu1 %v5717_v51  ;;  %v2539_v3 = vrot.slane %v1073_v34, 7 }
 0x1d0   : > { %v1630_v37 = vpop.f32.mrf.mxu1  ;;  %v3598_v52 = vpop.f32.mrf.mxu0 }
 0x1d1   : > { %v2507_v24 = vrot.slane %v1065_v23, 7  ;;  %v1076_v0 = vadd.f32 %v3598_v52, %v5719_v31  ;;  %v5721_v23 = vld [vmem:[#allocation31_spill] sm:$0xff] }
 0x1d2   : > { %v1631_v35 = vpop.f32.mrf.mxu1  ;;  %v1067_v10 = vpop.f32.mrf.mxu0 }
 0x1d3   : > { %v1068_v20 = vadd.f32 %v1067_v10, %v5718_v53  ;;  %v4987_v8 = vsel %vm2557_vm0, %v2539_v3, %v2507_v24  ;;  %v5722_v35 = vld [vmem:[#allocation26_spill] sm:$0xff]  ;;  %v5723_v3 = vld [vmem:[#allocation12_spill] sm:$0xff] }
 0x1d4   : > { %v1632_v5 = vpop.f32.mrf.mxu1  ;;  %v3601_v30 = vpop.f32.mrf.mxu0  ;;  %3760 = vmatmul.mubr.bf16.gmra.mxu0 %v4269_v21 }
 0x1d5   : > { %v2523_v36 = vrot.slane %v1068_v20, 7  ;;  %3763 = vmatprep.mubr.bf16.mxu0 %v4275_v26  ;;  %v1089_v37 = vadd.f32 %v3601_v30, %v5721_v23  ;;  %v2508_v20 = vrot.slane %v1076_v0, 7  ;;  %v5726_v30 = vld [vmem:[#allocation28_spill] sm:$0xff] }
 0x1d6   : > { %v4992_v51 = vpop.f32.mrf.mxu1  ;;  %2258 = vmatmul.mubr.bf16.gmra.mxu1 %v4222_v32  ;;  %v1080_v34 = vpop.f32.mrf.mxu0 }
 0x1d7   : > { %5720 = vst [vmem:[#allocation22_spill] sm:$0xff] %v4992_v51  ;;  %v1081_v10 = vadd.f32 %v1080_v34, %v5722_v35  ;;  %2265 = vmatprep.mubr.bf16.mxu1 %v5723_v3  ;;  %v5000_v53 = vsel %vm2557_vm0, %v2507_v24, %v2523_v36  ;;  %v2509_v13 = vrot.slane %v1089_v37, 7  ;;  %v5727_v37 = vld [vmem:[#allocation36_spill] sm:$0xff]  ;;  %v5728_v3 = vld [vmem:[#allocation14_spill] sm:$0xff] }
 0x1d8   : > { %v1637_v5 = vpop.f32.mrf.mxu1  ;;  %v3602_v52 = vpop.f32.mrf.mxu0 }
 0x1d9   : > { %v2524_v31 = vrot.slane %v1081_v10, 7  ;;  %v1092_v1 = vadd.f32 %v3602_v52, %v5724_v55 }
 0x1da   : > { %v5003_v29 = vpop.f32.mrf.mxu1  ;;  %v1083_v32 = vpop.f32.mrf.mxu0 }
 0x1db   : > { %5725 = vst [vmem:[#allocation7_spill] sm:$0xff] %v5003_v29  ;;  %v2525_v51 = vrot.slane %v1092_v1, 7  ;;  %v1084_v23 = vadd.f32 %v1083_v32, %v5726_v30  ;;  %v5008_v34 = vsel %vm2557_vm0, %v2508_v20, %v2524_v31 }
 0x1dc   : > { %v1640_v35 = vpop.f32.mrf.mxu1  ;;  %v3605_v24 = vpop.f32.mrf.mxu0  ;;  %3764 = vmatmul.mubr.bf16.gmra.mxu0 %v4297_v43 }
 0x1dd   : > { %v2540_v36 = vrot.slane %v1084_v23, 7  ;;  %3767 = vmatprep.mubr.bf16.mxu0 %v4305_v46  ;;  %v5014_v55 = vsel %vm2557_vm0, %v2509_v13, %v2525_v51  ;;  %v1105_v31 = vadd.f32 %v3605_v24, %v4709_v57  ;;  %v5730_v23 = vld [vmem:[#allocation38_spill] sm:$0xff]  ;;  %v5732_v24 = vld [vmem:[#allocation48_spill] sm:$0xff] }
 0x1de   : > { %v1643_v0 = vpop.f32.mrf.mxu1  ;;  %2266 = vmatmul.mubr.bf16.gmra.mxu1 %v4269_v21  ;;  %v1096_v1 = vpop.f32.mrf.mxu0 }
 0x1df   : > { %v1097_v10 = vadd.f32 %v1096_v1, %v5727_v37  ;;  %2273 = vmatprep.mubr.bf16.mxu1 %v5728_v3  ;;  %v2575_v5 = vsel %vm2557_vm0, %v2540_v36, %v2508_v20  ;;  %v2526_v20 = vrot.slane %v1105_v31, 7  ;;  %v5731_v3 = vld [vmem:[#allocation44_spill] sm:$0xff] }
 0x1e0   : > { %v1644_v52 = vpop.f32.mrf.mxu1  ;;  %v3606_v43 = vpop.f32.mrf.mxu0 }
 0x1e1   : > { %v2541_v46 = vrot.slane %v1097_v10, 7  ;;  %v1108_v32 = vadd.f32 %v3606_v43, %v4718_v47  ;;  %v5733_v10 = vld [vmem:[#allocation11_spill] sm:$0xff] }
 0x1e2   : > { %v5023_v51 = vpop.f32.mrf.mxu1  ;;  %v1099_v30 = vpop.f32.mrf.mxu0  ;;  %v1129_v47 = vadd.f32 %v5733_v10, %v5732_v24  ;;  %v5738_v24 = vld [vmem:[#allocation46_spill] sm:$0xff] }
 0x1e3   : > { %5729 = vst [vmem:[#allocation24_spill] sm:$0xff] %v5023_v51  ;;  %v1100_v21 = vadd.f32 %v1099_v30, %v5730_v23  ;;  %v2576_v35 = vsel %vm2557_vm0, %v2541_v46, %v2509_v13  ;;  %v2542_v36 = vrot.slane %v1108_v32, 7  ;;  %v5735_v30 = vld [vmem:[#allocation49_spill] sm:$0xff] }
 0x1e4   : > { %v1647_v0 = vpop.f32.mrf.mxu1  ;;  %v3609_v1 = vpop.f32.mrf.mxu0  ;;  %3768 = vmatmul.mubr.bf16.gmra.mxu0 %v4327_v9  ;;  %v5736_v23 = vld [vmem:[#allocation13_spill] sm:$0xff]  ;;  %v2528_v51 = vrot.slane %v1129_v47, 7 }
 0x1e5   : > { %v2510_v37 = vrot.slane %v1100_v21, 7  ;;  %v1121_v57 = vadd.f32 %v3609_v1, %v5731_v3  ;;  %v1132_v13 = vadd.f32 %v5736_v23, %v5735_v30  ;;  %v5737_v46 = vld [vmem:[#allocation41_spill] sm:$0xff]  ;;  %v5739_v30 = vld [vmem:[#allocation43_spill] sm:$0xff] }
 0x1e6   : > { %v5032_v52 = vpop.f32.mrf.mxu1  ;;  %2274 = vmatmul.mubr.bf16.gmra.mxu1 %v4275_v26  ;;  %v1112_v43 = vpop.f32.mrf.mxu0 }
 0x1e7   : > { %5734 = vst [vmem:[#allocation8_spill] sm:$0xff] %v5032_v52  ;;  %v1113_v0 = vadd.f32 %v1112_v43, %v5737_v46  ;;  %v2561_v9 = vsel %vm2557_vm0, %v2510_v37, %v2526_v20  ;;  %v2577_v31 = vsel %vm2557_vm0, %v2542_v36, %v2510_v37  ;;  %v2543_v1 = vrot.slane %v1121_v57, 7 }
 0x1e8   : > { %v1652_v32 = vpop.f32.mrf.mxu1  ;;  %v3610_v21 = vpop.f32.mrf.mxu0  ;;  %v2544_v29 = vrot.slane %v1132_v13, 7  ;;  %v5740_v13 = vld [vmem:[#allocation37_spill] sm:$0xff] }
 0x1e9   : > { %v2511_v3 = vrot.slane %v1113_v0, 7  ;;  %v1124_v10 = vadd.f32 %v3610_v21, %v5738_v24  ;;  %v5741_v24 = vld [vmem:[#allocation40_spill] sm:$0xff] }
 0x1ea   : > { %v1653_v26 = vpop.f32.mrf.mxu1  ;;  %v1115_v52 = vpop.f32.mrf.mxu0 }
 0x1eb   : > { %v2512_v18 = vrot.slane %v1124_v10, 7  ;;  %v1116_v23 = vadd.f32 %v1115_v52, %v5739_v30  ;;  %v2578_v43 = vsel %vm2557_vm0, %v2543_v1, %v2511_v3 }
 0x1ec   : > { %v1654_v20 = vpop.f32.mrf.mxu1  ;;  %v3661_v46 = vpop.f32.mrf.mxu0 }
 0x1ed   : > { %v2527_v11 = vrot.slane %v1116_v23, 7  ;;  %v2579_v36 = vsel %vm2557_vm0, %v2544_v29, %v2512_v18  ;;  %v5050_v37 = vsel %vm2557_vm0, %v2512_v18, %v2528_v51  ;;  %v5742_v51 = vld [vmem:[#allocation39_spill] sm:$0xff] }
 0x1ee   : > { %v5052_v57 = vpop.f32.mrf.mxu1  ;;  %v1690_v47 = vpop.f32.mrf.mxu0 }
 0x1ef   : > { %v1691_v0 = vadd.f32 %v1690_v47, %v5740_v13  ;;  %v2562_v52 = vsel %vm2557_vm0, %v2511_v3, %v2527_v11  ;;  %v5743_v11 = vld [vmem:[#allocation45_spill] sm:$0xff] }
 0x1f0   : > { %v2093_v32 = vpop.f32.mrf.mxu1  ;;  %v3662_v21 = vpop.f32.mrf.mxu0 }
 0x1f1   : > { %v5058_v1 = vadd.f32 %v4987_v8, %v1691_v0  ;;  %v1701_v10 = vadd.f32 %v3662_v21, %v5741_v24  ;;  %v5745_v0 = vld [vmem:[#allocation42_spill] sm:$0xff] }
 0x1f2   : > { %v5061_v29 = vpop.f32.mrf.mxu1  ;;  %v1693_v26 = vpop.f32.mrf.mxu0 }
 0x1f3   : > { %v5063_v18 = vadd.f32 %v2575_v5, %v1701_v10  ;;  %v1694_v30 = vadd.f32 %v1693_v26, %v5742_v51  ;;  %v5747_v10 = vld [vmem:[#allocation47_spill] sm:$0xff] }
 0x1f4   : > { %v2096_v23 = vpop.f32.mrf.mxu1  ;;  %v3665_v20 = vpop.f32.mrf.mxu0 }
 0x1f5   : > { %v5067_v46 = vadd.f32 %v5000_v53, %v1694_v30  ;;  %v1713_v3 = vadd.f32 %v3665_v20, %v5743_v11  ;;  %v5748_v11 = vld [vmem:[#allocation51_spill] sm:$0xff] }
 0x1f6   : > { %v5070_v47 = vpop.f32.mrf.mxu1  ;;  %v1705_v8 = vpop.f32.mrf.mxu0 }
 0x1f7   : > { %v5072_v13 = vadd.f32 %v2576_v35, %v1713_v3  ;;  %v1706_v32 = vadd.f32 %v1705_v8, %v5745_v0 }
 0x1f8   : > { %v2101_v21 = vpop.f32.mrf.mxu1  ;;  %v3666_v24 = vpop.f32.mrf.mxu0 }
 0x1f9   : > { %5744 = vst [vmem:[#allocation30_spill] sm:$0xff] %v5072_v13  ;;  %v5076_v5 = vadd.f32 %v5008_v34, %v1706_v32  ;;  %v1716_v26 = vadd.f32 %v3666_v24, %v5747_v10  ;;  %v5750_v10 = vld [vmem:[#allocation50_spill] sm:$0xff] }
 0x1fa   : > { %v5079_v51 = vpop.f32.mrf.mxu1  ;;  %v1708_v53 = vpop.f32.mrf.mxu0 }
 0x1fb   : > { %5746 = vst [vmem:[#allocation27_spill] sm:$0xff] %v5076_v5  ;;  %v5082_v30 = vadd.f32 %v5014_v55, %v1716_v26 }
 0x1fc   : > { %v2104_v23 = vpop.f32.mrf.mxu1  ;;  %v3669_v20 = vpop.f32.mrf.mxu0 }
 0x1fd   : > { %v1728_v35 = vadd.f32 %v3669_v20, %v5748_v11 }
 0x1fe   : > { %v5085_v3 = vpop.f32.mrf.mxu1  ;;  %v1720_v8 = vpop.f32.mrf.mxu0 }
 0x1ff   : > { %v5087_v0 = vadd.f32 %v2561_v9, %v1728_v35 }
 0x200   : > { %v2109_v21 = vpop.f32.mrf.mxu1  ;;  %v3670_v34 = vpop.f32.mrf.mxu0 }
 0x201   : > { %5749 = vst [vmem:[#allocation3_spill] sm:$0xff] %v5087_v0 }
 0x202   : > { %v5089_v32 = vpop.f32.mrf.mxu1  ;;  %v1722_v24 = vpop.f32.mrf.mxu0 }
 0x203   : > { %v1723_v13 = vadd.f32 %v1722_v24, %v5750_v10 }
 0x204   : > { %v2112_v53 = vpop.f32.mrf.mxu1  ;;  %v3673_v5 = vpop.f32.mrf.mxu0 }
 0x205   : > { %v5092_v55 = vadd.f32 %v2577_v31, %v1723_v13 }
 0x206   : > { %v5094_v26 = vpop.f32.mrf.mxu1  ;;  %v1734_v23 = vpop.f32.mrf.mxu0 }
 0x207   : > { %v1735_v20 = vadd.f32 %v1734_v23, %v4781_v27 }
 0x208   : > { %v2117_v11 = vpop.f32.mrf.mxu1  ;;  %v3674_v8 = vpop.f32.mrf.mxu0 }
 0x209   : > { %v5097_v9 = vadd.f32 %v2578_v43, %v1735_v20  ;;  %v1745_v35 = vadd.f32 %v3674_v8, %v4802_v17 }
 0x20a   : > { %v5100_v21 = vpop.f32.mrf.mxu1  ;;  %v1737_v34 = vpop.f32.mrf.mxu0 }
 0x20b   : > { %v5102_v0 = vadd.f32 %v2579_v36, %v1745_v35  ;;  %v1738_v5 = vadd.f32 %v1737_v34, %v4789_v58 }
 0x20c   : > { %v2120_v31 = vpop.f32.mrf.mxu1  ;;  %v3677_v13 = vpop.f32.mrf.mxu0 }
 0x20d   : > { %v5105_v24 = vadd.f32 %v2562_v52, %v1738_v5  ;;  %v1757_v10 = vadd.f32 %v3677_v13, %v4823_v39 }
 0x20e   : > { %v5108_v27 = vpop.f32.mrf.mxu1  ;;  %v1749_v53 = vpop.f32.mrf.mxu0 }
 0x20f   : > { %v5111_v43 = vadd.f32 %v4787_v19, %v1757_v10  ;;  %v1750_v17 = vadd.f32 %v1749_v53, %v4810_v49 }
 0x210   : > { %v2125_v23 = vpop.f32.mrf.mxu1  ;;  %v3678_v20 = vpop.f32.mrf.mxu0 }
 0x211   : > { %v5115_v36 = vadd.f32 %v5050_v37, %v1750_v17  ;;  %v1760_v58 = vadd.f32 %v3678_v20, %v4831_v16 }
 0x212   : > { %v5118_v11 = vpop.f32.mrf.mxu1  ;;  %v1752_v52 = vpop.f32.mrf.mxu0 }
 0x213   : > { %v5121_v39 = vadd.f32 %v4779_v54, %v1760_v58 }
 0x214   : > { %v2128_v8 = vpop.f32.mrf.mxu1  ;;  %v3681_v35 = vpop.f32.mrf.mxu0 }
 0x215   : > { %v1772_v19 = vadd.f32 %v3681_v35, %v4852_v15 }
 0x216   : > { %v5124_v34 = vpop.f32.mrf.mxu1  ;;  %v1764_v49 = vpop.f32.mrf.mxu0 }
 0x217   : > { %v5127_v5 = vadd.f32 %v4800_v22, %v1772_v19 }
 0x218   : > { %v2133_v37 = vpop.f32.mrf.mxu1  ;;  %v3682_v31 = vpop.f32.mrf.mxu0 }
 0x21a   : > { %v5129_v13 = vpop.f32.mrf.mxu1  ;;  %v1766_v16 = vpop.f32.mrf.mxu0 }
 0x21b   : > { %v1767_v10 = vadd.f32 %v1766_v16, %v4844_v14 }
 0x21c   : > { %v2136_v53 = vpop.f32.mrf.mxu1  ;;  %v3685_v54 = vpop.f32.mrf.mxu0 }
 0x21d   : > { %v5133_v17 = vadd.f32 %v4808_v25, %v1767_v10 }
 0x21e   : > { %v5135_v23 = vpop.f32.mrf.mxu1  ;;  %v1778_v15 = vpop.f32.mrf.mxu0 }
 0x21f   : > { %v1779_v20 = vadd.f32 %v1778_v15, %v4865_v60 }
 0x220   : > { %v2141_v58 = vpop.f32.mrf.mxu1  ;;  %v3686_v22 = vpop.f32.mrf.mxu0 }
 0x221   : > { %v5139_v52 = vadd.f32 %v4829_v62, %v1779_v20  ;;  %v1789_v8 = vadd.f32 %v3686_v22, %v4886_v7 }
 0x222   : > { %v5142_v35 = vpop.f32.mrf.mxu1  ;;  %v1781_v14 = vpop.f32.mrf.mxu0 }
 0x223   : > { %v5145_v19 = vadd.f32 %v4850_v50, %v1789_v8  ;;  %v1782_v25 = vadd.f32 %v1781_v14, %v4873_v2 }
 0x224   : > { %v2144_v49 = vpop.f32.mrf.mxu1  ;;  %v3689_v37 = vpop.f32.mrf.mxu0 }
 0x225   : > { %v5149_v31 = vadd.f32 %v4821_v4, %v1782_v25  ;;  %v1801_v60 = vadd.f32 %v3689_v37, %v4907_v33 }
 0x226   : > { %v5152_v16 = vpop.f32.mrf.mxu1  ;;  %v1793_v62 = vpop.f32.mrf.mxu0 }
 0x227   : > { %v5155_v7 = vadd.f32 %v4871_v61, %v1801_v60  ;;  %v1794_v10 = vadd.f32 %v1793_v62, %v4894_v38 }
 0x228   : > { %v2149_v53 = vpop.f32.mrf.mxu1  ;;  %v3690_v50 = vpop.f32.mrf.mxu0 }
 0x229   : > { %v5159_v54 = vadd.f32 %v4842_v40, %v1794_v10  ;;  %v1804_v2 = vadd.f32 %v3690_v50, %v4915_v56 }
 0x22a   : > { %v5162_v15 = vpop.f32.mrf.mxu1  ;;  %v1796_v4 = vpop.f32.mrf.mxu0 }
 0x22b   : > { %v5165_v33 = vadd.f32 %v4863_v45, %v1804_v2 }
 0x22c   : > { %v2152_v20 = vpop.f32.mrf.mxu1  ;;  %v3693_v58 = vpop.f32.mrf.mxu0 }
 0x22d   : > { %v1816_v61 = vadd.f32 %v3693_v58, %v4936_v28 }
 0x22e   : > { %v5168_v22 = vpop.f32.mrf.mxu1  ;;  %v1808_v38 = vpop.f32.mrf.mxu0 }
 0x22f   : > { %v5171_v8 = vadd.f32 %v4884_v63, %v1816_v61 }
 0x230   : > { %v2157_v40 = vpop.f32.mrf.mxu1  ;;  %v3694_v14 = vpop.f32.mrf.mxu0 }
 0x231   : > { %v5753_v40 = vld [vmem:[#allocation15_spill] sm:$0xff] }
 0x232   : > { %v5173_v25 = vpop.f32.mrf.mxu1  ;;  %v1810_v56 = vpop.f32.mrf.mxu0 }
 0x233   : > { %v1811_v49 = vadd.f32 %v1810_v56, %v4928_v59 }
 0x234   : > { %v2160_v37 = vpop.f32.mrf.mxu1  ;;  %v3697_v45 = vpop.f32.mrf.mxu0 }
 0x235   : > { %v5177_v60 = vadd.f32 %v4892_v41, %v1811_v49  ;;  %v5752_v41 = vld [vmem:[#allocation6_spill] sm:$0xff]  ;;  %v5755_v37 = vld [vmem:[#allocation17_spill] sm:$0xff] }
 0x236   : > { %v5179_v62 = vpop.f32.mrf.mxu1  ;;  %v1822_v28 = vpop.f32.mrf.mxu0  ;;  %v5757_v45 = vld [vmem:[#allocation25_spill] sm:$0xff] }
 0x237   : > { %v1823_v10 = vadd.f32 %v1822_v28, %v4949_v42  ;;  %v5754_v42 = vld [vmem:[#allocation22_spill] sm:$0xff] }
 0x238   : > { %v2165_v53 = vpop.f32.mrf.mxu1  ;;  %v3698_v63 = vpop.f32.mrf.mxu0 }
 0x239   : > { %v5183_v50 = vadd.f32 %v4913_v48, %v1823_v10  ;;  %v1833_v2 = vadd.f32 %v3698_v63, %v4970_v44  ;;  %v5758_v53 = vld [vmem:[#allocation5_spill] sm:$0xff] }
 0x23a   : > { %v5186_v4 = vpop.f32.mrf.mxu1  ;;  %v1825_v59 = vpop.f32.mrf.mxu0 }
 0x23b   : > { %v5189_v20 = vadd.f32 %v4934_v12, %v1833_v2  ;;  %v1826_v58 = vadd.f32 %v1825_v59, %v5752_v41  ;;  %v5760_v2 = vld [vmem:[#allocation7_spill] sm:$0xff] }
 0x23c   : > { %v2168_v61 = vpop.f32.mrf.mxu1  ;;  %v3701_v38 = vpop.f32.mrf.mxu0 }
 0x23d   : > { %5751 = vst [vmem:[#allocation29_spill] sm:$0xff] %v5189_v20  ;;  %v5193_v14 = vadd.f32 %v5753_v40, %v1826_v58  ;;  %v1845_v56 = vadd.f32 %v3701_v38, %v5754_v42  ;;  %v5761_v61 = vld [vmem:[#allocation20_spill] sm:$0xff] }
 0x23e   : > { %v5196_v49 = vpop.f32.mrf.mxu1  ;;  %v1837_v48 = vpop.f32.mrf.mxu0  ;;  %v5763_v20 = vld [vmem:[#allocation8_spill] sm:$0xff] }
 0x23f   : > { %v5199_v44 = vadd.f32 %v5755_v37, %v1845_v56  ;;  %v1838_v28 = vadd.f32 %v1837_v48, %v5757_v45  ;;  %v5764_v45 = vld [vmem:[#allocation19_spill] sm:$0xff] }
 0x240   : > { %v2173_v10 = vpop.f32.mrf.mxu1  ;;  %v3702_v12 = vpop.f32.mrf.mxu0 }
 0x241   : > { %5756 = vst [vmem:[#allocation9_spill] sm:$0xff] %v5199_v44  ;;  %v5203_v63 = vadd.f32 %v5758_v53, %v1838_v28  ;;  %v1848_v59 = vadd.f32 %v3702_v12, %v5760_v2  ;;  %v5766_v2 = vld [vmem:[#allocation24_spill] sm:$0xff] }
 0x242   : > { %v5206_v41 = vpop.f32.mrf.mxu1  ;;  %v1840_v58 = vpop.f32.mrf.mxu0 }
 0x243   : > { %5759 = vst [vmem:[#allocation35_spill] sm:$0xff] %v5203_v63  ;;  %v5209_v38 = vadd.f32 %v5761_v61, %v1848_v59  ;;  %v5767_v61 = vld [vmem:[#allocation2_spill] sm:$0xff] }
 0x244   : > { %v2176_v40 = vpop.f32.mrf.mxu1  ;;  %v3705_v42 = vpop.f32.mrf.mxu0 }
 0x245   : > { %5762 = vst [vmem:[#allocation32_spill] sm:$0xff] %v5209_v38  ;;  %v1860_v56 = vadd.f32 %v3705_v42, %v5763_v20 }
 0x246   : > { %v5212_v37 = vpop.f32.mrf.mxu1  ;;  %v1852_v48 = vpop.f32.mrf.mxu0 }
 0x247   : > { %v5215_v10 = vadd.f32 %v5764_v45, %v1860_v56 }
 0x248   : > { %v2181_v28 = vpop.f32.mrf.mxu1  ;;  %v3706_v53 = vpop.f32.mrf.mxu0 }
 0x249   : > { %5765 = vst [vmem:[#allocation10_spill] sm:$0xff] %v5215_v10 }
 0x24a   : > { %v5217_v44 = vpop.f32.mrf.mxu1  ;;  %v1854_v12 = vpop.f32.mrf.mxu0 }
 0x24b   : > { %v1855_v58 = vadd.f32 %v1854_v12, %v5766_v2 }
 0x24c   : > { %v2184_v63 = vpop.f32.mrf.mxu1  ;;  %v3725_v59 = vpop.f32.mrf.mxu0 }
 0x24d   : > { %v5221_v40 = vadd.f32 %v5767_v61, %v1855_v58  ;;  %v2325_v56 = vadd.f32 %v3725_v59, %v5070_v47 }
 0x24e   : > { %v5223_v38 = vpop.f32.mrf.mxu1  ;;  %v2316_v20 = vpop.f32.mrf.mxu0 }
 0x24f   : > { %5768 = vst [vmem:[#allocation34_spill] sm:$0xff] %v5221_v40  ;;  %v2317_v45 = vadd.f32 %v2316_v20, %v5052_v57  ;;  %v2654_v2 = vrot.slane %v2325_v56, 1 }
 0x250   : > { %v2189_v42 = vpop.f32.mrf.mxu1  ;;  %v3726_v48 = vpop.f32.mrf.mxu0 }
 0x251   : > { %v2622_v58 = vrot.slane %v2317_v45, 1  ;;  %v2328_v61 = vadd.f32 %v3726_v48, %v5079_v51 }
 0x252   : > { %v5227_v28 = vpop.f32.mrf.mxu1  ;;  %v2319_v53 = vpop.f32.mrf.mxu0 }
 0x253   : > { %v2320_v10 = vadd.f32 %v2319_v53, %v5061_v29 }
 0x254   : > { %v2192_v63 = vpop.f32.mrf.mxu1  ;;  %v3729_v12 = vpop.f32.mrf.mxu0 }
 0x255   : > { %v2638_v42 = vrot.slane %v2320_v10, 1  ;;  %v2623_v10 = vrot.slane %v2328_v61, 1  ;;  %v2341_v63 = vadd.f32 %v3729_v12, %v5094_v26 }
 0x256   : > { %v5232_v40 = vpop.f32.mrf.mxu1  ;;  %v2332_v47 = vpop.f32.mrf.mxu0 }
 0x257   : > { %v2671_v57 = vsel %vm2670_vm1, %v2638_v42, %v2654_v2  ;;  %v2687_v59 = vsel %vm2670_vm1, %v2622_v58, %v2638_v42  ;;  %v2333_v29 = vadd.f32 %v2332_v47, %v5085_v3  ;;  %v2624_v26 = vrot.slane %v2341_v63, 1 }
 0x258   : > { %v5240_v20 = vadd.f32 %v2687_v59, %v5058_v1  ;;  %v5243_v56 = vadd.f32 %v2671_v57, %v5067_v46  ;;  %v2197_v45 = vpop.f32.mrf.mxu1  ;;  %v3730_v51 = vpop.f32.mrf.mxu0 }
 0x259   : > { %v2639_v48 = vrot.slane %v2333_v29, 1  ;;  %v2344_v53 = vadd.f32 %v3730_v51, %v5100_v21 }
 0x25a   : > { %v3376_v1 = vpack.c.bf16 %v5243_v56, %v5240_v20  ;;  %v5255_v3 = vpop.f32.mrf.mxu1  ;;  %v2335_v46 = vpop.f32.mrf.mxu0  ;;  %v2735_v59 = vadd.f32 %v5243_v56, %v5240_v20 }
 0x25b   : > { %v2688_v2 = vsel %vm2670_vm1, %v2623_v10, %v2639_v48  ;;  %v2336_v58 = vadd.f32 %v2335_v46, %v5089_v32  ;;  %v2640_v21 = vrot.slane %v2344_v53, 1  ;;  %v5769_v10 = vld [vmem:[#allocation27_spill] sm:$0xff] }
 0x25c   : > { %3377 = vst [vmem:[%s5250_s7] sm:$0xff] %v3376_v1   ;;  %v5263_v61 = vadd.f32 %v2688_v2, %v5063_v18  ;;  %v2200_v42 = vpop.f32.mrf.mxu1  ;;  %v3733_v47 = vpop.f32.mrf.mxu0 }
 0x25d   : > { %v2655_v57 = vrot.slane %v2336_v58, 1  ;;  %v2357_v32 = vadd.f32 %v3733_v47, %v5124_v34  ;;  %v2689_v2 = vsel %vm2670_vm1, %v2624_v26, %v2640_v21  ;;  %v5770_v26 = vld [vmem:[#allocation30_spill] sm:$0xff] }
 0x25e   : > { %v5267_v29 = vpop.f32.mrf.mxu1  ;;  %v2348_v45 = vpop.f32.mrf.mxu0  ;;  %v2736_v18 = vadd.f32 %v2735_v59, %v5263_v61 }
 0x25f   : > { %v2672_v12 = vsel %vm2670_vm1, %v2639_v48, %v2655_v57  ;;  %v2349_v51 = vadd.f32 %v2348_v45, %v5108_v27  ;;  %v2641_v47 = vrot.slane %v2357_v32, 1 }
 0x260   : > { %v5275_v53 = vadd.f32 %v2672_v12, %v5769_v10  ;;  %v2205_v1 = vpop.f32.mrf.mxu1  ;;  %v3734_v46 = vpop.f32.mrf.mxu0  ;;  %v5289_v12 = vadd.f32 %v2689_v2, %v5770_v26 }
 0x261   : > { %v2656_v58 = vrot.slane %v2349_v51, 1  ;;  %v2360_v63 = vadd.f32 %v3734_v46, %v5129_v13 }
 0x262   : > { %v2737_v48 = vadd.f32 %v2736_v18, %v5275_v53  ;;  %v3381_v34 = vpack.c.bf16 %v5275_v53, %v5263_v61  ;;  %v5283_v27 = vpop.f32.mrf.mxu1  ;;  %v2351_v42 = vpop.f32.mrf.mxu0 }
 0x263   : > { %v2673_v57 = vsel %vm2670_vm1, %v2640_v21, %v2656_v58  ;;  %v2657_v59 = vrot.slane %v2360_v63, 1  ;;  %v2352_v45 = vadd.f32 %v2351_v42, %v5118_v11 }
 0x264   : > { %3468 = vst [vmem:[%s5250_s7 + $0x8] sm:$0xff] %v3381_v34   ;;  %v5293_v13 = vadd.f32 %v2673_v57, %v5082_v30  ;;  %v2208_v51 = vpop.f32.mrf.mxu1  ;;  %v3737_v18 = vpop.f32.mrf.mxu0  ;;  %v2738_v1 = vadd.f32 %v2737_v48, %v5289_v12  ;;  %v5771_v30 = vld [vmem:[#allocation3_spill] sm:$0xff] }
 0x265   : > { %v2674_v10 = vsel %vm2670_vm1, %v2641_v47, %v2657_v59  ;;  %v2625_v32 = vrot.slane %v2352_v45, 1  ;;  %v2373_v48 = vadd.f32 %v3737_v18, %v5152_v16 }
 0x266   : > { %v3386_v21 = vpack.c.bf16 %v5293_v13, %v5289_v12  ;;  %v5300_v46 = vpop.f32.mrf.mxu1  ;;  %v2364_v11 = vpop.f32.mrf.mxu0  ;;  %v5306_v58 = vadd.f32 %v2674_v10, %v5771_v30  ;;  %v2739_v59 = vadd.f32 %v2738_v1, %v5293_v13 }
 0x267   : > { %v2690_v2 = vsel %vm2670_vm1, %v2625_v32, %v2641_v47  ;;  %v2365_v57 = vadd.f32 %v2364_v11, %v5135_v23 }
 0x268   : > { %3469 = vst [vmem:[%s5250_s7 + $0x10] sm:$0xff] %v3386_v21   ;;  %v5309_v63 = vadd.f32 %v2690_v2, %v5092_v55  ;;  %v2213_v34 = vpop.f32.mrf.mxu1  ;;  %v3738_v42 = vpop.f32.mrf.mxu0  ;;  %v2658_v21 = vrot.slane %v2373_v48, 1 }
 0x269   : > { %v2626_v2 = vrot.slane %v2365_v57, 1  ;;  %v2376_v16 = vadd.f32 %v3738_v42, %v5162_v15 }
 0x26a   : > { %v3391_v45 = vpack.c.bf16 %v5306_v58, %v5309_v63  ;;  %v5316_v26 = vpop.f32.mrf.mxu1  ;;  %v2367_v47 = vpop.f32.mrf.mxu0  ;;  %v2740_v10 = vadd.f32 %v2739_v59, %v5309_v63 }
 0x26b   : > { %v2368_v51 = vadd.f32 %v2367_v47, %v5142_v35 }
 0x26c   : > { %3470 = vst [vmem:[%s5250_s7 + $0x18] sm:$0xff] %v3391_v45   ;;  %v2216_v55 = vpop.f32.mrf.mxu1  ;;  %v3741_v32 = vpop.f32.mrf.mxu0  ;;  %v2741_v15 = vadd.f32 %v2740_v10, %v5306_v58  ;;  %v2627_v45 = vrot.slane %v2376_v16, 1 }
 0x26d   : > { %v2642_v23 = vrot.slane %v2368_v51, 1  ;;  %v2389_v35 = vadd.f32 %v3741_v32, %v5179_v62 }
 0x26e   : > { %v5322_v18 = vpop.f32.mrf.mxu1  ;;  %v2380_v1 = vpop.f32.mrf.mxu0 }
 0x26f   : > { %v2675_v11 = vsel %vm2670_vm1, %v2642_v23, %v2658_v21  ;;  %v2691_v30 = vsel %vm2670_vm1, %v2626_v2, %v2642_v23  ;;  %v2381_v34 = vadd.f32 %v2380_v1, %v5168_v22  ;;  %v2628_v32 = vrot.slane %v2389_v35, 1 }
 0x270   : > { %v5331_v59 = vadd.f32 %v2691_v30, %v5097_v9  ;;  %v5334_v48 = vadd.f32 %v2675_v11, %v5105_v24  ;;  %v2221_v42 = vpop.f32.mrf.mxu1  ;;  %v3742_v57 = vpop.f32.mrf.mxu0 }
 0x271   : > { %v2643_v47 = vrot.slane %v2381_v34, 1  ;;  %v2392_v51 = vadd.f32 %v3742_v57, %v5186_v4 }
 0x272   : > { %v2742_v55 = vadd.f32 %v2741_v15, %v5331_v59  ;;  %v3396_v22 = vpack.c.bf16 %v5334_v48, %v5331_v59  ;;  %v5341_v62 = vpop.f32.mrf.mxu1  ;;  %v2383_v9 = vpop.f32.mrf.mxu0 }
 0x273   : > { %v2692_v24 = vsel %vm2670_vm1, %v2627_v45, %v2643_v47  ;;  %v2644_v21 = vrot.slane %v2392_v51, 1  ;;  %v2384_v10 = vadd.f32 %v2383_v9, %v5173_v25 }
 0x274   : > { %v2743_v2 = vadd.f32 %v2742_v55, %v5334_v48  ;;  %3471 = vst [vmem:[%s5250_s7 + $0x20] sm:$0xff] %v3396_v22   ;;  %v5349_v4 = vadd.f32 %v2692_v24, %v5102_v0  ;;  %v2224_v16 = vpop.f32.mrf.mxu1  ;;  %v3745_v23 = vpop.f32.mrf.mxu0 }
 0x275   : > { %v2693_v1 = vsel %vm2670_vm1, %v2628_v32, %v2644_v21  ;;  %v2659_v11 = vrot.slane %v2384_v10, 1  ;;  %v2405_v15 = vadd.f32 %v3745_v23, %v5212_v37 }
 0x276   : > { %v5354_v30 = vadd.f32 %v2693_v1, %v5111_v43  ;;  %v5356_v35 = vpop.f32.mrf.mxu1  ;;  %v2396_v34 = vpop.f32.mrf.mxu0  ;;  %v2744_v42 = vadd.f32 %v2743_v2, %v5349_v4 }
 0x277   : > { %v2676_v25 = vsel %vm2670_vm1, %v2643_v47, %v2659_v11  ;;  %v2397_v0 = vadd.f32 %v2396_v34, %v5196_v49  ;;  %v2645_v49 = vrot.slane %v2405_v15, 1 }
 0x278   : > { %v5364_v57 = vadd.f32 %v2676_v25, %v5115_v36  ;;  %v2229_v45 = vpop.f32.mrf.mxu1  ;;  %v3746_v51 = vpop.f32.mrf.mxu0 }
 0x279   : > { %v2660_v43 = vrot.slane %v2397_v0, 1  ;;  %v2408_v55 = vadd.f32 %v3746_v51, %v5217_v44 }
 0x27a   : > { %v2745_v22 = vadd.f32 %v2744_v42, %v5364_v57  ;;  %v3401_v47 = vpack.c.bf16 %v5364_v57, %v5349_v4  ;;  %v5370_v9 = vpop.f32.mrf.mxu1  ;;  %v2399_v37 = vpop.f32.mrf.mxu0 }
 0x27b   : > { %v2677_v32 = vsel %vm2670_vm1, %v2644_v21, %v2660_v43  ;;  %v2661_v36 = vrot.slane %v2408_v55, 1  ;;  %v2400_v24 = vadd.f32 %v2399_v37, %v5206_v41 }
 0x27c   : > { %3472 = vst [vmem:[%s5250_s7 + $0x28] sm:$0xff] %v3401_v47   ;;  %v5377_v10 = vadd.f32 %v2677_v32, %v5121_v39  ;;  %v2232_v44 = vpop.f32.mrf.mxu1  ;;  %v3749_v2 = vpop.f32.mrf.mxu0  ;;  %v2746_v1 = vadd.f32 %v2745_v22, %v5354_v30 }
 0x27d   : > { %v2678_v16 = vsel %vm2670_vm1, %v2645_v49, %v2661_v36  ;;  %v2629_v23 = vrot.slane %v2400_v24, 1  ;;  %v2421_v42 = vadd.f32 %v3749_v2, %v5232_v40 }
 0x27e   : > { %v3406_v11 = vpack.c.bf16 %v5377_v10, %v5354_v30  ;;  %v5384_v34 = vpop.f32.mrf.mxu1  ;;  %v2412_v21 = vpop.f32.mrf.mxu0  ;;  %v5390_v39 = vadd.f32 %v2678_v16, %v5127_v5  ;;  %v2747_v51 = vadd.f32 %v2746_v1, %v5377_v10 }
 0x27f   : > { %v2694_v41 = vsel %vm2670_vm1, %v2629_v23, %v2645_v49  ;;  %v2413_v45 = vadd.f32 %v2412_v21, %v5223_v38  ;;  %v2662_v49 = vrot.slane %v2421_v42, 1 }
 0x280   : > { %3473 = vst [vmem:[%s5250_s7 + $0x30] sm:$0xff] %v3406_v11   ;;  %v5393_v25 = vadd.f32 %v2694_v41, %v5133_v17  ;;  %v2237_v15 = vpop.f32.mrf.mxu1  ;;  %v3750_v0 = vpop.f32.mrf.mxu0 }
 0x281   : > { %v2630_v32 = vrot.slane %v2413_v45, 1  ;;  %v2424_v40 = vadd.f32 %v3750_v0, %v5255_v3 }
 0x282   : > { %v3411_v43 = vpack.c.bf16 %v5390_v39, %v5393_v25  ;;  %v5400_v55 = vpop.f32.mrf.mxu1  ;;  %v2415_v22 = vpop.f32.mrf.mxu0  ;;  %v2748_v47 = vadd.f32 %v2747_v51, %v5393_v25 }
 0x283   : > { %v2416_v5 = vadd.f32 %v2415_v22, %v5227_v28  ;;  %v2631_v21 = vrot.slane %v2424_v40, 1 }
 0x284   : > { %3474 = vst [vmem:[%s5250_s7 + $0x38] sm:$0xff] %v3411_v43   ;;  %v2240_v17 = vpop.f32.mrf.mxu1  ;;  %v3753_v37 = vpop.f32.mrf.mxu0  ;;  %v2749_v3 = vadd.f32 %v2748_v47, %v5390_v39 }
 0x285   : > { %v2646_v38 = vrot.slane %v2416_v5, 1  ;;  %v2437_v41 = vadd.f32 %v3753_v37, %v5300_v46 }
 0x286   : > { %v5406_v36 = vpop.f32.mrf.mxu1  ;;  %v2428_v24 = vpop.f32.mrf.mxu0 }
 0x287   : > { %v2679_v44 = vsel %vm2670_vm1, %v2646_v38, %v2662_v49  ;;  %v2695_v2 = vsel %vm2670_vm1, %v2630_v32, %v2646_v38  ;;  %v2429_v28 = vadd.f32 %v2428_v24, %v5267_v29  ;;  %v2632_v47 = vrot.slane %v2437_v41, 1 }
 0x288   : > { %v5414_v16 = vadd.f32 %v2695_v2, %v5139_v52  ;;  %v5417_v23 = vadd.f32 %v2679_v44, %v5149_v31  ;;  %v2245_v1 = vpop.f32.mrf.mxu1  ;;  %v3754_v11 = vpop.f32.mrf.mxu0 }
 0x289   : > { %v2647_v15 = vrot.slane %v2429_v28, 1  ;;  %v2440_v0 = vadd.f32 %v3754_v11, %v5316_v26 }
 0x28a   : > { %v2750_v42 = vadd.f32 %v2749_v3, %v5414_v16  ;;  %v3416_v52 = vpack.c.bf16 %v5417_v23, %v5414_v16  ;;  %v5425_v29 = vpop.f32.mrf.mxu1  ;;  %v2431_v31 = vpop.f32.mrf.mxu0 }
 0x28b   : > { %v2696_v45 = vsel %vm2670_vm1, %v2631_v21, %v2647_v15  ;;  %v2648_v51 = vrot.slane %v2440_v0, 1  ;;  %v2432_v43 = vadd.f32 %v2431_v31, %v5283_v27 }
 0x28c   : > { %v2751_v22 = vadd.f32 %v2750_v42, %v5417_v23  ;;  %3475 = vst [vmem:[%s5250_s7 + $0x40] sm:$0xff] %v3416_v52   ;;  %v5433_v46 = vadd.f32 %v2696_v45, %v5145_v19  ;;  %v2248_v26 = vpop.f32.mrf.mxu1  ;;  %v3757_v5 = vpop.f32.mrf.mxu0 }
 0x28d   : > { %v2663_v17 = vrot.slane %v2432_v43, 1  ;;  %v2697_v40 = vsel %vm2670_vm1, %v2632_v47, %v2648_v51  ;;  %v2453_v38 = vadd.f32 %v3757_v5, %v5356_v35 }
 0x28e   : > { %v2752_v37 = vadd.f32 %v2751_v22, %v5433_v46  ;;  %v2251_v49 = vpop.f32.mrf.mxu1  ;;  %v2444_v32 = vpop.f32.mrf.mxu0  ;;  %v5447_v1 = vadd.f32 %v2697_v40, %v5155_v7 }
 0x28f   : > { %v2680_v27 = vsel %vm2670_vm1, %v2647_v15, %v2663_v17  ;;  %v2445_v19 = vadd.f32 %v2444_v32, %v5322_v18  ;;  %v2649_v15 = vrot.slane %v2453_v38, 1 }
 0x290   : > { %v5443_v24 = vadd.f32 %v2680_v27, %v5159_v54  ;;  %v2253_v44 = vpop.f32.mrf.mxu1  ;;  %v3758_v2 = vpop.f32.mrf.mxu0 }
 0x291   : > { %v2664_v28 = vrot.slane %v2445_v19, 1  ;;  %v2456_v3 = vadd.f32 %v3758_v2, %v5370_v9 }
 0x292   : > { %v2753_v11 = vadd.f32 %v2752_v37, %v5443_v24  ;;  %v3421_v21 = vpack.c.bf16 %v5443_v24, %v5433_v46  ;;  %v2254_v35 = vpop.f32.mrf.mxu1  ;;  %v2447_v41 = vpop.f32.mrf.mxu0 }
 0x293   : > { %v2681_v54 = vsel %vm2670_vm1, %v2648_v51, %v2664_v28  ;;  %v2665_v18 = vrot.slane %v2456_v3, 1  ;;  %v2448_v0 = vadd.f32 %v2447_v41, %v5341_v62 }
 0x294   : > { %3476 = vst [vmem:[%s5250_s7 + $0x48] sm:$0xff] %v3421_v21   ;;  %v5457_v9 = vadd.f32 %v2681_v54, %v5165_v33  ;;  %v2754_v7 = vadd.f32 %v2753_v11, %v5447_v1  ;;  %v2256_v42 = vpop.f32.mrf.mxu1  ;;  %v3761_v52 = vpop.f32.mrf.mxu0 }
 0x295   : > { %v2682_v31 = vsel %vm2670_vm1, %v2649_v15, %v2665_v18  ;;  %v2633_v45 = vrot.slane %v2448_v0, 1  ;;  %v2469_v37 = vadd.f32 %v3761_v52, %v5406_v36 }
 0x296   : > { %v2755_v43 = vadd.f32 %v2754_v7, %v5457_v9  ;;  %v3426_v51 = vpack.c.bf16 %v5457_v9, %v5447_v1  ;;  %v2259_v22 = vpop.f32.mrf.mxu1  ;;  %v2460_v62 = vpop.f32.mrf.mxu0  ;;  %v5469_v26 = vadd.f32 %v2682_v31, %v5171_v8 }
 0x297   : > { %v2698_v33 = vsel %vm2670_vm1, %v2633_v45, %v2649_v15  ;;  %v2461_v32 = vadd.f32 %v2460_v62, %v5384_v34  ;;  %v2666_v28 = vrot.slane %v2469_v37, 1 }
 0x298   : > { %3477 = vst [vmem:[%s5250_s7 + $0x50] sm:$0xff] %v3426_v51   ;;  %v5472_v5 = vadd.f32 %v2698_v33, %v5177_v60  ;;  %v2261_v47 = vpop.f32.mrf.mxu1  ;;  %v3762_v17 = vpop.f32.mrf.mxu0 }
 0x299   : > { %v2634_v3 = vrot.slane %v2461_v32, 1  ;;  %v2472_v36 = vadd.f32 %v3762_v17, %v5425_v29  ;;  %v5772_v47 = vld [vmem:[#allocation29_spill] sm:$0xff] }
 0x29a   : > { %v2756_v40 = vadd.f32 %v2755_v43, %v5472_v5  ;;  %v3431_v27 = vpack.c.bf16 %v5469_v26, %v5472_v5  ;;  %v2262_v38 = vpop.f32.mrf.mxu1  ;;  %v2463_v19 = vpop.f32.mrf.mxu0 }
 0x29b   : > { %v2464_v44 = vadd.f32 %v2463_v19, %v5400_v55  ;;  %v2635_v29 = vrot.slane %v2472_v36, 1 }
 0x29c   : > { %3478 = vst [vmem:[%s5250_s7 + $0x58] sm:$0xff] %v3431_v27   ;;  %v2757_v8 = vadd.f32 %v2756_v40, %v5469_v26  ;;  %v2264_v60 = vpop.f32.mrf.mxu1  ;;  %v3765_v2 = vpop.f32.mrf.mxu0 }
 0x29d   : > { %v2650_v11 = vrot.slane %v2464_v44, 1  ;;  %v2485_v42 = vadd.f32 %v3765_v2, %v2259_v22  ;;  %v5773_v60 = vld [vmem:[#allocation35_spill] sm:$0xff] }
 0x29e   : > { %v2267_v34 = vpop.f32.mrf.mxu1  ;;  %v2476_v21 = vpop.f32.mrf.mxu0 }
 0x29f   : > { %v2683_v41 = vsel %vm2670_vm1, %v2650_v11, %v2666_v28  ;;  %v2699_v15 = vsel %vm2670_vm1, %v2634_v3, %v2650_v11  ;;  %v2477_v54 = vadd.f32 %v2476_v21, %v2251_v49  ;;  %v2636_v32 = vrot.slane %v2485_v42, 1  ;;  %v5774_v21 = vld [vmem:[#allocation9_spill] sm:$0xff] }
 0x2a0   : > { %v5488_v55 = vadd.f32 %v2699_v15, %v5183_v50  ;;  %v5491_v18 = vadd.f32 %v2683_v41, %v5193_v14  ;;  %v2269_v0 = vpop.f32.mrf.mxu1  ;;  %v3766_v7 = vpop.f32.mrf.mxu0 }
 0x2a1   : > { %v2651_v52 = vrot.slane %v2477_v54, 1  ;;  %v2488_v31 = vadd.f32 %v3766_v7, %v2262_v38 }
 0x2a2   : > { %v2758_v45 = vadd.f32 %v2757_v8, %v5488_v55  ;;  %v3436_v43 = vpack.c.bf16 %v5491_v18, %v5488_v55  ;;  %v2270_v51 = vpop.f32.mrf.mxu1  ;;  %v2479_v49 = vpop.f32.mrf.mxu0 }
 0x2a3   : > { %v2700_v50 = vsel %vm2670_vm1, %v2635_v29, %v2651_v52  ;;  %v2652_v62 = vrot.slane %v2488_v31, 1  ;;  %v2480_v33 = vadd.f32 %v2479_v49, %v2254_v35 }
 0x2a4   : > { %v2759_v14 = vadd.f32 %v2758_v45, %v5491_v18  ;;  %3479 = vst [vmem:[%s5250_s7 + $0x60] sm:$0xff] %v3436_v43   ;;  %v2729_v17 = vadd.f32 %v2700_v50, %v5772_v47  ;;  %v2272_v22 = vpop.f32.mrf.mxu1  ;;  %v3769_v37 = vpop.f32.mrf.mxu0 }
 0x2a5   : > { %v2667_v40 = vrot.slane %v2480_v33, 1  ;;  %v2701_v44 = vsel %vm2670_vm1, %v2636_v32, %v2652_v62  ;;  %v5777_v32 = vld [vmem:[#allocation34_spill] sm:$0xff] }
 0x2a6   : > { %v2760_v27 = vadd.f32 %v2759_v14, %v2729_v17  ;;  %v2275_v38 = vpop.f32.mrf.mxu1  ;;  %v2492_v19 = vpop.f32.mrf.mxu0  ;;  %v2731_v41 = vadd.f32 %v2701_v44, %v5774_v21 }
 0x2a7   : > { %v2684_v8 = vsel %vm2670_vm1, %v2651_v52, %v2667_v40  ;;  %v2493_v35 = vadd.f32 %v2492_v19, %v2267_v34  ;;  %v2501_v36 = vadd.f32 %v3769_v37, %v2275_v38  ;;  %v5775_v34 = vld [vmem:[#allocation32_spill] sm:$0xff] }
 0x2a8   : > { %v2730_v2 = vadd.f32 %v2684_v8, %v5773_v60  ;;  %v2277_v28 = vpop.f32.mrf.mxu1  ;;  %v3770_v3 = vpop.f32.mrf.mxu0 }
 0x2a9   : > { %v2668_v11 = vrot.slane %v2493_v35, 1  ;;  %v2653_v49 = vrot.slane %v2501_v36, 1 }
 0x2aa   : > { %v2761_v15 = vadd.f32 %v2760_v27, %v2730_v2  ;;  %v3441_v54 = vpack.c.bf16 %v2730_v2, %v2729_v17  ;;  %v2278_v0 = vpop.f32.mrf.mxu1  ;;  %v2495_v7 = vpop.f32.mrf.mxu0 }
 0x2ab   : > { %v2685_v29 = vsel %vm2670_vm1, %v2652_v62, %v2668_v11  ;;  %v2504_v42 = vadd.f32 %v3770_v3, %v2278_v0  ;;  %v2496_v31 = vadd.f32 %v2495_v7, %v2270_v51  ;;  %v5776_v51 = vld [vmem:[#allocation10_spill] sm:$0xff] }
 0x2ac   : > { %3480 = vst [vmem:[%s5250_s7 + $0x68] sm:$0xff] %v3441_v54   ;;  %v2732_v52 = vadd.f32 %v2685_v29, %v5775_v34  ;;  %v2762_v45 = vadd.f32 %v2761_v15, %v2731_v41  ;;  %v2280_v43 = vpop.f32.mrf.mxu1 }
 0x2ad   : > { %v2669_v50 = vrot.slane %v2504_v42, 1  ;;  %v2637_v33 = vrot.slane %v2496_v31, 1 }
 0x2ae   : > { %v2763_v14 = vadd.f32 %v2762_v45, %v2732_v52  ;;  %v3446_v47 = vpack.c.bf16 %v2732_v52, %v2731_v41 }
 0x2af   : > { %v2686_v22 = vsel %vm2670_vm1, %v2653_v49, %v2669_v50  ;;  %v2702_v62 = vsel %vm2670_vm1, %v2637_v33, %v2653_v49 }
 0x2b0   : > { %3481 = vst [vmem:[%s5250_s7 + $0x70] sm:$0xff] %v3446_v47   ;;  %v2734_v37 = vadd.f32 %v2686_v22, %v5776_v51  ;;  %v2733_v40 = vadd.f32 %v2702_v62, %v5777_v32 }
 0x2b2   : > { %v2764_v27 = vadd.f32 %v2763_v14, %v2733_v40  ;;  %v3451_v38 = vpack.c.bf16 %v2734_v37, %v2733_v40 }
 0x2b4   : > { %v2765_v19 = vadd.f32 %v2764_v27, %v2734_v37  ;;  %3482 = vst [vmem:[%s5250_s7 + $0x78] sm:$0xff] %v3451_v38  }
 0x2b6   : > { %v2766_v44 = vrot.slane %v2765_v19, 4 }
 0x2b8   : > { %v2767_v8 = vadd.f32 %v2766_v44, %v2765_v19 }
 0x2ba   : > { %v2768_v35 = vrot.slane %v2767_v8, 2 }
 0x2bc   : > { %v2769_v60 = vadd.f32 %v2768_v35, %v2767_v8 }
 0x2be   : > { %v2770_v28 = vrot.slane %v2769_v60, 1 }
 0x2c0   : > { %v2771_v6 = vadd.f32 %v2770_v28, %v2769_v60 }
 0x2c2   : > { %2874 = vst [vmem:[%s265_s9] sm:$0x1] %v2771_v6  ;;  %v2772_v3 = vmul.f32 0.00390625, %v2771_v6 }
 0x2c4   : > { %v2789_v36 = vsub.f32 %v5414_v16, %v2772_v3  ;;  %v5525_v11 = vsub.f32 %v5417_v23, %v2772_v3  ;;  %v5528_v21 = vsub.f32 %v5433_v46, %v2772_v3  ;;  %v5531_v15 = vsub.f32 %v5443_v24, %v2772_v3 }
 0x2c5   : > { %v5534_v54 = vsub.f32 %v5447_v1, %v2772_v3  ;;  %v5537_v0 = vsub.f32 %v5457_v9, %v2772_v3  ;;  %v5540_v7 = vsub.f32 %v5472_v5, %v2772_v3  ;;  %v5543_v16 = vsub.f32 %v5469_v26, %v2772_v3 }
 0x2c6   : > { %v5546_v23 = vsub.f32 %v5488_v55, %v2772_v3  ;;  %v5549_v46 = vsub.f32 %v5491_v18, %v2772_v3  ;;  %v5551_v24 = vsub.f32 %v2729_v17, %v2772_v3  ;;  %v5553_v29 = vsub.f32 %v2730_v2, %v2772_v3 }
 0x2c7   : > { %v5555_v1 = vsub.f32 %v2731_v41, %v2772_v3  ;;  %v5557_v9 = vsub.f32 %v2732_v52, %v2772_v3  ;;  %v5559_v42 = vsub.f32 %v2733_v40, %v2772_v3  ;;  %v5561_v5 = vsub.f32 %v2734_v37, %v2772_v3 }
 0x2c8   : > { %v2773_v26 = vsub.f32 %v5240_v20, %v2772_v3  ;;  %v2774_v55 = vsub.f32 %v5243_v56, %v2772_v3  ;;  %v2775_v31 = vsub.f32 %v5263_v61, %v2772_v3  ;;  %v2776_v17 = vsub.f32 %v5275_v53, %v2772_v3 }
 0x2c9   : > { %v2777_v2 = vsub.f32 %v5289_v12, %v2772_v3  ;;  %v2778_v52 = vsub.f32 %v5293_v13, %v2772_v3  ;;  %v2779_v50 = vsub.f32 %v5309_v63, %v2772_v3  ;;  %v2780_v56 = vsub.f32 %v5306_v58, %v2772_v3 }
 0x2ca   : > { %v2805_v18 = vmul.f32 %v2773_v26, %v2773_v26  ;;  %v2806_v34 = vmul.f32 %v2774_v55, %v2774_v55  ;;  %v2807_v41 = vmul.f32 %v2775_v31, %v2775_v31  ;;  %v2808_v43 = vmul.f32 %v2776_v17, %v2776_v17 }
 0x2cb   : > { %v2809_v33 = vmul.f32 %v2777_v2, %v2777_v2  ;;  %v2810_v14 = vmul.f32 %v2778_v52, %v2778_v52  ;;  %v2781_v47 = vsub.f32 %v5331_v59, %v2772_v3  ;;  %v2811_v22 = vmul.f32 %v2779_v50, %v2779_v50 }
 0x2cc   : > { %v2837_v45 = vadd.f32 %v2806_v34, %v2805_v18  ;;  %v2782_v12 = vsub.f32 %v5334_v48, %v2772_v3  ;;  %v2812_v62 = vmul.f32 %v2780_v56, %v2780_v56  ;;  %v2783_v13 = vsub.f32 %v5349_v4, %v2772_v3 }
 0x2cd   : > { %v2813_v37 = vmul.f32 %v2781_v47, %v2781_v47  ;;  %v2784_v63 = vsub.f32 %v5364_v57, %v2772_v3  ;;  %v2785_v58 = vsub.f32 %v5354_v30, %v2772_v3  ;;  %v2786_v59 = vsub.f32 %v5377_v10, %v2772_v3 }
 0x2ce   : > { %v2838_v49 = vadd.f32 %v2837_v45, %v2807_v41  ;;  %v2814_v40 = vmul.f32 %v2782_v12, %v2782_v12  ;;  %v2815_v38 = vmul.f32 %v2783_v13, %v2783_v13  ;;  %v2787_v48 = vsub.f32 %v5393_v25, %v2772_v3 }
 0x2cf   : > { %v2816_v44 = vmul.f32 %v2784_v63, %v2784_v63  ;;  %v2817_v35 = vmul.f32 %v2785_v58, %v2785_v58  ;;  %v2788_v4 = vsub.f32 %v5390_v39, %v2772_v3  ;;  %v2818_v28 = vmul.f32 %v2786_v59, %v2786_v59 }
 0x2d0   : > { %v2839_v20 = vadd.f32 %v2838_v49, %v2808_v43  ;;  %v2819_v26 = vmul.f32 %v2787_v48, %v2787_v48  ;;  %v2821_v18 = vmul.f32 %v2789_v36, %v2789_v36  ;;  %v2822_v34 = vmul.f32 %v5525_v11, %v5525_v11 }
 0x2d1   : > { %v2820_v55 = vmul.f32 %v2788_v4, %v2788_v4  ;;  %v2823_v17 = vmul.f32 %v5528_v21, %v5528_v21  ;;  %v2824_v2 = vmul.f32 %v5531_v15, %v5531_v15  ;;  %v2825_v3 = vmul.f32 %v5534_v54, %v5534_v54 }
 0x2d2   : > { %v2840_v61 = vadd.f32 %v2839_v20, %v2809_v33  ;;  %v2826_v36 = vmul.f32 %v5537_v0, %v5537_v0  ;;  %v2827_v11 = vmul.f32 %v5540_v7, %v5540_v7  ;;  %v2828_v21 = vmul.f32 %v5543_v16, %v5543_v16 }
 0x2d3   : > { %v2829_v15 = vmul.f32 %v5546_v23, %v5546_v23  ;;  %v2830_v54 = vmul.f32 %v5549_v46, %v5549_v46  ;;  %v2831_v0 = vmul.f32 %v5551_v24, %v5551_v24  ;;  %v2832_v7 = vmul.f32 %v5553_v29, %v5553_v29 }
 0x2d4   : > { %v2841_v53 = vadd.f32 %v2840_v61, %v2810_v14  ;;  %v2833_v16 = vmul.f32 %v5555_v1, %v5555_v1  ;;  %v2834_v23 = vmul.f32 %v5557_v9, %v5557_v9  ;;  %v2835_v46 = vmul.f32 %v5559_v42, %v5559_v42 }
 0x2d5   : > { %v2836_v24 = vmul.f32 %v5561_v5, %v5561_v5 }
 0x2d6   : > { %v2842_v51 = vadd.f32 %v2841_v53, %v2811_v22 }
 0x2d8   : > { %v2843_v32 = vadd.f32 %v2842_v51, %v2812_v62 }
 0x2da   : > { %v2844_v27 = vadd.f32 %v2843_v32, %v2813_v37 }
 0x2dc   : > { %v2845_v19 = vadd.f32 %v2844_v27, %v2814_v40 }
 0x2de   : > { %v2846_v8 = vadd.f32 %v2845_v19, %v2815_v38 }
 0x2e0   : > { %v2847_v60 = vadd.f32 %v2846_v8, %v2816_v44 }
 0x2e2   : > { %v2848_v6 = vadd.f32 %v2847_v60, %v2817_v35 }
 0x2e4   : > { %v2849_v57 = vadd.f32 %v2848_v6, %v2818_v28 }
 0x2e6   : > { %v2850_v31 = vadd.f32 %v2849_v57, %v2819_v26 }
 0x2e8   : > { %v2851_v30 = vadd.f32 %v2850_v31, %v2820_v55 }
 0x2ea   : > { %v2852_v10 = vadd.f32 %v2851_v30, %v2821_v18 }
 0x2ec   : > { %v2853_v25 = vadd.f32 %v2852_v10, %v2822_v34 }
 0x2ee   : > { %v2854_v39 = vadd.f32 %v2853_v25, %v2823_v17 }
 0x2f0   : > { %v2855_v41 = vadd.f32 %v2854_v39, %v2824_v2 }
 0x2f2   : > { %v2856_v45 = vadd.f32 %v2855_v41, %v2825_v3 }
 0x2f4   : > { %v2857_v52 = vadd.f32 %v2856_v45, %v2826_v36 }
 0x2f6   : > { %v2858_v43 = vadd.f32 %v2857_v52, %v2827_v11 }
 0x2f8   : > { %v2859_v49 = vadd.f32 %v2858_v43, %v2828_v21 }
 0x2fa   : > { %v2860_v50 = vadd.f32 %v2859_v49, %v2829_v15 }
 0x2fc   : > { %v2861_v33 = vadd.f32 %v2860_v50, %v2830_v54 }
 0x2fe   : > { %v2862_v20 = vadd.f32 %v2861_v33, %v2831_v0 }
 0x300   : > { %v2863_v56 = vadd.f32 %v2862_v20, %v2832_v7 }
 0x302   : > { %v2864_v14 = vadd.f32 %v2863_v56, %v2833_v16 }
 0x304   : > { %v2865_v61 = vadd.f32 %v2864_v14, %v2834_v23 }
 0x306   : > { %v2866_v47 = vadd.f32 %v2865_v61, %v2835_v46 }
 0x308   : > { %v2867_v22 = vadd.f32 %v2866_v47, %v2836_v24 }
 0x30a   : > { %v2868_v29 = vrot.slane %v2867_v22, 4 }
 0x30c   : > { %v2869_v53 = vadd.f32 %v2868_v29, %v2867_v22 }
 0x30e   : > { %v2870_v12 = vrot.slane %v2869_v53, 2 }
 0x310   : > { %v2871_v62 = vadd.f32 %v2870_v12, %v2869_v53 }
 0x312   : > { %v2872_v51 = vrot.slane %v2871_v62, 1 }
 0x314   : > { %v2873_v1 = vadd.f32 %v2872_v51, %v2871_v62 }
 0x316   : > { %2875 = vst [vmem:[%s268_s11] sm:$0x1] %v2873_v1 }
 0x317 PF: > { %s17_s21 = sadd.s32 1, %s3874_s21  }
 0x318   : > { %p14_p4 = scmp.ge.s32.totalorder %s17_s21, 4  }
 0x31a   :  { %16 = sbr.rel (!%p14_p4) target bundleno = 1 (0x1), region = 90 }

</bundles_post_ra>
